<compile_context>
chip_gen: v6e
topology: v6e:2x2x1
jax: 0.10.0
libtpu: 0.0.40
codegen_flags: <defaults>
</compile_context>

<pallas_src>
import jax
import jax.numpy as jnp
from jax.experimental import pallas as pl
from jax.experimental.pallas import tpu as pltpu

LEAKY_SLOPE = 0.2
BN_EPS = 1e-5

# bf16 distances halve HBM traffic into top_k; near-tied neighbors may be
# reordered vs an f32 reference.  Flip to jnp.float32 for exact ordering.
DIST_DTYPE = jnp.bfloat16


def _leaky_relu(x):
    return jnp.where(x > 0, x, LEAKY_SLOPE * x)


def _pick_tile(n, cands=(1024, 512, 256, 128)):
    """Largest candidate tile that divides n; else the full extent."""
    for t in cands:
        if n > t and n % t == 0:
            return t
    return n


def _pick_kb(k, tn, c, budget=4 << 20):
    """Neighbors per grid step: largest of 8/4/2 dividing k within a byte cap."""
    for kb in (8, 4, 2):
        if k % kb == 0 and kb * tn * c * 2 <= budget:
            return kb
    return 1


# ---------------------------------------------------------------------------
# Kernel 1: per-batch pairwise  -||xi - xj||^2  (kNN distance matrix),
# column-tiled over the second N axis.  Squared norms are precomputed in JAX
# and passed in; the inner product is a bf16 MXU matmul with f32 accumulation.
# ---------------------------------------------------------------------------
def _neg_sqdist_kernel(x_ref, xc_ref, sqr_ref, sqc_ref, d_ref):
    # x_ref: (N, C) bf16; xc_ref: (TJ, C) bf16; sqr: (N,1) f32; sqc: (1,TJ) f32
    inner = jax.lax.dot_general(x_ref[...], xc_ref[...],
                                (((1,), (1,)), ((), ())),
                                preferred_element_type=jnp.float32)  # (N, TJ)
    d = 2.0 * inner - sqr_ref[...] - sqc_ref[...]
    d_ref[...] = d.astype(d_ref.dtype)


def neg_sqdist(x_bf, sq_row, sq_col):
    # x_bf: (B,N,C) bf16; sq_row: (B,N,1) f32; sq_col: (B,1,N) f32
    B, N, C = x_bf.shape
    TJ = _pick_tile(N, (1024, 512, 256, 128))
    return pl.pallas_call(
        _neg_sqdist_kernel,
        out_shape=jax.ShapeDtypeStruct((B, N, N), DIST_DTYPE),
        grid=(B, N // TJ),
        in_specs=[
            pl.BlockSpec((None, N, C), lambda b, j: (b, 0, 0)),    # all points
            pl.BlockSpec((None, TJ, C), lambda b, j: (b, j, 0)),   # column slab
            pl.BlockSpec((None, N, 1), lambda b, j: (b, 0, 0)),
            pl.BlockSpec((None, 1, TJ), lambda b, j: (b, 0, j)),
        ],
        out_specs=pl.BlockSpec((None, N, TJ), lambda b, j: (b, 0, j)),
        compiler_params=pltpu.CompilerParams(
            dimension_semantics=("parallel", "parallel")),
    )(x_bf, x_bf, sq_row, sq_col)


# ---------------------------------------------------------------------------
# Kernel 2: EdgeConv block, split-weight form:
#   y = leaky( nbr @ Wa' + center @ (Wb - Wa)' + shift ),  max over k
# grid = (B, N-tiles, K-blocks).  KB neighbors per step; center term computed
# once per (b, n-tile) into scratch; running max accumulated in o_ref (bf16,
# VMEM resident across the kb axis).
# ---------------------------------------------------------------------------
def _edgeconv_kernel(nbr_ref, ctr_ref, wa_ref, wd_ref, sh_ref, o_ref, cterm_ref):
    kb = pl.program_id(2)

    @pl.when(kb == 0)
    def _():
        cterm_ref[...] = (jnp.dot(ctr_ref[...], wd_ref[...],
                                  preferred_element_type=jnp.float32)
                          + sh_ref[...])

    cterm = cterm_ref[...]
    kb_count = nbr_ref.shape[0]
    tile_max = None
    for j in range(kb_count):                      # static short loop over KB
        y = _leaky_relu(jnp.dot(nbr_ref[j], wa_ref[...],
                                preferred_element_type=jnp.float32) + cterm)
        tile_max = y if tile_max is None else jnp.maximum(tile_max, y)
    tile_max = tile_max.astype(o_ref.dtype)

    @pl.when(kb == 0)
    def _():
        o_ref[...] = tile_max

    @pl.when(kb > 0)
    def _():
        o_ref[...] = jnp.maximum(o_ref[...], tile_max)


def edgeconv(nbr, center, wa, wd, shift):
    # nbr: (B,K,N,C) bf16; center: (B,N,C) bf16; wa/wd: (C,Cout) bf16
    B, K, N, C = nbr.shape
    Cout = wa.shape[1]
    TN = _pick_tile(N, (512, 256, 128))
    KB = _pick_kb(K, TN, C)
    return pl.pallas_call(
        _edgeconv_kernel,
        out_shape=jax.ShapeDtypeStruct((B, N, Cout), jnp.bfloat16),
        grid=(B, N // TN, K // KB),
        in_specs=[
            pl.BlockSpec((None, KB, TN, C), lambda b, n, kb: (b, kb, n, 0)),
            pl.BlockSpec((None, TN, C), lambda b, n, kb: (b, n, 0)),
            pl.BlockSpec((C, Cout), lambda b, n, kb: (0, 0)),
            pl.BlockSpec((C, Cout), lambda b, n, kb: (0, 0)),
            pl.BlockSpec((1, Cout), lambda b, n, kb: (0, 0)),
        ],
        out_specs=pl.BlockSpec((None, TN, Cout), lambda b, n, kb: (b, n, 0)),
        scratch_shapes=[pltpu.VMEM((TN, Cout), jnp.float32)],   # center term
        compiler_params=pltpu.CompilerParams(
            dimension_semantics=("parallel", "parallel", "arbitrary")),
    )(nbr, center, wa, wd, shift)


# ---------------------------------------------------------------------------
# Kernel 3: conv5 (1x1 conv 512 -> emb) + folded BN + LeakyReLU, N-tiled.
# x1..x4 enter separately (no concat); w5 is split into four row blocks.
# Max/mean pools accumulate directly into their VMEM-resident output blocks.
# ---------------------------------------------------------------------------
def conv5_pool(x1, x2, x3, x4, w5a, w5b, w5c, w5d, shift):
    B, N, _ = x1.shape
    E = w5a.shape[1]
    TN = _pick_tile(N, (1024, 512, 256, 128))
    inv_n = 1.0 / float(N)

    def kernel(x1_ref, x2_ref, x3_ref, x4_ref, wa, wb, wc, wd, sh_ref,
               emb_ref, max_ref, mean_ref):
        n = pl.program_id(1)
        y = (jnp.dot(x1_ref[...], wa[...], preferred_element_type=jnp.float32)
             + jnp.dot(x2_ref[...], wb[...], preferred_element_type=jnp.float32)
             + jnp.dot(x3_ref[...], wc[...], preferred_element_type=jnp.float32)
             + jnp.dot(x4_ref[...], wd[...], preferred_element_type=jnp.float32))
        y = _leaky_relu(y + sh_ref[...])
        emb_ref[...] = y.astype(emb_ref.dtype)
        tile_max = jnp.max(y, axis=0, keepdims=True)
        tile_sum = jnp.sum(y, axis=0, keepdims=True)

        @pl.when(n == 0)
        def _():
            max_ref[...] = tile_max
            mean_ref[...] = tile_sum

        @pl.when(n > 0)
        def _():
            max_ref[...] = jnp.maximum(max_ref[...], tile_max)
            mean_ref[...] = mean_ref[...] + tile_sum

        @pl.when(n == pl.num_programs(1) - 1)
        def _():
            mean_ref[...] = mean_ref[...] * inv_n

    return pl.pallas_call(
        kernel,
        out_shape=(
            jax.ShapeDtypeStruct((B, N, E), jnp.bfloat16),   # per-point emb
            jax.ShapeDtypeStruct((B, 1, E), jnp.float32),    # max pool
            jax.ShapeDtypeStruct((B, 1, E), jnp.float32),    # mean pool
        ),
        grid=(B, N // TN),
        in_specs=[
            pl.BlockSpec((None, TN, x1.shape[2]), lambda b, n: (b, n, 0)),
            pl.BlockSpec((None, TN, x2.shape[2]), lambda b, n: (b, n, 0)),
            pl.BlockSpec((None, TN, x3.shape[2]), lambda b, n: (b, n, 0)),
            pl.BlockSpec((None, TN, x4.shape[2]), lambda b, n: (b, n, 0)),
            pl.BlockSpec(w5a.shape, lambda b, n: (0, 0)),
            pl.BlockSpec(w5b.shape, lambda b, n: (0, 0)),
            pl.BlockSpec(w5c.shape, lambda b, n: (0, 0)),
            pl.BlockSpec(w5d.shape, lambda b, n: (0, 0)),
            pl.BlockSpec((1, E), lambda b, n: (0, 0)),
        ],
        out_specs=(
            pl.BlockSpec((None, TN, E), lambda b, n: (b, n, 0)),
            pl.BlockSpec((None, 1, E), lambda b, n: (b, 0, 0)),
            pl.BlockSpec((None, 1, E), lambda b, n: (b, 0, 0)),
        ),
        compiler_params=pltpu.CompilerParams(
            dimension_semantics=("parallel", "arbitrary")),
    )(x1, x2, x3, x4, w5a, w5b, w5c, w5d, shift)


# ---------------------------------------------------------------------------
# Kernel 4: segmentation MLP head.  x_seg=(B,N,3E) is never materialized: the
# global (max/mean) part of linear1 is applied as a per-batch bias inside the
# kernel.  BN scales pre-folded; Dropout = identity.  Classifier weights are
# zero-padded to 128 lanes; the padded logits are sliced outside.
# ---------------------------------------------------------------------------
def _head_kernel(xe_ref, xg_ref, w1e_ref, w1g_ref, sh6_ref,
                 w2_ref, sh7_ref, w3_ref, b3_ref, o_ref):
    gb = (jnp.dot(xg_ref[...].astype(jnp.bfloat16), w1g_ref[...],
                  preferred_element_type=jnp.float32) + sh6_ref[...])   # (1,H)
    h = _leaky_relu(jnp.dot(xe_ref[...], w1e_ref[...],
                            preferred_element_type=jnp.float32) + gb)
    h = _leaky_relu(jnp.dot(h.astype(jnp.bfloat16), w2_ref[...],
                            preferred_element_type=jnp.float32) + sh7_ref[...])
    o_ref[...] = (jnp.dot(h.astype(jnp.bfloat16), w3_ref[...],
                          preferred_element_type=jnp.float32) + b3_ref[...])


def seg_head(x_emb, x_global, w1e, w1g, sh6, w2, sh7, w3, b3):
    B, N, E = x_emb.shape
    G = x_global.shape[-1]
    H = w1e.shape[1]
    Pp = w3.shape[1]                      # padded (multiple of 128) class dim
    TN = _pick_tile(N, (1024, 512, 256, 128))
    return pl.pallas_call(
        _head_kernel,
        out_shape=jax.ShapeDtypeStruct((B, N, Pp), jnp.float32),
        grid=(B, N // TN),
        in_specs=[
            pl.BlockSpec((None, TN, E), lambda b, n: (b, n, 0)),
            pl.BlockSpec((None, 1, G), lambda b, n: (b, 0, 0)),
            pl.BlockSpec((E, H), lambda b, n: (0, 0)),
            pl.BlockSpec((G, H), lambda b, n: (0, 0)),
            pl.BlockSpec((1, H), lambda b, n: (0, 0)),
            pl.BlockSpec((H, H), lambda b, n: (0, 0)),
            pl.BlockSpec((1, H), lambda b, n: (0, 0)),
            pl.BlockSpec((H, Pp), lambda b, n: (0, 0)),
            pl.BlockSpec((1, Pp), lambda b, n: (0, 0)),
        ],
        out_specs=pl.BlockSpec((None, TN, Pp), lambda b, n: (b, n, 0)),
        compiler_params=pltpu.CompilerParams(
            dimension_semantics=("parallel", "parallel")),
    )(x_emb, x_global, w1e, w1g, sh6, w2, sh7, w3, b3)


# ---------------------------------------------------------------------------
# Glue: graph feature construction.  top-k + gather stay in plain JAX.  Only
# the gathered neighbor tensor (B, K, N, C) is materialized (bf16); the small
# (B, N, k) index tensor is transposed instead of the big feature tensor.
# ---------------------------------------------------------------------------
def graph_feature_nbr(x_bf, k):
    # x_bf: (B, N, C) bf16 -> nbr (B, k, N, C) bf16
    sq = jnp.sum(jnp.square(x_bf.astype(jnp.float32)), axis=-1)   # (B, N) f32
    d = neg_sqdist(x_bf, sq[:, :, None], sq[:, None, :])          # Pallas
    idx = jax.lax.top_k(d, k)[1]                                  # (B, N, k)
    idx_t = jnp.transpose(idx, (0, 2, 1))                         # (B, k, N)
    nbr = jax.vmap(lambda a, i: a[i])(x_bf, idx_t)                # (B, k, N, C)
    return nbr


def dgcnn_forward(pts, params, k, num_part_classes):
    # pts: (B, N, 3) -> logits (B, N, num_part_classes)
    x0 = pts.astype(jnp.bfloat16)

    nbr = graph_feature_nbr(x0, k)
    x1 = edgeconv(nbr, x0, *params["c1"])            # (B, N, 64)  bf16
    nbr = graph_feature_nbr(x1, k)
    x2 = edgeconv(nbr, x1, *params["c2"])            # (B, N, 64)
    nbr = graph_feature_nbr(x2, k)
    x3 = edgeconv(nbr, x2, *params["c3"])            # (B, N, 128)
    nbr = graph_feature_nbr(x3, k)
    x4 = edgeconv(nbr, x3, *params["c4"])            # (B, N, 256)

    x_emb, x_max, x_mean = conv5_pool(x1, x2, x3, x4, *params["c5"])
    x_global = jnp.concatenate([x_max, x_mean], axis=-1)          # (B, 1, 2E)

    logits_pad = seg_head(x_emb, x_global,
                          params["w1e"], params["w1g"], params["sh6"],
                          params["w2"], params["sh7"],
                          params["w3"], params["b3"])
    return logits_pad[..., :num_part_classes]


# ---------------------------------------------------------------------------
# Deterministic parameter init (shapes follow DGCNNPartSeg.__init__), with BN
# scales folded into the weights and weights split/cast for the kernels.
# ---------------------------------------------------------------------------
def init_params(key, emb_dims, num_part_classes):
    keys = jax.random.split(key, 16)

    def conv_w(kk, cin, cout):
        return jax.random.normal(kk, (cin, cout), jnp.float32) / jnp.sqrt(cin)

    def bn(kk, c):
        k1, k2, k3, k4 = jax.random.split(kk, 4)
        gamma = jax.random.uniform(k1, (c,), jnp.float32, minval=0.5, maxval=1.5)
        beta = 0.1 * jax.random.normal(k2, (c,), jnp.float32)
        mean = 0.1 * jax.random.normal(k3, (c,), jnp.float32)
        var = jax.random.uniform(k4, (c,), jnp.float32, minval=0.5, maxval=1.5)
        scale = gamma / jnp.sqrt(var + BN_EPS)
        shift = beta - mean * scale
        return scale, shift

    def edge_layer(kw, kb, cin2, cout):
        # PyTorch edge feature = concat([x_j - x_i, x_i]); weight rows [Wa; Wb]
        w = conv_w(kw, cin2, cout)                   # (2C, Cout)
        scale, shift = bn(kb, cout)
        c = cin2 // 2
        wa = (w[:c] * scale[None, :]).astype(jnp.bfloat16)
        wd = ((w[c:] - w[:c]) * scale[None, :]).astype(jnp.bfloat16)
        return wa, wd, shift[None, :].astype(jnp.float32)

    E = emb_dims

    # conv5 + bn5, split into the four row blocks matching x1..x4 channels
    w5 = conv_w(keys[8], 512, E)
    s5, sh5 = bn(keys[9], E)
    w5f = w5 * s5[None, :]
    w5a = w5f[:64].astype(jnp.bfloat16)
    w5b = w5f[64:128].astype(jnp.bfloat16)
    w5c = w5f[128:256].astype(jnp.bfloat16)
    w5d = w5f[256:512].astype(jnp.bfloat16)

    # linear1 (3E -> 256, no bias) + bn6, split into emb / global parts
    wl1 = conv_w(keys[10], 3 * E, 256)
    s6, sh6 = bn(keys[11], 256)
    wl1f = wl1 * s6[None, :]
    w1e = wl1f[:E].astype(jnp.bfloat16)              # multiplies x_emb
    w1g = wl1f[E:].astype(jnp.bfloat16)              # multiplies [x_max, x_mean]

    # linear2 + bn7
    wl2 = conv_w(keys[12], 256, 256)
    s7, sh7 = bn(keys[13], 256)
    w2 = (wl2 * s7[None, :]).astype(jnp.bfloat16)

    # linear3 (with bias), zero-padded to a multiple of 128 output lanes
    P = num_part_classes
    P_pad = ((P + 127) // 128) * 128
    wl3 = conv_w(keys[14], 256, P)
    bl3 = 0.01 * jax.random.normal(keys[15], (P,), jnp.float32)
    w3 = jnp.zeros((256, P_pad), jnp.float32).at[:, :P].set(wl3).astype(jnp.bfloat16)
    b3 = jnp.zeros((1, P_pad), jnp.float32).at[0, :P].set(bl3)

    return dict(
        c1=edge_layer(keys[0], keys[1], 6, 64),
        c2=edge_layer(keys[2], keys[3], 128, 64),
        c3=edge_layer(keys[4], keys[5], 128, 128),
        c4=edge_layer(keys[6], keys[7], 256, 256),
        c5=(w5a, w5b, w5c, w5d, sh5[None, :].astype(jnp.float32)),
        w1e=w1e, w1g=w1g, sh6=sh6[None, :].astype(jnp.float32),
        w2=w2, sh7=sh7[None, :].astype(jnp.float32),
        w3=w3, b3=b3,
    )


if __name__ == "__main__":
    B, N, K = 2, 32, 8          # small shapes; K is the constructor's k
    EMB, NUM_CLS = 64, 16       # constructor params emb_dims / num_part_classes

    key = jax.random.PRNGKey(0)
    pts_key, param_key = jax.random.split(key)
    pts = jax.random.normal(pts_key, (B, N, 3), jnp.float32)
    params = init_params(param_key, EMB, NUM_CLS)

    fwd = jax.jit(lambda p, prm: dgcnn_forward(p, prm, K, NUM_CLS))
    logits = fwd(pts, params)
    jax.block_until_ready(logits)
    assert logits.shape == (B, N, NUM_CLS)
    assert bool(jnp.all(jnp.isfinite(logits)))
    print("KERNEL_OK")
</pallas_src>

<mosaic_0001>
module attributes {stable_mosaic.version = 11 : i64} {
  func.func @_neg_sqdist_kernel(%arg0: i32, %arg1: i32, %arg2: memref<1x32x3xbf16, #tpu.memory_space<vmem>>, %arg3: memref<1x32x3xbf16, #tpu.memory_space<vmem>>, %arg4: memref<1x32x1xf32, #tpu.memory_space<vmem>>, %arg5: memref<1x1x32xf32, #tpu.memory_space<vmem>>, %arg6: memref<1x32x32xbf16, #tpu.memory_space<vmem>>) attributes {dimension_semantics = [#tpu.dimension_semantics<parallel>, #tpu.dimension_semantics<parallel>], iteration_bounds = array<i64: 2, 1>, scalar_prefetch = 0 : i64, scratch_operands = 0 : i64, tpu.core_type = #tpu.core_type<tc>, window_params = [{transform_indices = @transform_0, window_bounds = array<i64: 1, 32, 3>}, {transform_indices = @transform_1, window_bounds = array<i64: 1, 32, 3>}, {transform_indices = @transform_2, window_bounds = array<i64: 1, 32, 1>}, {transform_indices = @transform_3, window_bounds = array<i64: 1, 1, 32>}, {transform_indices = @transform_4, window_bounds = array<i64: 1, 32, 32>}]} {
    %c0 = arith.constant 0 : index
    %c0_0 = arith.constant 0 : index
    %c0_1 = arith.constant 0 : index
    %0 = vector.load %arg2[%c0, %c0_0, %c0_1] : memref<1x32x3xbf16, #tpu.memory_space<vmem>>, vector<1x32x3xbf16>
    %1 = vector.shape_cast %0 : vector<1x32x3xbf16> to vector<32x3xbf16>
    %c0_2 = arith.constant 0 : index
    %c0_3 = arith.constant 0 : index
    %c0_4 = arith.constant 0 : index
    %2 = vector.load %arg3[%c0_2, %c0_3, %c0_4] : memref<1x32x3xbf16, #tpu.memory_space<vmem>>, vector<1x32x3xbf16>
    %3 = vector.shape_cast %2 : vector<1x32x3xbf16> to vector<32x3xbf16>
    %cst = arith.constant dense<0.000000e+00> : vector<32x32xf32>
    %4 = tpu.matmul %1, %3, %cst {dimension_numbers = #tpu.dot_dimension_numbers<[1], [1], [0], [0], [0, 0, 1, 0], [], []>} : vector<32x3xbf16>, vector<32x3xbf16>, vector<32x32xf32> -> vector<32x32xf32>
    %cst_5 = arith.constant 2.000000e+00 : f32
    %5 = vector.broadcast %cst_5 : f32 to vector<32x32xf32>
    %6 = arith.mulf %5, %4 : vector<32x32xf32>
    %c0_6 = arith.constant 0 : index
    %c0_7 = arith.constant 0 : index
    %c0_8 = arith.constant 0 : index
    %7 = vector.load %arg4[%c0_6, %c0_7, %c0_8] : memref<1x32x1xf32, #tpu.memory_space<vmem>>, vector<1x32x1xf32>
    %8 = vector.shape_cast %7 : vector<1x32x1xf32> to vector<32x1xf32>
    %9 = vector.broadcast %8 : vector<32x1xf32> to vector<32x32xf32>
    %10 = arith.subf %6, %9 : vector<32x32xf32>
    %c0_9 = arith.constant 0 : index
    %c0_10 = arith.constant 0 : index
    %c0_11 = arith.constant 0 : index
    %11 = vector.load %arg5[%c0_9, %c0_10, %c0_11] : memref<1x1x32xf32, #tpu.memory_space<vmem>>, vector<1x1x32xf32>
    %12 = vector.shape_cast %11 : vector<1x1x32xf32> to vector<1x32xf32>
    %13 = vector.broadcast %12 : vector<1x32xf32> to vector<32x32xf32>
    %14 = arith.subf %10, %13 : vector<32x32xf32>
    %15 = arith.truncf %14 : vector<32x32xf32> to vector<32x32xbf16>
    %c0_12 = arith.constant 0 : index
    %c0_13 = arith.constant 0 : index
    %c0_14 = arith.constant 0 : index
    %16 = vector.load %arg6[%c0_12, %c0_13, %c0_14] : memref<1x32x32xbf16, #tpu.memory_space<vmem>>, vector<1x32x32xbf16>
    %17 = vector.shape_cast %16 : vector<1x32x32xbf16> to vector<32x32xbf16>
    %18 = vector.shape_cast %15 : vector<32x32xbf16> to vector<1x32x32xbf16>
    tpu.vector_store %arg6[%c0_12, %c0_13, %c0_14], %18 {strides = array<i32>} : memref<1x32x32xbf16, #tpu.memory_space<vmem>>, vector<1x32x32xbf16>,
    return
  }
  func.func @transform_0(%arg0: i32, %arg1: i32) -> (i32, i32, i32) {
    %c0_i32 = arith.constant 0 : i32
    %c0_i32_0 = arith.constant 0 : i32
    %c0_i32_1 = arith.constant 0 : i32
    return %arg0, %c0_i32, %c0_i32_0 : i32, i32, i32
  }
  func.func @transform_1(%arg0: i32, %arg1: i32) -> (i32, i32, i32) {
    %c0_i32 = arith.constant 0 : i32
    %c0_i32_0 = arith.constant 0 : i32
    return %arg0, %arg1, %c0_i32 : i32, i32, i32
  }
  func.func @transform_2(%arg0: i32, %arg1: i32) -> (i32, i32, i32) {
    %c0_i32 = arith.constant 0 : i32
    %c0_i32_0 = arith.constant 0 : i32
    %c0_i32_1 = arith.constant 0 : i32
    return %arg0, %c0_i32, %c0_i32_0 : i32, i32, i32
  }
  func.func @transform_3(%arg0: i32, %arg1: i32) -> (i32, i32, i32) {
    %c0_i32 = arith.constant 0 : i32
    %c0_i32_0 = arith.constant 0 : i32
    return %arg0, %c0_i32, %arg1 : i32, i32, i32
  }
  func.func @transform_4(%arg0: i32, %arg1: i32) -> (i32, i32, i32) {
    %c0_i32 = arith.constant 0 : i32
    %c0_i32_0 = arith.constant 0 : i32
    return %arg0, %c0_i32, %arg1 : i32, i32, i32
  }
}

module attributes {stable_mosaic.version = 11 : i64} {
  func.func @_edgeconv_kernel(%arg0: i32, %arg1: i32, %arg2: i32, %arg3: memref<1x8x32x3xbf16, #tpu.memory_space<vmem>>, %arg4: memref<1x32x3xbf16, #tpu.memory_space<vmem>>, %arg5: memref<3x64xbf16, #tpu.memory_space<vmem>>, %arg6: memref<3x64xbf16, #tpu.memory_space<vmem>>, %arg7: memref<1x64xf32, #tpu.memory_space<vmem>>, %arg8: memref<1x32x64xbf16, #tpu.memory_space<vmem>>, %arg9: memref<32x64xf32, #tpu.memory_space<vmem>>) attributes {dimension_semantics = [#tpu.dimension_semantics<parallel>, #tpu.dimension_semantics<parallel>, #tpu.dimension_semantics<arbitrary>], iteration_bounds = array<i64: 2, 1, 1>, scalar_prefetch = 0 : i64, scratch_operands = 1 : i64, tpu.core_type = #tpu.core_type<tc>, window_params = [{transform_indices = @transform_0, window_bounds = array<i64: 1, 8, 32, 3>}, {transform_indices = @transform_1, window_bounds = array<i64: 1, 32, 3>}, {pipeline_mode = #tpu.pipeline_mode<synchronous>, transform_indices = @transform_2, window_bounds = array<i64: 3, 64>}, {pipeline_mode = #tpu.pipeline_mode<synchronous>, transform_indices = @transform_3, window_bounds = array<i64: 3, 64>}, {pipeline_mode = #tpu.pipeline_mode<synchronous>, transform_indices = @transform_4, window_bounds = array<i64: 1, 64>}, {transform_indices = @transform_5, window_bounds = array<i64: 1, 32, 64>}]} {
    %c0_i32 = arith.constant 0 : i32
    %0 = arith.cmpi eq, %arg2, %c0_i32 : i32
    %1 = arith.extui %0 : i1 to i32
    %c0_i32_0 = arith.constant 0 : i32
    %2 = arith.cmpi ne, %1, %c0_i32_0 : i32
    scf.if %2 {
      %c0_70 = arith.constant 0 : index
      %c0_71 = arith.constant 0 : index
      %c0_72 = arith.constant 0 : index
      %98 = vector.load %arg4[%c0_70, %c0_71, %c0_72] : memref<1x32x3xbf16, #tpu.memory_space<vmem>>, vector<1x32x3xbf16>
      %99 = vector.shape_cast %98 : vector<1x32x3xbf16> to vector<32x3xbf16>
      %c0_73 = arith.constant 0 : index
      %c0_74 = arith.constant 0 : index
      %100 = vector.load %arg6[%c0_73, %c0_74] : memref<3x64xbf16, #tpu.memory_space<vmem>>, vector<3x64xbf16>
      %cst_75 = arith.constant dense<0.000000e+00> : vector<32x64xf32>
      %101 = tpu.matmul %99, %100, %cst_75 {dimension_numbers = #tpu.dot_dimension_numbers<[1], [0], [0], [1], [0, 0, 1, 1], [], []>} : vector<32x3xbf16>, vector<3x64xbf16>, vector<32x64xf32> -> vector<32x64xf32>
      %c0_76 = arith.constant 0 : index
      %c0_77 = arith.constant 0 : index
      %102 = vector.load %arg7[%c0_76, %c0_77] : memref<1x64xf32, #tpu.memory_space<vmem>>, vector<1x64xf32>
      %103 = vector.broadcast %102 : vector<1x64xf32> to vector<32x64xf32>
      %104 = arith.addf %101, %103 : vector<32x64xf32>
      %c0_78 = arith.constant 0 : index
      %c0_79 = arith.constant 0 : index
      %105 = vector.load %arg9[%c0_78, %c0_79] : memref<32x64xf32, #tpu.memory_space<vmem>>, vector<32x64xf32>
      tpu.vector_store %arg9[%c0_78, %c0_79], %104 {strides = array<i32>} : memref<32x64xf32, #tpu.memory_space<vmem>>, vector<32x64xf32>,
    } else {
    }
    %c0 = arith.constant 0 : index
    %c0_1 = arith.constant 0 : index
    %3 = vector.load %arg9[%c0, %c0_1] : memref<32x64xf32, #tpu.memory_space<vmem>>, vector<32x64xf32>
    %c0_2 = arith.constant 0 : index
    %c0_3 = arith.constant 0 : index
    %c0_4 = arith.constant 0 : index
    %c0_5 = arith.constant 0 : index
    %4 = vector.load %arg3[%c0_2, %c0_3, %c0_4, %c0_5] : memref<1x8x32x3xbf16, #tpu.memory_space<vmem>>, vector<1x1x32x3xbf16>
    %5 = vector.shape_cast %4 : vector<1x1x32x3xbf16> to vector<32x3xbf16>
    %c0_6 = arith.constant 0 : index
    %c0_7 = arith.constant 0 : index
    %6 = vector.load %arg5[%c0_6, %c0_7] : memref<3x64xbf16, #tpu.memory_space<vmem>>, vector<3x64xbf16>
    %cst = arith.constant dense<0.000000e+00> : vector<32x64xf32>
    %7 = tpu.matmul %5, %6, %cst {dimension_numbers = #tpu.dot_dimension_numbers<[1], [0], [0], [1], [0, 0, 1, 1], [], []>} : vector<32x3xbf16>, vector<3x64xbf16>, vector<32x64xf32> -> vector<32x64xf32>
    %8 = arith.addf %7, %3 : vector<32x64xf32>
    %cst_8 = arith.constant 0.000000e+00 : f32
    %9 = vector.broadcast %cst_8 : f32 to vector<32x64xf32>
    %10 = arith.cmpf ogt, %8, %9 : vector<32x64xf32>
    %cst_9 = arith.constant 2.000000e-01 : f32
    %11 = vector.broadcast %cst_9 : f32 to vector<32x64xf32>
    %12 = arith.mulf %11, %8 : vector<32x64xf32>
    %13 = arith.select %10, %8, %12 : vector<32x64xi1>, vector<32x64xf32>
    %c0_10 = arith.constant 0 : index
    %c1 = arith.constant 1 : index
    %c0_11 = arith.constant 0 : index
    %c0_12 = arith.constant 0 : index
    %14 = vector.load %arg3[%c0_10, %c1, %c0_11, %c0_12] : memref<1x8x32x3xbf16, #tpu.memory_space<vmem>>, vector<1x1x32x3xbf16>
    %15 = vector.shape_cast %14 : vector<1x1x32x3xbf16> to vector<32x3xbf16>
    %c0_13 = arith.constant 0 : index
    %c0_14 = arith.constant 0 : index
    %16 = vector.load %arg5[%c0_13, %c0_14] : memref<3x64xbf16, #tpu.memory_space<vmem>>, vector<3x64xbf16>
    %cst_15 = arith.constant dense<0.000000e+00> : vector<32x64xf32>
    %17 = tpu.matmul %15, %16, %cst_15 {dimension_numbers = #tpu.dot_dimension_numbers<[1], [0], [0], [1], [0, 0, 1, 1], [], []>} : vector<32x3xbf16>, vector<3x64xbf16>, vector<32x64xf32> -> vector<32x64xf32>
    %18 = arith.addf %17, %3 : vector<32x64xf32>
    %cst_16 = arith.constant 0.000000e+00 : f32
    %19 = vector.broadcast %cst_16 : f32 to vector<32x64xf32>
    %20 = arith.cmpf ogt, %18, %19 : vector<32x64xf32>
    %cst_17 = arith.constant 2.000000e-01 : f32
    %21 = vector.broadcast %cst_17 : f32 to vector<32x64xf32>
    %22 = arith.mulf %21, %18 : vector<32x64xf32>
    %23 = arith.select %20, %18, %22 : vector<32x64xi1>, vector<32x64xf32>
    %24 = arith.maximumf %13, %23 : vector<32x64xf32>
    %c0_18 = arith.constant 0 : index
    %c2 = arith.constant 2 : index
    %c0_19 = arith.constant 0 : index
    %c0_20 = arith.constant 0 : index
    %25 = vector.load %arg3[%c0_18, %c2, %c0_19, %c0_20] : memref<1x8x32x3xbf16, #tpu.memory_space<vmem>>, vector<1x1x32x3xbf16>
    %26 = vector.shape_cast %25 : vector<1x1x32x3xbf16> to vector<32x3xbf16>
    %c0_21 = arith.constant 0 : index
    %c0_22 = arith.constant 0 : index
    %27 = vector.load %arg5[%c0_21, %c0_22] : memref<3x64xbf16, #tpu.memory_space<vmem>>, vector<3x64xbf16>
    %cst_23 = arith.constant dense<0.000000e+00> : vector<32x64xf32>
    %28 = tpu.matmul %26, %27, %cst_23 {dimension_numbers = #tpu.dot_dimension_numbers<[1], [0], [0], [1], [0, 0, 1, 1], [], []>} : vector<32x3xbf16>, vector<3x64xbf16>, vector<32x64xf32> -> vector<32x64xf32>
    %29 = arith.addf %28, %3 : vector<32x64xf32>
    %cst_24 = arith.constant 0.000000e+00 : f32
    %30 = vector.broadcast %cst_24 : f32 to vector<32x64xf32>
    %31 = arith.cmpf ogt, %29, %30 : vector<32x64xf32>
    %cst_25 = arith.constant 2.000000e-01 : f32
    %32 = vector.broadcast %cst_25 : f32 to vector<32x64xf32>
    %33 = arith.mulf %32, %29 : vector<32x64xf32>
    %34 = arith.select %31, %29, %33 : vector<32x64xi1>, vector<32x64xf32>
    %35 = arith.maximumf %24, %34 : vector<32x64xf32>
    %c0_26 = arith.constant 0 : index
    %c3 = arith.constant 3 : index
    %c0_27 = arith.constant 0 : index
    %c0_28 = arith.constant 0 : index
    %36 = vector.load %arg3[%c0_26, %c3, %c0_27, %c0_28] : memref<1x8x32x3xbf16, #tpu.memory_space<vmem>>, vector<1x1x32x3xbf16>
    %37 = vector.shape_cast %36 : vector<1x1x32x3xbf16> to vector<32x3xbf16>
    %c0_29 = arith.constant 0 : index
    %c0_30 = arith.constant 0 : index
    %38 = vector.load %arg5[%c0_29, %c0_30] : memref<3x64xbf16, #tpu.memory_space<vmem>>, vector<3x64xbf16>
    %cst_31 = arith.constant dense<0.000000e+00> : vector<32x64xf32>
    %39 = tpu.matmul %37, %38, %cst_31 {dimension_numbers = #tpu.dot_dimension_numbers<[1], [0], [0], [1], [0, 0, 1, 1], [], []>} : vector<32x3xbf16>, vector<3x64xbf16>, vector<32x64xf32> -> vector<32x64xf32>
    %40 = arith.addf %39, %3 : vector<32x64xf32>
    %cst_32 = arith.constant 0.000000e+00 : f32
    %41 = vector.broadcast %cst_32 : f32 to vector<32x64xf32>
    %42 = arith.cmpf ogt, %40, %41 : vector<32x64xf32>
    %cst_33 = arith.constant 2.000000e-01 : f32
    %43 = vector.broadcast %cst_33 : f32 to vector<32x64xf32>
    %44 = arith.mulf %43, %40 : vector<32x64xf32>
    %45 = arith.select %42, %40, %44 : vector<32x64xi1>, vector<32x64xf32>
    %46 = arith.maximumf %35, %45 : vector<32x64xf32>
    %c0_34 = arith.constant 0 : index
    %c4 = arith.constant 4 : index
    %c0_35 = arith.constant 0 : index
    %c0_36 = arith.constant 0 : index
    %47 = vector.load %arg3[%c0_34, %c4, %c0_35, %c0_36] : memref<1x8x32x3xbf16, #tpu.memory_space<vmem>>, vector<1x1x32x3xbf16>
    %48 = vector.shape_cast %47 : vector<1x1x32x3xbf16> to vector<32x3xbf16>
    %c0_37 = arith.constant 0 : index
    %c0_38 = arith.constant 0 : index
    %49 = vector.load %arg5[%c0_37, %c0_38] : memref<3x64xbf16, #tpu.memory_space<vmem>>, vector<3x64xbf16>
    %cst_39 = arith.constant dense<0.000000e+00> : vector<32x64xf32>
    %50 = tpu.matmul %48, %49, %cst_39 {dimension_numbers = #tpu.dot_dimension_numbers<[1], [0], [0], [1], [0, 0, 1, 1], [], []>} : vector<32x3xbf16>, vector<3x64xbf16>, vector<32x64xf32> -> vector<32x64xf32>
    %51 = arith.addf %50, %3 : vector<32x64xf32>
    %cst_40 = arith.constant 0.000000e+00 : f32
    %52 = vector.broadcast %cst_40 : f32 to vector<32x64xf32>
    %53 = arith.cmpf ogt, %51, %52 : vector<32x64xf32>
    %cst_41 = arith.constant 2.000000e-01 : f32
    %54 = vector.broadcast %cst_41 : f32 to vector<32x64xf32>
    %55 = arith.mulf %54, %51 : vector<32x64xf32>
    %56 = arith.select %53, %51, %55 : vector<32x64xi1>, vector<32x64xf32>
    %57 = arith.maximumf %46, %56 : vector<32x64xf32>
    %c0_42 = arith.constant 0 : index
    %c5 = arith.constant 5 : index
    %c0_43 = arith.constant 0 : index
    %c0_44 = arith.constant 0 : index
    %58 = vector.load %arg3[%c0_42, %c5, %c0_43, %c0_44] : memref<1x8x32x3xbf16, #tpu.memory_space<vmem>>, vector<1x1x32x3xbf16>
    %59 = vector.shape_cast %58 : vector<1x1x32x3xbf16> to vector<32x3xbf16>
    %c0_45 = arith.constant 0 : index
    %c0_46 = arith.constant 0 : index
    %60 = vector.load %arg5[%c0_45, %c0_46] : memref<3x64xbf16, #tpu.memory_space<vmem>>, vector<3x64xbf16>
    %cst_47 = arith.constant dense<0.000000e+00> : vector<32x64xf32>
    %61 = tpu.matmul %59, %60, %cst_47 {dimension_numbers = #tpu.dot_dimension_numbers<[1], [0], [0], [1], [0, 0, 1, 1], [], []>} : vector<32x3xbf16>, vector<3x64xbf16>, vector<32x64xf32> -> vector<32x64xf32>
    %62 = arith.addf %61, %3 : vector<32x64xf32>
    %cst_48 = arith.constant 0.000000e+00 : f32
    %63 = vector.broadcast %cst_48 : f32 to vector<32x64xf32>
    %64 = arith.cmpf ogt, %62, %63 : vector<32x64xf32>
    %cst_49 = arith.constant 2.000000e-01 : f32
    %65 = vector.broadcast %cst_49 : f32 to vector<32x64xf32>
    %66 = arith.mulf %65, %62 : vector<32x64xf32>
    %67 = arith.select %64, %62, %66 : vector<32x64xi1>, vector<32x64xf32>
    %68 = arith.maximumf %57, %67 : vector<32x64xf32>
    %c0_50 = arith.constant 0 : index
    %c6 = arith.constant 6 : index
    %c0_51 = arith.constant 0 : index
    %c0_52 = arith.constant 0 : index
    %69 = vector.load %arg3[%c0_50, %c6, %c0_51, %c0_52] : memref<1x8x32x3xbf16, #tpu.memory_space<vmem>>, vector<1x1x32x3xbf16>
    %70 = vector.shape_cast %69 : vector<1x1x32x3xbf16> to vector<32x3xbf16>
    %c0_53 = arith.constant 0 : index
    %c0_54 = arith.constant 0 : index
    %71 = vector.load %arg5[%c0_53, %c0_54] : memref<3x64xbf16, #tpu.memory_space<vmem>>, vector<3x64xbf16>
    %cst_55 = arith.constant dense<0.000000e+00> : vector<32x64xf32>
    %72 = tpu.matmul %70, %71, %cst_55 {dimension_numbers = #tpu.dot_dimension_numbers<[1], [0], [0], [1], [0, 0, 1, 1], [], []>} : vector<32x3xbf16>, vector<3x64xbf16>, vector<32x64xf32> -> vector<32x64xf32>
    %73 = arith.addf %72, %3 : vector<32x64xf32>
    %cst_56 = arith.constant 0.000000e+00 : f32
    %74 = vector.broadcast %cst_56 : f32 to vector<32x64xf32>
    %75 = arith.cmpf ogt, %73, %74 : vector<32x64xf32>
    %cst_57 = arith.constant 2.000000e-01 : f32
    %76 = vector.broadcast %cst_57 : f32 to vector<32x64xf32>
    %77 = arith.mulf %76, %73 : vector<32x64xf32>
    %78 = arith.select %75, %73, %77 : vector<32x64xi1>, vector<32x64xf32>
    %79 = arith.maximumf %68, %78 : vector<32x64xf32>
    %c0_58 = arith.constant 0 : index
    %c7 = arith.constant 7 : index
    %c0_59 = arith.constant 0 : index
    %c0_60 = arith.constant 0 : index
    %80 = vector.load %arg3[%c0_58, %c7, %c0_59, %c0_60] : memref<1x8x32x3xbf16, #tpu.memory_space<vmem>>, vector<1x1x32x3xbf16>
    %81 = vector.shape_cast %80 : vector<1x1x32x3xbf16> to vector<32x3xbf16>
    %c0_61 = arith.constant 0 : index
    %c0_62 = arith.constant 0 : index
    %82 = vector.load %arg5[%c0_61, %c0_62] : memref<3x64xbf16, #tpu.memory_space<vmem>>, vector<3x64xbf16>
    %cst_63 = arith.constant dense<0.000000e+00> : vector<32x64xf32>
    %83 = tpu.matmul %81, %82, %cst_63 {dimension_numbers = #tpu.dot_dimension_numbers<[1], [0], [0], [1], [0, 0, 1, 1], [], []>} : vector<32x3xbf16>, vector<3x64xbf16>, vector<32x64xf32> -> vector<32x64xf32>
    %84 = arith.addf %83, %3 : vector<32x64xf32>
    %cst_64 = arith.constant 0.000000e+00 : f32
    %85 = vector.broadcast %cst_64 : f32 to vector<32x64xf32>
    %86 = arith.cmpf ogt, %84, %85 : vector<32x64xf32>
    %cst_65 = arith.constant 2.000000e-01 : f32
    %87 = vector.broadcast %cst_65 : f32 to vector<32x64xf32>
    %88 = arith.mulf %87, %84 : vector<32x64xf32>
    %89 = arith.select %86, %84, %88 : vector<32x64xi1>, vector<32x64xf32>
    %90 = arith.maximumf %79, %89 : vector<32x64xf32>
    %91 = arith.truncf %90 : vector<32x64xf32> to vector<32x64xbf16>
    %c0_i32_66 = arith.constant 0 : i32
    %92 = arith.cmpi eq, %arg2, %c0_i32_66 : i32
    %93 = arith.extui %92 : i1 to i32
    %c0_i32_67 = arith.constant 0 : i32
    %94 = arith.cmpi ne, %93, %c0_i32_67 : i32
    scf.if %94 {
      %c0_70 = arith.constant 0 : index
      %c0_71 = arith.constant 0 : index
      %c0_72 = arith.constant 0 : index
      %98 = vector.load %arg8[%c0_70, %c0_71, %c0_72] : memref<1x32x64xbf16, #tpu.memory_space<vmem>>, vector<1x32x64xbf16>
      %99 = vector.shape_cast %98 : vector<1x32x64xbf16> to vector<32x64xbf16>
      %100 = vector.shape_cast %91 : vector<32x64xbf16> to vector<1x32x64xbf16>
      tpu.vector_store %arg8[%c0_70, %c0_71, %c0_72], %100 {strides = array<i32>} : memref<1x32x64xbf16, #tpu.memory_space<vmem>>, vector<1x32x64xbf16>,
    } else {
    }
    %c0_i32_68 = arith.constant 0 : i32
    %95 = arith.cmpi sgt, %arg2, %c0_i32_68 : i32
    %96 = arith.extui %95 : i1 to i32
    %c0_i32_69 = arith.constant 0 : i32
    %97 = arith.cmpi ne, %96, %c0_i32_69 : i32
    scf.if %97 {
      %c0_70 = arith.constant 0 : index
      %c0_71 = arith.constant 0 : index
      %c0_72 = arith.constant 0 : index
      %98 = vector.load %arg8[%c0_70, %c0_71, %c0_72] : memref<1x32x64xbf16, #tpu.memory_space<vmem>>, vector<1x32x64xbf16>
      %99 = vector.shape_cast %98 : vector<1x32x64xbf16> to vector<32x64xbf16>
      %100 = arith.maximumf %99, %91 : vector<32x64xbf16>
      %c0_73 = arith.constant 0 : index
      %c0_74 = arith.constant 0 : index
      %c0_75 = arith.constant 0 : index
      %101 = vector.load %arg8[%c0_73, %c0_74, %c0_75] : memref<1x32x64xbf16, #tpu.memory_space<vmem>>, vector<1x32x64xbf16>
      %102 = vector.shape_cast %101 : vector<1x32x64xbf16> to vector<32x64xbf16>
      %103 = vector.shape_cast %100 : vector<32x64xbf16> to vector<1x32x64xbf16>
      tpu.vector_store %arg8[%c0_73, %c0_74, %c0_75], %103 {strides = array<i32>} : memref<1x32x64xbf16, #tpu.memory_space<vmem>>, vector<1x32x64xbf16>,
    } else {
    }
    return
  }
  func.func @transform_0(%arg0: i32, %arg1: i32, %arg2: i32) -> (i32, i32, i32, i32) {
    %c0_i32 = arith.constant 0 : i32
    %c0_i32_0 = arith.constant 0 : i32
    return %arg0, %arg2, %arg1, %c0_i32 : i32, i32, i32, i32
  }
  func.func @transform_1(%arg0: i32, %arg1: i32, %arg2: i32) -> (i32, i32, i32) {
    %c0_i32 = arith.constant 0 : i32
    %c0_i32_0 = arith.constant 0 : i32
    return %arg0, %arg1, %c0_i32 : i32, i32, i32
  }
  func.func @transform_2(%arg0: i32, %arg1: i32, %arg2: i32) -> (i32, i32) {
    %c0_i32 = arith.constant 0 : i32
    %c0_i32_0 = arith.constant 0 : i32
    %c0_i32_1 = arith.constant 0 : i32
    return %c0_i32, %c0_i32_0 : i32, i32
  }
  func.func @transform_3(%arg0: i32, %arg1: i32, %arg2: i32) -> (i32, i32) {
    %c0_i32 = arith.constant 0 : i32
    %c0_i32_0 = arith.constant 0 : i32
    %c0_i32_1 = arith.constant 0 : i32
    return %c0_i32, %c0_i32_0 : i32, i32
  }
  func.func @transform_4(%arg0: i32, %arg1: i32, %arg2: i32) -> (i32, i32) {
    %c0_i32 = arith.constant 0 : i32
    %c0_i32_0 = arith.constant 0 : i32
    %c0_i32_1 = arith.constant 0 : i32
    return %c0_i32, %c0_i32_0 : i32, i32
  }
  func.func @transform_5(%arg0: i32, %arg1: i32, %arg2: i32) -> (i32, i32, i32) {
    %c0_i32 = arith.constant 0 : i32
    %c0_i32_0 = arith.constant 0 : i32
    return %arg0, %arg1, %c0_i32 : i32, i32, i32
  }
}

module attributes {stable_mosaic.version = 11 : i64} {
  func.func @_neg_sqdist_kernel(%arg0: i32, %arg1: i32, %arg2: memref<1x32x64xbf16, #tpu.memory_space<vmem>>, %arg3: memref<1x32x64xbf16, #tpu.memory_space<vmem>>, %arg4: memref<1x32x1xf32, #tpu.memory_space<vmem>>, %arg5: memref<1x1x32xf32, #tpu.memory_space<vmem>>, %arg6: memref<1x32x32xbf16, #tpu.memory_space<vmem>>) attributes {dimension_semantics = [#tpu.dimension_semantics<parallel>, #tpu.dimension_semantics<parallel>], iteration_bounds = array<i64: 2, 1>, scalar_prefetch = 0 : i64, scratch_operands = 0 : i64, tpu.core_type = #tpu.core_type<tc>, window_params = [{transform_indices = @transform_0, window_bounds = array<i64: 1, 32, 64>}, {transform_indices = @transform_1, window_bounds = array<i64: 1, 32, 64>}, {transform_indices = @transform_2, window_bounds = array<i64: 1, 32, 1>}, {transform_indices = @transform_3, window_bounds = array<i64: 1, 1, 32>}, {transform_indices = @transform_4, window_bounds = array<i64: 1, 32, 32>}]} {
    %c0 = arith.constant 0 : index
    %c0_0 = arith.constant 0 : index
    %c0_1 = arith.constant 0 : index
    %0 = vector.load %arg2[%c0, %c0_0, %c0_1] : memref<1x32x64xbf16, #tpu.memory_space<vmem>>, vector<1x32x64xbf16>
    %1 = vector.shape_cast %0 : vector<1x32x64xbf16> to vector<32x64xbf16>
    %c0_2 = arith.constant 0 : index
    %c0_3 = arith.constant 0 : index
    %c0_4 = arith.constant 0 : index
    %2 = vector.load %arg3[%c0_2, %c0_3, %c0_4] : memref<1x32x64xbf16, #tpu.memory_space<vmem>>, vector<1x32x64xbf16>
    %3 = vector.shape_cast %2 : vector<1x32x64xbf16> to vector<32x64xbf16>
    %cst = arith.constant dense<0.000000e+00> : vector<32x32xf32>
    %4 = tpu.matmul %1, %3, %cst {dimension_numbers = #tpu.dot_dimension_numbers<[1], [1], [0], [0], [0, 0, 1, 0], [], []>} : vector<32x64xbf16>, vector<32x64xbf16>, vector<32x32xf32> -> vector<32x32xf32>
    %cst_5 = arith.constant 2.000000e+00 : f32
    %5 = vector.broadcast %cst_5 : f32 to vector<32x32xf32>
    %6 = arith.mulf %5, %4 : vector<32x32xf32>
    %c0_6 = arith.constant 0 : index
    %c0_7 = arith.constant 0 : index
    %c0_8 = arith.constant 0 : index
    %7 = vector.load %arg4[%c0_6, %c0_7, %c0_8] : memref<1x32x1xf32, #tpu.memory_space<vmem>>, vector<1x32x1xf32>
    %8 = vector.shape_cast %7 : vector<1x32x1xf32> to vector<32x1xf32>
    %9 = vector.broadcast %8 : vector<32x1xf32> to vector<32x32xf32>
    %10 = arith.subf %6, %9 : vector<32x32xf32>
    %c0_9 = arith.constant 0 : index
    %c0_10 = arith.constant 0 : index
    %c0_11 = arith.constant 0 : index
    %11 = vector.load %arg5[%c0_9, %c0_10, %c0_11] : memref<1x1x32xf32, #tpu.memory_space<vmem>>, vector<1x1x32xf32>
    %12 = vector.shape_cast %11 : vector<1x1x32xf32> to vector<1x32xf32>
    %13 = vector.broadcast %12 : vector<1x32xf32> to vector<32x32xf32>
    %14 = arith.subf %10, %13 : vector<32x32xf32>
    %15 = arith.truncf %14 : vector<32x32xf32> to vector<32x32xbf16>
    %c0_12 = arith.constant 0 : index
    %c0_13 = arith.constant 0 : index
    %c0_14 = arith.constant 0 : index
    %16 = vector.load %arg6[%c0_12, %c0_13, %c0_14] : memref<1x32x32xbf16, #tpu.memory_space<vmem>>, vector<1x32x32xbf16>
    %17 = vector.shape_cast %16 : vector<1x32x32xbf16> to vector<32x32xbf16>
    %18 = vector.shape_cast %15 : vector<32x32xbf16> to vector<1x32x32xbf16>
    tpu.vector_store %arg6[%c0_12, %c0_13, %c0_14], %18 {strides = array<i32>} : memref<1x32x32xbf16, #tpu.memory_space<vmem>>, vector<1x32x32xbf16>,
    return
  }
  func.func @transform_0(%arg0: i32, %arg1: i32) -> (i32, i32, i32) {
    %c0_i32 = arith.constant 0 : i32
    %c0_i32_0 = arith.constant 0 : i32
    %c0_i32_1 = arith.constant 0 : i32
    return %arg0, %c0_i32, %c0_i32_0 : i32, i32, i32
  }
  func.func @transform_1(%arg0: i32, %arg1: i32) -> (i32, i32, i32) {
    %c0_i32 = arith.constant 0 : i32
    %c0_i32_0 = arith.constant 0 : i32
    return %arg0, %arg1, %c0_i32 : i32, i32, i32
  }
  func.func @transform_2(%arg0: i32, %arg1: i32) -> (i32, i32, i32) {
    %c0_i32 = arith.constant 0 : i32
    %c0_i32_0 = arith.constant 0 : i32
    %c0_i32_1 = arith.constant 0 : i32
    return %arg0, %c0_i32, %c0_i32_0 : i32, i32, i32
  }
  func.func @transform_3(%arg0: i32, %arg1: i32) -> (i32, i32, i32) {
    %c0_i32 = arith.constant 0 : i32
    %c0_i32_0 = arith.constant 0 : i32
    return %arg0, %c0_i32, %arg1 : i32, i32, i32
  }
  func.func @transform_4(%arg0: i32, %arg1: i32) -> (i32, i32, i32) {
    %c0_i32 = arith.constant 0 : i32
    %c0_i32_0 = arith.constant 0 : i32
    return %arg0, %c0_i32, %arg1 : i32, i32, i32
  }
}

module attributes {stable_mosaic.version = 11 : i64} {
  func.func @_edgeconv_kernel(%arg0: i32, %arg1: i32, %arg2: i32, %arg3: memref<1x8x32x64xbf16, #tpu.memory_space<vmem>>, %arg4: memref<1x32x64xbf16, #tpu.memory_space<vmem>>, %arg5: memref<64x64xbf16, #tpu.memory_space<vmem>>, %arg6: memref<64x64xbf16, #tpu.memory_space<vmem>>, %arg7: memref<1x64xf32, #tpu.memory_space<vmem>>, %arg8: memref<1x32x64xbf16, #tpu.memory_space<vmem>>, %arg9: memref<32x64xf32, #tpu.memory_space<vmem>>) attributes {dimension_semantics = [#tpu.dimension_semantics<parallel>, #tpu.dimension_semantics<parallel>, #tpu.dimension_semantics<arbitrary>], iteration_bounds = array<i64: 2, 1, 1>, scalar_prefetch = 0 : i64, scratch_operands = 1 : i64, tpu.core_type = #tpu.core_type<tc>, window_params = [{transform_indices = @transform_0, window_bounds = array<i64: 1, 8, 32, 64>}, {transform_indices = @transform_1, window_bounds = array<i64: 1, 32, 64>}, {pipeline_mode = #tpu.pipeline_mode<synchronous>, transform_indices = @transform_2, window_bounds = array<i64: 64, 64>}, {pipeline_mode = #tpu.pipeline_mode<synchronous>, transform_indices = @transform_3, window_bounds = array<i64: 64, 64>}, {pipeline_mode = #tpu.pipeline_mode<synchronous>, transform_indices = @transform_4, window_bounds = array<i64: 1, 64>}, {transform_indices = @transform_5, window_bounds = array<i64: 1, 32, 64>}]} {
    %c0_i32 = arith.constant 0 : i32
    %0 = arith.cmpi eq, %arg2, %c0_i32 : i32
    %1 = arith.extui %0 : i1 to i32
    %c0_i32_0 = arith.constant 0 : i32
    %2 = arith.cmpi ne, %1, %c0_i32_0 : i32
    scf.if %2 {
      %c0_70 = arith.constant 0 : index
      %c0_71 = arith.constant 0 : index
      %c0_72 = arith.constant 0 : index
      %98 = vector.load %arg4[%c0_70, %c0_71, %c0_72] : memref<1x32x64xbf16, #tpu.memory_space<vmem>>, vector<1x32x64xbf16>
      %99 = vector.shape_cast %98 : vector<1x32x64xbf16> to vector<32x64xbf16>
      %c0_73 = arith.constant 0 : index
      %c0_74 = arith.constant 0 : index
      %100 = vector.load %arg6[%c0_73, %c0_74] : memref<64x64xbf16, #tpu.memory_space<vmem>>, vector<64x64xbf16>
      %cst_75 = arith.constant dense<0.000000e+00> : vector<32x64xf32>
      %101 = tpu.matmul %99, %100, %cst_75 {dimension_numbers = #tpu.dot_dimension_numbers<[1], [0], [0], [1], [0, 0, 1, 1], [], []>} : vector<32x64xbf16>, vector<64x64xbf16>, vector<32x64xf32> -> vector<32x64xf32>
      %c0_76 = arith.constant 0 : index
      %c0_77 = arith.constant 0 : index
      %102 = vector.load %arg7[%c0_76, %c0_77] : memref<1x64xf32, #tpu.memory_space<vmem>>, vector<1x64xf32>
      %103 = vector.broadcast %102 : vector<1x64xf32> to vector<32x64xf32>
      %104 = arith.addf %101, %103 : vector<32x64xf32>
      %c0_78 = arith.constant 0 : index
      %c0_79 = arith.constant 0 : index
      %105 = vector.load %arg9[%c0_78, %c0_79] : memref<32x64xf32, #tpu.memory_space<vmem>>, vector<32x64xf32>
      tpu.vector_store %arg9[%c0_78, %c0_79], %104 {strides = array<i32>} : memref<32x64xf32, #tpu.memory_space<vmem>>, vector<32x64xf32>,
    } else {
    }
    %c0 = arith.constant 0 : index
    %c0_1 = arith.constant 0 : index
    %3 = vector.load %arg9[%c0, %c0_1] : memref<32x64xf32, #tpu.memory_space<vmem>>, vector<32x64xf32>
    %c0_2 = arith.constant 0 : index
    %c0_3 = arith.constant 0 : index
    %c0_4 = arith.constant 0 : index
    %c0_5 = arith.constant 0 : index
    %4 = vector.load %arg3[%c0_2, %c0_3, %c0_4, %c0_5] : memref<1x8x32x64xbf16, #tpu.memory_space<vmem>>, vector<1x1x32x64xbf16>
    %5 = vector.shape_cast %4 : vector<1x1x32x64xbf16> to vector<32x64xbf16>
    %c0_6 = arith.constant 0 : index
    %c0_7 = arith.constant 0 : index
    %6 = vector.load %arg5[%c0_6, %c0_7] : memref<64x64xbf16, #tpu.memory_space<vmem>>, vector<64x64xbf16>
    %cst = arith.constant dense<0.000000e+00> : vector<32x64xf32>
    %7 = tpu.matmul %5, %6, %cst {dimension_numbers = #tpu.dot_dimension_numbers<[1], [0], [0], [1], [0, 0, 1, 1], [], []>} : vector<32x64xbf16>, vector<64x64xbf16>, vector<32x64xf32> -> vector<32x64xf32>
    %8 = arith.addf %7, %3 : vector<32x64xf32>
    %cst_8 = arith.constant 0.000000e+00 : f32
    %9 = vector.broadcast %cst_8 : f32 to vector<32x64xf32>
    %10 = arith.cmpf ogt, %8, %9 : vector<32x64xf32>
    %cst_9 = arith.constant 2.000000e-01 : f32
    %11 = vector.broadcast %cst_9 : f32 to vector<32x64xf32>
    %12 = arith.mulf %11, %8 : vector<32x64xf32>
    %13 = arith.select %10, %8, %12 : vector<32x64xi1>, vector<32x64xf32>
    %c0_10 = arith.constant 0 : index
    %c1 = arith.constant 1 : index
    %c0_11 = arith.constant 0 : index
    %c0_12 = arith.constant 0 : index
    %14 = vector.load %arg3[%c0_10, %c1, %c0_11, %c0_12] : memref<1x8x32x64xbf16, #tpu.memory_space<vmem>>, vector<1x1x32x64xbf16>
    %15 = vector.shape_cast %14 : vector<1x1x32x64xbf16> to vector<32x64xbf16>
    %c0_13 = arith.constant 0 : index
    %c0_14 = arith.constant 0 : index
    %16 = vector.load %arg5[%c0_13, %c0_14] : memref<64x64xbf16, #tpu.memory_space<vmem>>, vector<64x64xbf16>
    %cst_15 = arith.constant dense<0.000000e+00> : vector<32x64xf32>
    %17 = tpu.matmul %15, %16, %cst_15 {dimension_numbers = #tpu.dot_dimension_numbers<[1], [0], [0], [1], [0, 0, 1, 1], [], []>} : vector<32x64xbf16>, vector<64x64xbf16>, vector<32x64xf32> -> vector<32x64xf32>
    %18 = arith.addf %17, %3 : vector<32x64xf32>
    %cst_16 = arith.constant 0.000000e+00 : f32
    %19 = vector.broadcast %cst_16 : f32 to vector<32x64xf32>
    %20 = arith.cmpf ogt, %18, %19 : vector<32x64xf32>
    %cst_17 = arith.constant 2.000000e-01 : f32
    %21 = vector.broadcast %cst_17 : f32 to vector<32x64xf32>
    %22 = arith.mulf %21, %18 : vector<32x64xf32>
    %23 = arith.select %20, %18, %22 : vector<32x64xi1>, vector<32x64xf32>
    %24 = arith.maximumf %13, %23 : vector<32x64xf32>
    %c0_18 = arith.constant 0 : index
    %c2 = arith.constant 2 : index
    %c0_19 = arith.constant 0 : index
    %c0_20 = arith.constant 0 : index
    %25 = vector.load %arg3[%c0_18, %c2, %c0_19, %c0_20] : memref<1x8x32x64xbf16, #tpu.memory_space<vmem>>, vector<1x1x32x64xbf16>
    %26 = vector.shape_cast %25 : vector<1x1x32x64xbf16> to vector<32x64xbf16>
    %c0_21 = arith.constant 0 : index
    %c0_22 = arith.constant 0 : index
    %27 = vector.load %arg5[%c0_21, %c0_22] : memref<64x64xbf16, #tpu.memory_space<vmem>>, vector<64x64xbf16>
    %cst_23 = arith.constant dense<0.000000e+00> : vector<32x64xf32>
    %28 = tpu.matmul %26, %27, %cst_23 {dimension_numbers = #tpu.dot_dimension_numbers<[1], [0], [0], [1], [0, 0, 1, 1], [], []>} : vector<32x64xbf16>, vector<64x64xbf16>, vector<32x64xf32> -> vector<32x64xf32>
    %29 = arith.addf %28, %3 : vector<32x64xf32>
    %cst_24 = arith.constant 0.000000e+00 : f32
    %30 = vector.broadcast %cst_24 : f32 to vector<32x64xf32>
    %31 = arith.cmpf ogt, %29, %30 : vector<32x64xf32>
    %cst_25 = arith.constant 2.000000e-01 : f32
    %32 = vector.broadcast %cst_25 : f32 to vector<32x64xf32>
    %33 = arith.mulf %32, %29 : vector<32x64xf32>
    %34 = arith.select %31, %29, %33 : vector<32x64xi1>, vector<32x64xf32>
    %35 = arith.maximumf %24, %34 : vector<32x64xf32>
    %c0_26 = arith.constant 0 : index
    %c3 = arith.constant 3 : index
    %c0_27 = arith.constant 0 : index
    %c0_28 = arith.constant 0 : index
    %36 = vector.load %arg3[%c0_26, %c3, %c0_27, %c0_28] : memref<1x8x32x64xbf16, #tpu.memory_space<vmem>>, vector<1x1x32x64xbf16>
    %37 = vector.shape_cast %36 : vector<1x1x32x64xbf16> to vector<32x64xbf16>
    %c0_29 = arith.constant 0 : index
    %c0_30 = arith.constant 0 : index
    %38 = vector.load %arg5[%c0_29, %c0_30] : memref<64x64xbf16, #tpu.memory_space<vmem>>, vector<64x64xbf16>
    %cst_31 = arith.constant dense<0.000000e+00> : vector<32x64xf32>
    %39 = tpu.matmul %37, %38, %cst_31 {dimension_numbers = #tpu.dot_dimension_numbers<[1], [0], [0], [1], [0, 0, 1, 1], [], []>} : vector<32x64xbf16>, vector<64x64xbf16>, vector<32x64xf32> -> vector<32x64xf32>
    %40 = arith.addf %39, %3 : vector<32x64xf32>
    %cst_32 = arith.constant 0.000000e+00 : f32
    %41 = vector.broadcast %cst_32 : f32 to vector<32x64xf32>
    %42 = arith.cmpf ogt, %40, %41 : vector<32x64xf32>
    %cst_33 = arith.constant 2.000000e-01 : f32
    %43 = vector.broadcast %cst_33 : f32 to vector<32x64xf32>
    %44 = arith.mulf %43, %40 : vector<32x64xf32>
    %45 = arith.select %42, %40, %44 : vector<32x64xi1>, vector<32x64xf32>
    %46 = arith.maximumf %35, %45 : vector<32x64xf32>
    %c0_34 = arith.constant 0 : index
    %c4 = arith.constant 4 : index
    %c0_35 = arith.constant 0 : index
    %c0_36 = arith.constant 0 : index
    %47 = vector.load %arg3[%c0_34, %c4, %c0_35, %c0_36] : memref<1x8x32x64xbf16, #tpu.memory_space<vmem>>, vector<1x1x32x64xbf16>
    %48 = vector.shape_cast %47 : vector<1x1x32x64xbf16> to vector<32x64xbf16>
    %c0_37 = arith.constant 0 : index
    %c0_38 = arith.constant 0 : index
    %49 = vector.load %arg5[%c0_37, %c0_38] : memref<64x64xbf16, #tpu.memory_space<vmem>>, vector<64x64xbf16>
    %cst_39 = arith.constant dense<0.000000e+00> : vector<32x64xf32>
    %50 = tpu.matmul %48, %49, %cst_39 {dimension_numbers = #tpu.dot_dimension_numbers<[1], [0], [0], [1], [0, 0, 1, 1], [], []>} : vector<32x64xbf16>, vector<64x64xbf16>, vector<32x64xf32> -> vector<32x64xf32>
    %51 = arith.addf %50, %3 : vector<32x64xf32>
    %cst_40 = arith.constant 0.000000e+00 : f32
    %52 = vector.broadcast %cst_40 : f32 to vector<32x64xf32>
    %53 = arith.cmpf ogt, %51, %52 : vector<32x64xf32>
    %cst_41 = arith.constant 2.000000e-01 : f32
    %54 = vector.broadcast %cst_41 : f32 to vector<32x64xf32>
    %55 = arith.mulf %54, %51 : vector<32x64xf32>
    %56 = arith.select %53, %51, %55 : vector<32x64xi1>, vector<32x64xf32>
    %57 = arith.maximumf %46, %56 : vector<32x64xf32>
    %c0_42 = arith.constant 0 : index
    %c5 = arith.constant 5 : index
    %c0_43 = arith.constant 0 : index
    %c0_44 = arith.constant 0 : index
    %58 = vector.load %arg3[%c0_42, %c5, %c0_43, %c0_44] : memref<1x8x32x64xbf16, #tpu.memory_space<vmem>>, vector<1x1x32x64xbf16>
    %59 = vector.shape_cast %58 : vector<1x1x32x64xbf16> to vector<32x64xbf16>
    %c0_45 = arith.constant 0 : index
    %c0_46 = arith.constant 0 : index
    %60 = vector.load %arg5[%c0_45, %c0_46] : memref<64x64xbf16, #tpu.memory_space<vmem>>, vector<64x64xbf16>
    %cst_47 = arith.constant dense<0.000000e+00> : vector<32x64xf32>
    %61 = tpu.matmul %59, %60, %cst_47 {dimension_numbers = #tpu.dot_dimension_numbers<[1], [0], [0], [1], [0, 0, 1, 1], [], []>} : vector<32x64xbf16>, vector<64x64xbf16>, vector<32x64xf32> -> vector<32x64xf32>
    %62 = arith.addf %61, %3 : vector<32x64xf32>
    %cst_48 = arith.constant 0.000000e+00 : f32
    %63 = vector.broadcast %cst_48 : f32 to vector<32x64xf32>
    %64 = arith.cmpf ogt, %62, %63 : vector<32x64xf32>
    %cst_49 = arith.constant 2.000000e-01 : f32
    %65 = vector.broadcast %cst_49 : f32 to vector<32x64xf32>
    %66 = arith.mulf %65, %62 : vector<32x64xf32>
    %67 = arith.select %64, %62, %66 : vector<32x64xi1>, vector<32x64xf32>
    %68 = arith.maximumf %57, %67 : vector<32x64xf32>
    %c0_50 = arith.constant 0 : index
    %c6 = arith.constant 6 : index
    %c0_51 = arith.constant 0 : index
    %c0_52 = arith.constant 0 : index
    %69 = vector.load %arg3[%c0_50, %c6, %c0_51, %c0_52] : memref<1x8x32x64xbf16, #tpu.memory_space<vmem>>, vector<1x1x32x64xbf16>
    %70 = vector.shape_cast %69 : vector<1x1x32x64xbf16> to vector<32x64xbf16>
    %c0_53 = arith.constant 0 : index
    %c0_54 = arith.constant 0 : index
    %71 = vector.load %arg5[%c0_53, %c0_54] : memref<64x64xbf16, #tpu.memory_space<vmem>>, vector<64x64xbf16>
    %cst_55 = arith.constant dense<0.000000e+00> : vector<32x64xf32>
    %72 = tpu.matmul %70, %71, %cst_55 {dimension_numbers = #tpu.dot_dimension_numbers<[1], [0], [0], [1], [0, 0, 1, 1], [], []>} : vector<32x64xbf16>, vector<64x64xbf16>, vector<32x64xf32> -> vector<32x64xf32>
    %73 = arith.addf %72, %3 : vector<32x64xf32>
    %cst_56 = arith.constant 0.000000e+00 : f32
    %74 = vector.broadcast %cst_56 : f32 to vector<32x64xf32>
    %75 = arith.cmpf ogt, %73, %74 : vector<32x64xf32>
    %cst_57 = arith.constant 2.000000e-01 : f32
    %76 = vector.broadcast %cst_57 : f32 to vector<32x64xf32>
    %77 = arith.mulf %76, %73 : vector<32x64xf32>
    %78 = arith.select %75, %73, %77 : vector<32x64xi1>, vector<32x64xf32>
    %79 = arith.maximumf %68, %78 : vector<32x64xf32>
    %c0_58 = arith.constant 0 : index
    %c7 = arith.constant 7 : index
    %c0_59 = arith.constant 0 : index
    %c0_60 = arith.constant 0 : index
    %80 = vector.load %arg3[%c0_58, %c7, %c0_59, %c0_60] : memref<1x8x32x64xbf16, #tpu.memory_space<vmem>>, vector<1x1x32x64xbf16>
    %81 = vector.shape_cast %80 : vector<1x1x32x64xbf16> to vector<32x64xbf16>
    %c0_61 = arith.constant 0 : index
    %c0_62 = arith.constant 0 : index
    %82 = vector.load %arg5[%c0_61, %c0_62] : memref<64x64xbf16, #tpu.memory_space<vmem>>, vector<64x64xbf16>
    %cst_63 = arith.constant dense<0.000000e+00> : vector<32x64xf32>
    %83 = tpu.matmul %81, %82, %cst_63 {dimension_numbers = #tpu.dot_dimension_numbers<[1], [0], [0], [1], [0, 0, 1, 1], [], []>} : vector<32x64xbf16>, vector<64x64xbf16>, vector<32x64xf32> -> vector<32x64xf32>
    %84 = arith.addf %83, %3 : vector<32x64xf32>
    %cst_64 = arith.constant 0.000000e+00 : f32
    %85 = vector.broadcast %cst_64 : f32 to vector<32x64xf32>
    %86 = arith.cmpf ogt, %84, %85 : vector<32x64xf32>
    %cst_65 = arith.constant 2.000000e-01 : f32
    %87 = vector.broadcast %cst_65 : f32 to vector<32x64xf32>
    %88 = arith.mulf %87, %84 : vector<32x64xf32>
    %89 = arith.select %86, %84, %88 : vector<32x64xi1>, vector<32x64xf32>
    %90 = arith.maximumf %79, %89 : vector<32x64xf32>
    %91 = arith.truncf %90 : vector<32x64xf32> to vector<32x64xbf16>
    %c0_i32_66 = arith.constant 0 : i32
    %92 = arith.cmpi eq, %arg2, %c0_i32_66 : i32
    %93 = arith.extui %92 : i1 to i32
    %c0_i32_67 = arith.constant 0 : i32
    %94 = arith.cmpi ne, %93, %c0_i32_67 : i32
    scf.if %94 {
      %c0_70 = arith.constant 0 : index
      %c0_71 = arith.constant 0 : index
      %c0_72 = arith.constant 0 : index
      %98 = vector.load %arg8[%c0_70, %c0_71, %c0_72] : memref<1x32x64xbf16, #tpu.memory_space<vmem>>, vector<1x32x64xbf16>
      %99 = vector.shape_cast %98 : vector<1x32x64xbf16> to vector<32x64xbf16>
      %100 = vector.shape_cast %91 : vector<32x64xbf16> to vector<1x32x64xbf16>
      tpu.vector_store %arg8[%c0_70, %c0_71, %c0_72], %100 {strides = array<i32>} : memref<1x32x64xbf16, #tpu.memory_space<vmem>>, vector<1x32x64xbf16>,
    } else {
    }
    %c0_i32_68 = arith.constant 0 : i32
    %95 = arith.cmpi sgt, %arg2, %c0_i32_68 : i32
    %96 = arith.extui %95 : i1 to i32
    %c0_i32_69 = arith.constant 0 : i32
    %97 = arith.cmpi ne, %96, %c0_i32_69 : i32
    scf.if %97 {
      %c0_70 = arith.constant 0 : index
      %c0_71 = arith.constant 0 : index
      %c0_72 = arith.constant 0 : index
      %98 = vector.load %arg8[%c0_70, %c0_71, %c0_72] : memref<1x32x64xbf16, #tpu.memory_space<vmem>>, vector<1x32x64xbf16>
      %99 = vector.shape_cast %98 : vector<1x32x64xbf16> to vector<32x64xbf16>
      %100 = arith.maximumf %99, %91 : vector<32x64xbf16>
      %c0_73 = arith.constant 0 : index
      %c0_74 = arith.constant 0 : index
      %c0_75 = arith.constant 0 : index
      %101 = vector.load %arg8[%c0_73, %c0_74, %c0_75] : memref<1x32x64xbf16, #tpu.memory_space<vmem>>, vector<1x32x64xbf16>
      %102 = vector.shape_cast %101 : vector<1x32x64xbf16> to vector<32x64xbf16>
      %103 = vector.shape_cast %100 : vector<32x64xbf16> to vector<1x32x64xbf16>
      tpu.vector_store %arg8[%c0_73, %c0_74, %c0_75], %103 {strides = array<i32>} : memref<1x32x64xbf16, #tpu.memory_space<vmem>>, vector<1x32x64xbf16>,
    } else {
    }
    return
  }
  func.func @transform_0(%arg0: i32, %arg1: i32, %arg2: i32) -> (i32, i32, i32, i32) {
    %c0_i32 = arith.constant 0 : i32
    %c0_i32_0 = arith.constant 0 : i32
    return %arg0, %arg2, %arg1, %c0_i32 : i32, i32, i32, i32
  }
  func.func @transform_1(%arg0: i32, %arg1: i32, %arg2: i32) -> (i32, i32, i32) {
    %c0_i32 = arith.constant 0 : i32
    %c0_i32_0 = arith.constant 0 : i32
    return %arg0, %arg1, %c0_i32 : i32, i32, i32
  }
  func.func @transform_2(%arg0: i32, %arg1: i32, %arg2: i32) -> (i32, i32) {
    %c0_i32 = arith.constant 0 : i32
    %c0_i32_0 = arith.constant 0 : i32
    %c0_i32_1 = arith.constant 0 : i32
    return %c0_i32, %c0_i32_0 : i32, i32
  }
  func.func @transform_3(%arg0: i32, %arg1: i32, %arg2: i32) -> (i32, i32) {
    %c0_i32 = arith.constant 0 : i32
    %c0_i32_0 = arith.constant 0 : i32
    %c0_i32_1 = arith.constant 0 : i32
    return %c0_i32, %c0_i32_0 : i32, i32
  }
  func.func @transform_4(%arg0: i32, %arg1: i32, %arg2: i32) -> (i32, i32) {
    %c0_i32 = arith.constant 0 : i32
    %c0_i32_0 = arith.constant 0 : i32
    %c0_i32_1 = arith.constant 0 : i32
    return %c0_i32, %c0_i32_0 : i32, i32
  }
  func.func @transform_5(%arg0: i32, %arg1: i32, %arg2: i32) -> (i32, i32, i32) {
    %c0_i32 = arith.constant 0 : i32
    %c0_i32_0 = arith.constant 0 : i32
    return %arg0, %arg1, %c0_i32 : i32, i32, i32
  }
}

module attributes {stable_mosaic.version = 11 : i64} {
  func.func @_edgeconv_kernel(%arg0: i32, %arg1: i32, %arg2: i32, %arg3: memref<1x8x32x64xbf16, #tpu.memory_space<vmem>>, %arg4: memref<1x32x64xbf16, #tpu.memory_space<vmem>>, %arg5: memref<64x128xbf16, #tpu.memory_space<vmem>>, %arg6: memref<64x128xbf16, #tpu.memory_space<vmem>>, %arg7: memref<1x128xf32, #tpu.memory_space<vmem>>, %arg8: memref<1x32x128xbf16, #tpu.memory_space<vmem>>, %arg9: memref<32x128xf32, #tpu.memory_space<vmem>>) attributes {dimension_semantics = [#tpu.dimension_semantics<parallel>, #tpu.dimension_semantics<parallel>, #tpu.dimension_semantics<arbitrary>], iteration_bounds = array<i64: 2, 1, 1>, scalar_prefetch = 0 : i64, scratch_operands = 1 : i64, tpu.core_type = #tpu.core_type<tc>, window_params = [{transform_indices = @transform_0, window_bounds = array<i64: 1, 8, 32, 64>}, {transform_indices = @transform_1, window_bounds = array<i64: 1, 32, 64>}, {pipeline_mode = #tpu.pipeline_mode<synchronous>, transform_indices = @transform_2, window_bounds = array<i64: 64, 128>}, {pipeline_mode = #tpu.pipeline_mode<synchronous>, transform_indices = @transform_3, window_bounds = array<i64: 64, 128>}, {pipeline_mode = #tpu.pipeline_mode<synchronous>, transform_indices = @transform_4, window_bounds = array<i64: 1, 128>}, {transform_indices = @transform_5, window_bounds = array<i64: 1, 32, 128>}]} {
    %c0_i32 = arith.constant 0 : i32
    %0 = arith.cmpi eq, %arg2, %c0_i32 : i32
    %1 = arith.extui %0 : i1 to i32
    %c0_i32_0 = arith.constant 0 : i32
    %2 = arith.cmpi ne, %1, %c0_i32_0 : i32
    scf.if %2 {
      %c0_70 = arith.constant 0 : index
      %c0_71 = arith.constant 0 : index
      %c0_72 = arith.constant 0 : index
      %98 = vector.load %arg4[%c0_70, %c0_71, %c0_72] : memref<1x32x64xbf16, #tpu.memory_space<vmem>>, vector<1x32x64xbf16>
      %99 = vector.shape_cast %98 : vector<1x32x64xbf16> to vector<32x64xbf16>
      %c0_73 = arith.constant 0 : index
      %c0_74 = arith.constant 0 : index
      %100 = vector.load %arg6[%c0_73, %c0_74] : memref<64x128xbf16, #tpu.memory_space<vmem>>, vector<64x128xbf16>
      %cst_75 = arith.constant dense<0.000000e+00> : vector<32x128xf32>
      %101 = tpu.matmul %99, %100, %cst_75 {dimension_numbers = #tpu.dot_dimension_numbers<[1], [0], [0], [1], [0, 0, 1, 1], [], []>} : vector<32x64xbf16>, vector<64x128xbf16>, vector<32x128xf32> -> vector<32x128xf32>
      %c0_76 = arith.constant 0 : index
      %c0_77 = arith.constant 0 : index
      %102 = vector.load %arg7[%c0_76, %c0_77] : memref<1x128xf32, #tpu.memory_space<vmem>>, vector<1x128xf32>
      %103 = vector.broadcast %102 : vector<1x128xf32> to vector<32x128xf32>
      %104 = arith.addf %101, %103 : vector<32x128xf32>
      %c0_78 = arith.constant 0 : index
      %c0_79 = arith.constant 0 : index
      %105 = vector.load %arg9[%c0_78, %c0_79] : memref<32x128xf32, #tpu.memory_space<vmem>>, vector<32x128xf32>
      tpu.vector_store %arg9[%c0_78, %c0_79], %104 {strides = array<i32>} : memref<32x128xf32, #tpu.memory_space<vmem>>, vector<32x128xf32>,
    } else {
    }
    %c0 = arith.constant 0 : index
    %c0_1 = arith.constant 0 : index
    %3 = vector.load %arg9[%c0, %c0_1] : memref<32x128xf32, #tpu.memory_space<vmem>>, vector<32x128xf32>
    %c0_2 = arith.constant 0 : index
    %c0_3 = arith.constant 0 : index
    %c0_4 = arith.constant 0 : index
    %c0_5 = arith.constant 0 : index
    %4 = vector.load %arg3[%c0_2, %c0_3, %c0_4, %c0_5] : memref<1x8x32x64xbf16, #tpu.memory_space<vmem>>, vector<1x1x32x64xbf16>
    %5 = vector.shape_cast %4 : vector<1x1x32x64xbf16> to vector<32x64xbf16>
    %c0_6 = arith.constant 0 : index
    %c0_7 = arith.constant 0 : index
    %6 = vector.load %arg5[%c0_6, %c0_7] : memref<64x128xbf16, #tpu.memory_space<vmem>>, vector<64x128xbf16>
    %cst = arith.constant dense<0.000000e+00> : vector<32x128xf32>
    %7 = tpu.matmul %5, %6, %cst {dimension_numbers = #tpu.dot_dimension_numbers<[1], [0], [0], [1], [0, 0, 1, 1], [], []>} : vector<32x64xbf16>, vector<64x128xbf16>, vector<32x128xf32> -> vector<32x128xf32>
    %8 = arith.addf %7, %3 : vector<32x128xf32>
    %cst_8 = arith.constant 0.000000e+00 : f32
    %9 = vector.broadcast %cst_8 : f32 to vector<32x128xf32>
    %10 = arith.cmpf ogt, %8, %9 : vector<32x128xf32>
    %cst_9 = arith.constant 2.000000e-01 : f32
    %11 = vector.broadcast %cst_9 : f32 to vector<32x128xf32>
    %12 = arith.mulf %11, %8 : vector<32x128xf32>
    %13 = arith.select %10, %8, %12 : vector<32x128xi1>, vector<32x128xf32>
    %c0_10 = arith.constant 0 : index
    %c1 = arith.constant 1 : index
    %c0_11 = arith.constant 0 : index
    %c0_12 = arith.constant 0 : index
    %14 = vector.load %arg3[%c0_10, %c1, %c0_11, %c0_12] : memref<1x8x32x64xbf16, #tpu.memory_space<vmem>>, vector<1x1x32x64xbf16>
    %15 = vector.shape_cast %14 : vector<1x1x32x64xbf16> to vector<32x64xbf16>
    %c0_13 = arith.constant 0 : index
    %c0_14 = arith.constant 0 : index
    %16 = vector.load %arg5[%c0_13, %c0_14] : memref<64x128xbf16, #tpu.memory_space<vmem>>, vector<64x128xbf16>
    %cst_15 = arith.constant dense<0.000000e+00> : vector<32x128xf32>
    %17 = tpu.matmul %15, %16, %cst_15 {dimension_numbers = #tpu.dot_dimension_numbers<[1], [0], [0], [1], [0, 0, 1, 1], [], []>} : vector<32x64xbf16>, vector<64x128xbf16>, vector<32x128xf32> -> vector<32x128xf32>
    %18 = arith.addf %17, %3 : vector<32x128xf32>
    %cst_16 = arith.constant 0.000000e+00 : f32
    %19 = vector.broadcast %cst_16 : f32 to vector<32x128xf32>
    %20 = arith.cmpf ogt, %18, %19 : vector<32x128xf32>
    %cst_17 = arith.constant 2.000000e-01 : f32
    %21 = vector.broadcast %cst_17 : f32 to vector<32x128xf32>
    %22 = arith.mulf %21, %18 : vector<32x128xf32>
    %23 = arith.select %20, %18, %22 : vector<32x128xi1>, vector<32x128xf32>
    %24 = arith.maximumf %13, %23 : vector<32x128xf32>
    %c0_18 = arith.constant 0 : index
    %c2 = arith.constant 2 : index
    %c0_19 = arith.constant 0 : index
    %c0_20 = arith.constant 0 : index
    %25 = vector.load %arg3[%c0_18, %c2, %c0_19, %c0_20] : memref<1x8x32x64xbf16, #tpu.memory_space<vmem>>, vector<1x1x32x64xbf16>
    %26 = vector.shape_cast %25 : vector<1x1x32x64xbf16> to vector<32x64xbf16>
    %c0_21 = arith.constant 0 : index
    %c0_22 = arith.constant 0 : index
    %27 = vector.load %arg5[%c0_21, %c0_22] : memref<64x128xbf16, #tpu.memory_space<vmem>>, vector<64x128xbf16>
    %cst_23 = arith.constant dense<0.000000e+00> : vector<32x128xf32>
    %28 = tpu.matmul %26, %27, %cst_23 {dimension_numbers = #tpu.dot_dimension_numbers<[1], [0], [0], [1], [0, 0, 1, 1], [], []>} : vector<32x64xbf16>, vector<64x128xbf16>, vector<32x128xf32> -> vector<32x128xf32>
    %29 = arith.addf %28, %3 : vector<32x128xf32>
    %cst_24 = arith.constant 0.000000e+00 : f32
    %30 = vector.broadcast %cst_24 : f32 to vector<32x128xf32>
    %31 = arith.cmpf ogt, %29, %30 : vector<32x128xf32>
    %cst_25 = arith.constant 2.000000e-01 : f32
    %32 = vector.broadcast %cst_25 : f32 to vector<32x128xf32>
    %33 = arith.mulf %32, %29 : vector<32x128xf32>
    %34 = arith.select %31, %29, %33 : vector<32x128xi1>, vector<32x128xf32>
    %35 = arith.maximumf %24, %34 : vector<32x128xf32>
    %c0_26 = arith.constant 0 : index
    %c3 = arith.constant 3 : index
    %c0_27 = arith.constant 0 : index
    %c0_28 = arith.constant 0 : index
    %36 = vector.load %arg3[%c0_26, %c3, %c0_27, %c0_28] : memref<1x8x32x64xbf16, #tpu.memory_space<vmem>>, vector<1x1x32x64xbf16>
    %37 = vector.shape_cast %36 : vector<1x1x32x64xbf16> to vector<32x64xbf16>
    %c0_29 = arith.constant 0 : index
    %c0_30 = arith.constant 0 : index
    %38 = vector.load %arg5[%c0_29, %c0_30] : memref<64x128xbf16, #tpu.memory_space<vmem>>, vector<64x128xbf16>
    %cst_31 = arith.constant dense<0.000000e+00> : vector<32x128xf32>
    %39 = tpu.matmul %37, %38, %cst_31 {dimension_numbers = #tpu.dot_dimension_numbers<[1], [0], [0], [1], [0, 0, 1, 1], [], []>} : vector<32x64xbf16>, vector<64x128xbf16>, vector<32x128xf32> -> vector<32x128xf32>
    %40 = arith.addf %39, %3 : vector<32x128xf32>
    %cst_32 = arith.constant 0.000000e+00 : f32
    %41 = vector.broadcast %cst_32 : f32 to vector<32x128xf32>
    %42 = arith.cmpf ogt, %40, %41 : vector<32x128xf32>
    %cst_33 = arith.constant 2.000000e-01 : f32
    %43 = vector.broadcast %cst_33 : f32 to vector<32x128xf32>
    %44 = arith.mulf %43, %40 : vector<32x128xf32>
    %45 = arith.select %42, %40, %44 : vector<32x128xi1>, vector<32x128xf32>
    %46 = arith.maximumf %35, %45 : vector<32x128xf32>
    %c0_34 = arith.constant 0 : index
    %c4 = arith.constant 4 : index
    %c0_35 = arith.constant 0 : index
    %c0_36 = arith.constant 0 : index
    %47 = vector.load %arg3[%c0_34, %c4, %c0_35, %c0_36] : memref<1x8x32x64xbf16, #tpu.memory_space<vmem>>, vector<1x1x32x64xbf16>
    %48 = vector.shape_cast %47 : vector<1x1x32x64xbf16> to vector<32x64xbf16>
    %c0_37 = arith.constant 0 : index
    %c0_38 = arith.constant 0 : index
    %49 = vector.load %arg5[%c0_37, %c0_38] : memref<64x128xbf16, #tpu.memory_space<vmem>>, vector<64x128xbf16>
    %cst_39 = arith.constant dense<0.000000e+00> : vector<32x128xf32>
    %50 = tpu.matmul %48, %49, %cst_39 {dimension_numbers = #tpu.dot_dimension_numbers<[1], [0], [0], [1], [0, 0, 1, 1], [], []>} : vector<32x64xbf16>, vector<64x128xbf16>, vector<32x128xf32> -> vector<32x128xf32>
    %51 = arith.addf %50, %3 : vector<32x128xf32>
    %cst_40 = arith.constant 0.000000e+00 : f32
    %52 = vector.broadcast %cst_40 : f32 to vector<32x128xf32>
    %53 = arith.cmpf ogt, %51, %52 : vector<32x128xf32>
    %cst_41 = arith.constant 2.000000e-01 : f32
    %54 = vector.broadcast %cst_41 : f32 to vector<32x128xf32>
    %55 = arith.mulf %54, %51 : vector<32x128xf32>
    %56 = arith.select %53, %51, %55 : vector<32x128xi1>, vector<32x128xf32>
    %57 = arith.maximumf %46, %56 : vector<32x128xf32>
    %c0_42 = arith.constant 0 : index
    %c5 = arith.constant 5 : index
    %c0_43 = arith.constant 0 : index
    %c0_44 = arith.constant 0 : index
    %58 = vector.load %arg3[%c0_42, %c5, %c0_43, %c0_44] : memref<1x8x32x64xbf16, #tpu.memory_space<vmem>>, vector<1x1x32x64xbf16>
    %59 = vector.shape_cast %58 : vector<1x1x32x64xbf16> to vector<32x64xbf16>
    %c0_45 = arith.constant 0 : index
    %c0_46 = arith.constant 0 : index
    %60 = vector.load %arg5[%c0_45, %c0_46] : memref<64x128xbf16, #tpu.memory_space<vmem>>, vector<64x128xbf16>
    %cst_47 = arith.constant dense<0.000000e+00> : vector<32x128xf32>
    %61 = tpu.matmul %59, %60, %cst_47 {dimension_numbers = #tpu.dot_dimension_numbers<[1], [0], [0], [1], [0, 0, 1, 1], [], []>} : vector<32x64xbf16>, vector<64x128xbf16>, vector<32x128xf32> -> vector<32x128xf32>
    %62 = arith.addf %61, %3 : vector<32x128xf32>
    %cst_48 = arith.constant 0.000000e+00 : f32
    %63 = vector.broadcast %cst_48 : f32 to vector<32x128xf32>
    %64 = arith.cmpf ogt, %62, %63 : vector<32x128xf32>
    %cst_49 = arith.constant 2.000000e-01 : f32
    %65 = vector.broadcast %cst_49 : f32 to vector<32x128xf32>
    %66 = arith.mulf %65, %62 : vector<32x128xf32>
    %67 = arith.select %64, %62, %66 : vector<32x128xi1>, vector<32x128xf32>
    %68 = arith.maximumf %57, %67 : vector<32x128xf32>
    %c0_50 = arith.constant 0 : index
    %c6 = arith.constant 6 : index
    %c0_51 = arith.constant 0 : index
    %c0_52 = arith.constant 0 : index
    %69 = vector.load %arg3[%c0_50, %c6, %c0_51, %c0_52] : memref<1x8x32x64xbf16, #tpu.memory_space<vmem>>, vector<1x1x32x64xbf16>
    %70 = vector.shape_cast %69 : vector<1x1x32x64xbf16> to vector<32x64xbf16>
    %c0_53 = arith.constant 0 : index
    %c0_54 = arith.constant 0 : index
    %71 = vector.load %arg5[%c0_53, %c0_54] : memref<64x128xbf16, #tpu.memory_space<vmem>>, vector<64x128xbf16>
    %cst_55 = arith.constant dense<0.000000e+00> : vector<32x128xf32>
    %72 = tpu.matmul %70, %71, %cst_55 {dimension_numbers = #tpu.dot_dimension_numbers<[1], [0], [0], [1], [0, 0, 1, 1], [], []>} : vector<32x64xbf16>, vector<64x128xbf16>, vector<32x128xf32> -> vector<32x128xf32>
    %73 = arith.addf %72, %3 : vector<32x128xf32>
    %cst_56 = arith.constant 0.000000e+00 : f32
    %74 = vector.broadcast %cst_56 : f32 to vector<32x128xf32>
    %75 = arith.cmpf ogt, %73, %74 : vector<32x128xf32>
    %cst_57 = arith.constant 2.000000e-01 : f32
    %76 = vector.broadcast %cst_57 : f32 to vector<32x128xf32>
    %77 = arith.mulf %76, %73 : vector<32x128xf32>
    %78 = arith.select %75, %73, %77 : vector<32x128xi1>, vector<32x128xf32>
    %79 = arith.maximumf %68, %78 : vector<32x128xf32>
    %c0_58 = arith.constant 0 : index
    %c7 = arith.constant 7 : index
    %c0_59 = arith.constant 0 : index
    %c0_60 = arith.constant 0 : index
    %80 = vector.load %arg3[%c0_58, %c7, %c0_59, %c0_60] : memref<1x8x32x64xbf16, #tpu.memory_space<vmem>>, vector<1x1x32x64xbf16>
    %81 = vector.shape_cast %80 : vector<1x1x32x64xbf16> to vector<32x64xbf16>
    %c0_61 = arith.constant 0 : index
    %c0_62 = arith.constant 0 : index
    %82 = vector.load %arg5[%c0_61, %c0_62] : memref<64x128xbf16, #tpu.memory_space<vmem>>, vector<64x128xbf16>
    %cst_63 = arith.constant dense<0.000000e+00> : vector<32x128xf32>
    %83 = tpu.matmul %81, %82, %cst_63 {dimension_numbers = #tpu.dot_dimension_numbers<[1], [0], [0], [1], [0, 0, 1, 1], [], []>} : vector<32x64xbf16>, vector<64x128xbf16>, vector<32x128xf32> -> vector<32x128xf32>
    %84 = arith.addf %83, %3 : vector<32x128xf32>
    %cst_64 = arith.constant 0.000000e+00 : f32
    %85 = vector.broadcast %cst_64 : f32 to vector<32x128xf32>
    %86 = arith.cmpf ogt, %84, %85 : vector<32x128xf32>
    %cst_65 = arith.constant 2.000000e-01 : f32
    %87 = vector.broadcast %cst_65 : f32 to vector<32x128xf32>
    %88 = arith.mulf %87, %84 : vector<32x128xf32>
    %89 = arith.select %86, %84, %88 : vector<32x128xi1>, vector<32x128xf32>
    %90 = arith.maximumf %79, %89 : vector<32x128xf32>
    %91 = arith.truncf %90 : vector<32x128xf32> to vector<32x128xbf16>
    %c0_i32_66 = arith.constant 0 : i32
    %92 = arith.cmpi eq, %arg2, %c0_i32_66 : i32
    %93 = arith.extui %92 : i1 to i32
    %c0_i32_67 = arith.constant 0 : i32
    %94 = arith.cmpi ne, %93, %c0_i32_67 : i32
    scf.if %94 {
      %c0_70 = arith.constant 0 : index
      %c0_71 = arith.constant 0 : index
      %c0_72 = arith.constant 0 : index
      %98 = vector.load %arg8[%c0_70, %c0_71, %c0_72] : memref<1x32x128xbf16, #tpu.memory_space<vmem>>, vector<1x32x128xbf16>
      %99 = vector.shape_cast %98 : vector<1x32x128xbf16> to vector<32x128xbf16>
      %100 = vector.shape_cast %91 : vector<32x128xbf16> to vector<1x32x128xbf16>
      tpu.vector_store %arg8[%c0_70, %c0_71, %c0_72], %100 {strides = array<i32>} : memref<1x32x128xbf16, #tpu.memory_space<vmem>>, vector<1x32x128xbf16>,
    } else {
    }
    %c0_i32_68 = arith.constant 0 : i32
    %95 = arith.cmpi sgt, %arg2, %c0_i32_68 : i32
    %96 = arith.extui %95 : i1 to i32
    %c0_i32_69 = arith.constant 0 : i32
    %97 = arith.cmpi ne, %96, %c0_i32_69 : i32
    scf.if %97 {
      %c0_70 = arith.constant 0 : index
      %c0_71 = arith.constant 0 : index
      %c0_72 = arith.constant 0 : index
      %98 = vector.load %arg8[%c0_70, %c0_71, %c0_72] : memref<1x32x128xbf16, #tpu.memory_space<vmem>>, vector<1x32x128xbf16>
      %99 = vector.shape_cast %98 : vector<1x32x128xbf16> to vector<32x128xbf16>
      %100 = arith.maximumf %99, %91 : vector<32x128xbf16>
      %c0_73 = arith.constant 0 : index
      %c0_74 = arith.constant 0 : index
      %c0_75 = arith.constant 0 : index
      %101 = vector.load %arg8[%c0_73, %c0_74, %c0_75] : memref<1x32x128xbf16, #tpu.memory_space<vmem>>, vector<1x32x128xbf16>
      %102 = vector.shape_cast %101 : vector<1x32x128xbf16> to vector<32x128xbf16>
      %103 = vector.shape_cast %100 : vector<32x128xbf16> to vector<1x32x128xbf16>
      tpu.vector_store %arg8[%c0_73, %c0_74, %c0_75], %103 {strides = array<i32>} : memref<1x32x128xbf16, #tpu.memory_space<vmem>>, vector<1x32x128xbf16>,
    } else {
    }
    return
  }
  func.func @transform_0(%arg0: i32, %arg1: i32, %arg2: i32) -> (i32, i32, i32, i32) {
    %c0_i32 = arith.constant 0 : i32
    %c0_i32_0 = arith.constant 0 : i32
    return %arg0, %arg2, %arg1, %c0_i32 : i32, i32, i32, i32
  }
  func.func @transform_1(%arg0: i32, %arg1: i32, %arg2: i32) -> (i32, i32, i32) {
    %c0_i32 = arith.constant 0 : i32
    %c0_i32_0 = arith.constant 0 : i32
    return %arg0, %arg1, %c0_i32 : i32, i32, i32
  }
  func.func @transform_2(%arg0: i32, %arg1: i32, %arg2: i32) -> (i32, i32) {
    %c0_i32 = arith.constant 0 : i32
    %c0_i32_0 = arith.constant 0 : i32
    %c0_i32_1 = arith.constant 0 : i32
    return %c0_i32, %c0_i32_0 : i32, i32
  }
  func.func @transform_3(%arg0: i32, %arg1: i32, %arg2: i32) -> (i32, i32) {
    %c0_i32 = arith.constant 0 : i32
    %c0_i32_0 = arith.constant 0 : i32
    %c0_i32_1 = arith.constant 0 : i32
    return %c0_i32, %c0_i32_0 : i32, i32
  }
  func.func @transform_4(%arg0: i32, %arg1: i32, %arg2: i32) -> (i32, i32) {
    %c0_i32 = arith.constant 0 : i32
    %c0_i32_0 = arith.constant 0 : i32
    %c0_i32_1 = arith.constant 0 : i32
    return %c0_i32, %c0_i32_0 : i32, i32
  }
  func.func @transform_5(%arg0: i32, %arg1: i32, %arg2: i32) -> (i32, i32, i32) {
    %c0_i32 = arith.constant 0 : i32
    %c0_i32_0 = arith.constant 0 : i32
    return %arg0, %arg1, %c0_i32 : i32, i32, i32
  }
}

module attributes {stable_mosaic.version = 11 : i64} {
  func.func @_neg_sqdist_kernel(%arg0: i32, %arg1: i32, %arg2: memref<1x32x128xbf16, #tpu.memory_space<vmem>>, %arg3: memref<1x32x128xbf16, #tpu.memory_space<vmem>>, %arg4: memref<1x32x1xf32, #tpu.memory_space<vmem>>, %arg5: memref<1x1x32xf32, #tpu.memory_space<vmem>>, %arg6: memref<1x32x32xbf16, #tpu.memory_space<vmem>>) attributes {dimension_semantics = [#tpu.dimension_semantics<parallel>, #tpu.dimension_semantics<parallel>], iteration_bounds = array<i64: 2, 1>, scalar_prefetch = 0 : i64, scratch_operands = 0 : i64, tpu.core_type = #tpu.core_type<tc>, window_params = [{transform_indices = @transform_0, window_bounds = array<i64: 1, 32, 128>}, {transform_indices = @transform_1, window_bounds = array<i64: 1, 32, 128>}, {transform_indices = @transform_2, window_bounds = array<i64: 1, 32, 1>}, {transform_indices = @transform_3, window_bounds = array<i64: 1, 1, 32>}, {transform_indices = @transform_4, window_bounds = array<i64: 1, 32, 32>}]} {
    %c0 = arith.constant 0 : index
    %c0_0 = arith.constant 0 : index
    %c0_1 = arith.constant 0 : index
    %0 = vector.load %arg2[%c0, %c0_0, %c0_1] : memref<1x32x128xbf16, #tpu.memory_space<vmem>>, vector<1x32x128xbf16>
    %1 = vector.shape_cast %0 : vector<1x32x128xbf16> to vector<32x128xbf16>
    %c0_2 = arith.constant 0 : index
    %c0_3 = arith.constant 0 : index
    %c0_4 = arith.constant 0 : index
    %2 = vector.load %arg3[%c0_2, %c0_3, %c0_4] : memref<1x32x128xbf16, #tpu.memory_space<vmem>>, vector<1x32x128xbf16>
    %3 = vector.shape_cast %2 : vector<1x32x128xbf16> to vector<32x128xbf16>
    %cst = arith.constant dense<0.000000e+00> : vector<32x32xf32>
    %4 = tpu.matmul %1, %3, %cst {dimension_numbers = #tpu.dot_dimension_numbers<[1], [1], [0], [0], [0, 0, 1, 0], [], []>} : vector<32x128xbf16>, vector<32x128xbf16>, vector<32x32xf32> -> vector<32x32xf32>
    %cst_5 = arith.constant 2.000000e+00 : f32
    %5 = vector.broadcast %cst_5 : f32 to vector<32x32xf32>
    %6 = arith.mulf %5, %4 : vector<32x32xf32>
    %c0_6 = arith.constant 0 : index
    %c0_7 = arith.constant 0 : index
    %c0_8 = arith.constant 0 : index
    %7 = vector.load %arg4[%c0_6, %c0_7, %c0_8] : memref<1x32x1xf32, #tpu.memory_space<vmem>>, vector<1x32x1xf32>
    %8 = vector.shape_cast %7 : vector<1x32x1xf32> to vector<32x1xf32>
    %9 = vector.broadcast %8 : vector<32x1xf32> to vector<32x32xf32>
    %10 = arith.subf %6, %9 : vector<32x32xf32>
    %c0_9 = arith.constant 0 : index
    %c0_10 = arith.constant 0 : index
    %c0_11 = arith.constant 0 : index
    %11 = vector.load %arg5[%c0_9, %c0_10, %c0_11] : memref<1x1x32xf32, #tpu.memory_space<vmem>>, vector<1x1x32xf32>
    %12 = vector.shape_cast %11 : vector<1x1x32xf32> to vector<1x32xf32>
    %13 = vector.broadcast %12 : vector<1x32xf32> to vector<32x32xf32>
    %14 = arith.subf %10, %13 : vector<32x32xf32>
    %15 = arith.truncf %14 : vector<32x32xf32> to vector<32x32xbf16>
    %c0_12 = arith.constant 0 : index
    %c0_13 = arith.constant 0 : index
    %c0_14 = arith.constant 0 : index
    %16 = vector.load %arg6[%c0_12, %c0_13, %c0_14] : memref<1x32x32xbf16, #tpu.memory_space<vmem>>, vector<1x32x32xbf16>
    %17 = vector.shape_cast %16 : vector<1x32x32xbf16> to vector<32x32xbf16>
    %18 = vector.shape_cast %15 : vector<32x32xbf16> to vector<1x32x32xbf16>
    tpu.vector_store %arg6[%c0_12, %c0_13, %c0_14], %18 {strides = array<i32>} : memref<1x32x32xbf16, #tpu.memory_space<vmem>>, vector<1x32x32xbf16>,
    return
  }
  func.func @transform_0(%arg0: i32, %arg1: i32) -> (i32, i32, i32) {
    %c0_i32 = arith.constant 0 : i32
    %c0_i32_0 = arith.constant 0 : i32
    %c0_i32_1 = arith.constant 0 : i32
    return %arg0, %c0_i32, %c0_i32_0 : i32, i32, i32
  }
  func.func @transform_1(%arg0: i32, %arg1: i32) -> (i32, i32, i32) {
    %c0_i32 = arith.constant 0 : i32
    %c0_i32_0 = arith.constant 0 : i32
    return %arg0, %arg1, %c0_i32 : i32, i32, i32
  }
  func.func @transform_2(%arg0: i32, %arg1: i32) -> (i32, i32, i32) {
    %c0_i32 = arith.constant 0 : i32
    %c0_i32_0 = arith.constant 0 : i32
    %c0_i32_1 = arith.constant 0 : i32
    return %arg0, %c0_i32, %c0_i32_0 : i32, i32, i32
  }
  func.func @transform_3(%arg0: i32, %arg1: i32) -> (i32, i32, i32) {
    %c0_i32 = arith.constant 0 : i32
    %c0_i32_0 = arith.constant 0 : i32
    return %arg0, %c0_i32, %arg1 : i32, i32, i32
  }
  func.func @transform_4(%arg0: i32, %arg1: i32) -> (i32, i32, i32) {
    %c0_i32 = arith.constant 0 : i32
    %c0_i32_0 = arith.constant 0 : i32
    return %arg0, %c0_i32, %arg1 : i32, i32, i32
  }
}

module attributes {stable_mosaic.version = 11 : i64} {
  func.func @_edgeconv_kernel(%arg0: i32, %arg1: i32, %arg2: i32, %arg3: memref<1x8x32x128xbf16, #tpu.memory_space<vmem>>, %arg4: memref<1x32x128xbf16, #tpu.memory_space<vmem>>, %arg5: memref<128x256xbf16, #tpu.memory_space<vmem>>, %arg6: memref<128x256xbf16, #tpu.memory_space<vmem>>, %arg7: memref<1x256xf32, #tpu.memory_space<vmem>>, %arg8: memref<1x32x256xbf16, #tpu.memory_space<vmem>>, %arg9: memref<32x256xf32, #tpu.memory_space<vmem>>) attributes {dimension_semantics = [#tpu.dimension_semantics<parallel>, #tpu.dimension_semantics<parallel>, #tpu.dimension_semantics<arbitrary>], iteration_bounds = array<i64: 2, 1, 1>, scalar_prefetch = 0 : i64, scratch_operands = 1 : i64, tpu.core_type = #tpu.core_type<tc>, window_params = [{transform_indices = @transform_0, window_bounds = array<i64: 1, 8, 32, 128>}, {transform_indices = @transform_1, window_bounds = array<i64: 1, 32, 128>}, {pipeline_mode = #tpu.pipeline_mode<synchronous>, transform_indices = @transform_2, window_bounds = array<i64: 128, 256>}, {pipeline_mode = #tpu.pipeline_mode<synchronous>, transform_indices = @transform_3, window_bounds = array<i64: 128, 256>}, {pipeline_mode = #tpu.pipeline_mode<synchronous>, transform_indices = @transform_4, window_bounds = array<i64: 1, 256>}, {transform_indices = @transform_5, window_bounds = array<i64: 1, 32, 256>}]} {
    %c0_i32 = arith.constant 0 : i32
    %0 = arith.cmpi eq, %arg2, %c0_i32 : i32
    %1 = arith.extui %0 : i1 to i32
    %c0_i32_0 = arith.constant 0 : i32
    %2 = arith.cmpi ne, %1, %c0_i32_0 : i32
    scf.if %2 {
      %c0_70 = arith.constant 0 : index
      %c0_71 = arith.constant 0 : index
      %c0_72 = arith.constant 0 : index
      %98 = vector.load %arg4[%c0_70, %c0_71, %c0_72] : memref<1x32x128xbf16, #tpu.memory_space<vmem>>, vector<1x32x128xbf16>
      %99 = vector.shape_cast %98 : vector<1x32x128xbf16> to vector<32x128xbf16>
      %c0_73 = arith.constant 0 : index
      %c0_74 = arith.constant 0 : index
      %100 = vector.load %arg6[%c0_73, %c0_74] : memref<128x256xbf16, #tpu.memory_space<vmem>>, vector<128x256xbf16>
      %cst_75 = arith.constant dense<0.000000e+00> : vector<32x256xf32>
      %101 = tpu.matmul %99, %100, %cst_75 {dimension_numbers = #tpu.dot_dimension_numbers<[1], [0], [0], [1], [0, 0, 1, 1], [], []>} : vector<32x128xbf16>, vector<128x256xbf16>, vector<32x256xf32> -> vector<32x256xf32>
      %c0_76 = arith.constant 0 : index
      %c0_77 = arith.constant 0 : index
      %102 = vector.load %arg7[%c0_76, %c0_77] : memref<1x256xf32, #tpu.memory_space<vmem>>, vector<1x256xf32>
      %103 = vector.broadcast %102 : vector<1x256xf32> to vector<32x256xf32>
      %104 = arith.addf %101, %103 : vector<32x256xf32>
      %c0_78 = arith.constant 0 : index
      %c0_79 = arith.constant 0 : index
      %105 = vector.load %arg9[%c0_78, %c0_79] : memref<32x256xf32, #tpu.memory_space<vmem>>, vector<32x256xf32>
      tpu.vector_store %arg9[%c0_78, %c0_79], %104 {strides = array<i32>} : memref<32x256xf32, #tpu.memory_space<vmem>>, vector<32x256xf32>,
    } else {
    }
    %c0 = arith.constant 0 : index
    %c0_1 = arith.constant 0 : index
    %3 = vector.load %arg9[%c0, %c0_1] : memref<32x256xf32, #tpu.memory_space<vmem>>, vector<32x256xf32>
    %c0_2 = arith.constant 0 : index
    %c0_3 = arith.constant 0 : index
    %c0_4 = arith.constant 0 : index
    %c0_5 = arith.constant 0 : index
    %4 = vector.load %arg3[%c0_2, %c0_3, %c0_4, %c0_5] : memref<1x8x32x128xbf16, #tpu.memory_space<vmem>>, vector<1x1x32x128xbf16>
    %5 = vector.shape_cast %4 : vector<1x1x32x128xbf16> to vector<32x128xbf16>
    %c0_6 = arith.constant 0 : index
    %c0_7 = arith.constant 0 : index
    %6 = vector.load %arg5[%c0_6, %c0_7] : memref<128x256xbf16, #tpu.memory_space<vmem>>, vector<128x256xbf16>
    %cst = arith.constant dense<0.000000e+00> : vector<32x256xf32>
    %7 = tpu.matmul %5, %6, %cst {dimension_numbers = #tpu.dot_dimension_numbers<[1], [0], [0], [1], [0, 0, 1, 1], [], []>} : vector<32x128xbf16>, vector<128x256xbf16>, vector<32x256xf32> -> vector<32x256xf32>
    %8 = arith.addf %7, %3 : vector<32x256xf32>
    %cst_8 = arith.constant 0.000000e+00 : f32
    %9 = vector.broadcast %cst_8 : f32 to vector<32x256xf32>
    %10 = arith.cmpf ogt, %8, %9 : vector<32x256xf32>
    %cst_9 = arith.constant 2.000000e-01 : f32
    %11 = vector.broadcast %cst_9 : f32 to vector<32x256xf32>
    %12 = arith.mulf %11, %8 : vector<32x256xf32>
    %13 = arith.select %10, %8, %12 : vector<32x256xi1>, vector<32x256xf32>
    %c0_10 = arith.constant 0 : index
    %c1 = arith.constant 1 : index
    %c0_11 = arith.constant 0 : index
    %c0_12 = arith.constant 0 : index
    %14 = vector.load %arg3[%c0_10, %c1, %c0_11, %c0_12] : memref<1x8x32x128xbf16, #tpu.memory_space<vmem>>, vector<1x1x32x128xbf16>
    %15 = vector.shape_cast %14 : vector<1x1x32x128xbf16> to vector<32x128xbf16>
    %c0_13 = arith.constant 0 : index
    %c0_14 = arith.constant 0 : index
    %16 = vector.load %arg5[%c0_13, %c0_14] : memref<128x256xbf16, #tpu.memory_space<vmem>>, vector<128x256xbf16>
    %cst_15 = arith.constant dense<0.000000e+00> : vector<32x256xf32>
    %17 = tpu.matmul %15, %16, %cst_15 {dimension_numbers = #tpu.dot_dimension_numbers<[1], [0], [0], [1], [0, 0, 1, 1], [], []>} : vector<32x128xbf16>, vector<128x256xbf16>, vector<32x256xf32> -> vector<32x256xf32>
    %18 = arith.addf %17, %3 : vector<32x256xf32>
    %cst_16 = arith.constant 0.000000e+00 : f32
    %19 = vector.broadcast %cst_16 : f32 to vector<32x256xf32>
    %20 = arith.cmpf ogt, %18, %19 : vector<32x256xf32>
    %cst_17 = arith.constant 2.000000e-01 : f32
    %21 = vector.broadcast %cst_17 : f32 to vector<32x256xf32>
    %22 = arith.mulf %21, %18 : vector<32x256xf32>
    %23 = arith.select %20, %18, %22 : vector<32x256xi1>, vector<32x256xf32>
    %24 = arith.maximumf %13, %23 : vector<32x256xf32>
    %c0_18 = arith.constant 0 : index
    %c2 = arith.constant 2 : index
    %c0_19 = arith.constant 0 : index
    %c0_20 = arith.constant 0 : index
    %25 = vector.load %arg3[%c0_18, %c2, %c0_19, %c0_20] : memref<1x8x32x128xbf16, #tpu.memory_space<vmem>>, vector<1x1x32x128xbf16>
    %26 = vector.shape_cast %25 : vector<1x1x32x128xbf16> to vector<32x128xbf16>
    %c0_21 = arith.constant 0 : index
    %c0_22 = arith.constant 0 : index
    %27 = vector.load %arg5[%c0_21, %c0_22] : memref<128x256xbf16, #tpu.memory_space<vmem>>, vector<128x256xbf16>
    %cst_23 = arith.constant dense<0.000000e+00> : vector<32x256xf32>
    %28 = tpu.matmul %26, %27, %cst_23 {dimension_numbers = #tpu.dot_dimension_numbers<[1], [0], [0], [1], [0, 0, 1, 1], [], []>} : vector<32x128xbf16>, vector<128x256xbf16>, vector<32x256xf32> -> vector<32x256xf32>
    %29 = arith.addf %28, %3 : vector<32x256xf32>
    %cst_24 = arith.constant 0.000000e+00 : f32
    %30 = vector.broadcast %cst_24 : f32 to vector<32x256xf32>
    %31 = arith.cmpf ogt, %29, %30 : vector<32x256xf32>
    %cst_25 = arith.constant 2.000000e-01 : f32
    %32 = vector.broadcast %cst_25 : f32 to vector<32x256xf32>
    %33 = arith.mulf %32, %29 : vector<32x256xf32>
    %34 = arith.select %31, %29, %33 : vector<32x256xi1>, vector<32x256xf32>
    %35 = arith.maximumf %24, %34 : vector<32x256xf32>
    %c0_26 = arith.constant 0 : index
    %c3 = arith.constant 3 : index
    %c0_27 = arith.constant 0 : index
    %c0_28 = arith.constant 0 : index
    %36 = vector.load %arg3[%c0_26, %c3, %c0_27, %c0_28] : memref<1x8x32x128xbf16, #tpu.memory_space<vmem>>, vector<1x1x32x128xbf16>
    %37 = vector.shape_cast %36 : vector<1x1x32x128xbf16> to vector<32x128xbf16>
    %c0_29 = arith.constant 0 : index
    %c0_30 = arith.constant 0 : index
    %38 = vector.load %arg5[%c0_29, %c0_30] : memref<128x256xbf16, #tpu.memory_space<vmem>>, vector<128x256xbf16>
    %cst_31 = arith.constant dense<0.000000e+00> : vector<32x256xf32>
    %39 = tpu.matmul %37, %38, %cst_31 {dimension_numbers = #tpu.dot_dimension_numbers<[1], [0], [0], [1], [0, 0, 1, 1], [], []>} : vector<32x128xbf16>, vector<128x256xbf16>, vector<32x256xf32> -> vector<32x256xf32>
    %40 = arith.addf %39, %3 : vector<32x256xf32>
    %cst_32 = arith.constant 0.000000e+00 : f32
    %41 = vector.broadcast %cst_32 : f32 to vector<32x256xf32>
    %42 = arith.cmpf ogt, %40, %41 : vector<32x256xf32>
    %cst_33 = arith.constant 2.000000e-01 : f32
    %43 = vector.broadcast %cst_33 : f32 to vector<32x256xf32>
    %44 = arith.mulf %43, %40 : vector<32x256xf32>
    %45 = arith.select %42, %40, %44 : vector<32x256xi1>, vector<32x256xf32>
    %46 = arith.maximumf %35, %45 : vector<32x256xf32>
    %c0_34 = arith.constant 0 : index
    %c4 = arith.constant 4 : index
    %c0_35 = arith.constant 0 : index
    %c0_36 = arith.constant 0 : index
    %47 = vector.load %arg3[%c0_34, %c4, %c0_35, %c0_36] : memref<1x8x32x128xbf16, #tpu.memory_space<vmem>>, vector<1x1x32x128xbf16>
    %48 = vector.shape_cast %47 : vector<1x1x32x128xbf16> to vector<32x128xbf16>
    %c0_37 = arith.constant 0 : index
    %c0_38 = arith.constant 0 : index
    %49 = vector.load %arg5[%c0_37, %c0_38] : memref<128x256xbf16, #tpu.memory_space<vmem>>, vector<128x256xbf16>
    %cst_39 = arith.constant dense<0.000000e+00> : vector<32x256xf32>
    %50 = tpu.matmul %48, %49, %cst_39 {dimension_numbers = #tpu.dot_dimension_numbers<[1], [0], [0], [1], [0, 0, 1, 1], [], []>} : vector<32x128xbf16>, vector<128x256xbf16>, vector<32x256xf32> -> vector<32x256xf32>
    %51 = arith.addf %50, %3 : vector<32x256xf32>
    %cst_40 = arith.constant 0.000000e+00 : f32
    %52 = vector.broadcast %cst_40 : f32 to vector<32x256xf32>
    %53 = arith.cmpf ogt, %51, %52 : vector<32x256xf32>
    %cst_41 = arith.constant 2.000000e-01 : f32
    %54 = vector.broadcast %cst_41 : f32 to vector<32x256xf32>
    %55 = arith.mulf %54, %51 : vector<32x256xf32>
    %56 = arith.select %53, %51, %55 : vector<32x256xi1>, vector<32x256xf32>
    %57 = arith.maximumf %46, %56 : vector<32x256xf32>
    %c0_42 = arith.constant 0 : index
    %c5 = arith.constant 5 : index
    %c0_43 = arith.constant 0 : index
    %c0_44 = arith.constant 0 : index
    %58 = vector.load %arg3[%c0_42, %c5, %c0_43, %c0_44] : memref<1x8x32x128xbf16, #tpu.memory_space<vmem>>, vector<1x1x32x128xbf16>
    %59 = vector.shape_cast %58 : vector<1x1x32x128xbf16> to vector<32x128xbf16>
    %c0_45 = arith.constant 0 : index
    %c0_46 = arith.constant 0 : index
    %60 = vector.load %arg5[%c0_45, %c0_46] : memref<128x256xbf16, #tpu.memory_space<vmem>>, vector<128x256xbf16>
    %cst_47 = arith.constant dense<0.000000e+00> : vector<32x256xf32>
    %61 = tpu.matmul %59, %60, %cst_47 {dimension_numbers = #tpu.dot_dimension_numbers<[1], [0], [0], [1], [0, 0, 1, 1], [], []>} : vector<32x128xbf16>, vector<128x256xbf16>, vector<32x256xf32> -> vector<32x256xf32>
    %62 = arith.addf %61, %3 : vector<32x256xf32>
    %cst_48 = arith.constant 0.000000e+00 : f32
    %63 = vector.broadcast %cst_48 : f32 to vector<32x256xf32>
    %64 = arith.cmpf ogt, %62, %63 : vector<32x256xf32>
    %cst_49 = arith.constant 2.000000e-01 : f32
    %65 = vector.broadcast %cst_49 : f32 to vector<32x256xf32>
    %66 = arith.mulf %65, %62 : vector<32x256xf32>
    %67 = arith.select %64, %62, %66 : vector<32x256xi1>, vector<32x256xf32>
    %68 = arith.maximumf %57, %67 : vector<32x256xf32>
    %c0_50 = arith.constant 0 : index
    %c6 = arith.constant 6 : index
    %c0_51 = arith.constant 0 : index
    %c0_52 = arith.constant 0 : index
    %69 = vector.load %arg3[%c0_50, %c6, %c0_51, %c0_52] : memref<1x8x32x128xbf16, #tpu.memory_space<vmem>>, vector<1x1x32x128xbf16>
    %70 = vector.shape_cast %69 : vector<1x1x32x128xbf16> to vector<32x128xbf16>
    %c0_53 = arith.constant 0 : index
    %c0_54 = arith.constant 0 : index
    %71 = vector.load %arg5[%c0_53, %c0_54] : memref<128x256xbf16, #tpu.memory_space<vmem>>, vector<128x256xbf16>
    %cst_55 = arith.constant dense<0.000000e+00> : vector<32x256xf32>
    %72 = tpu.matmul %70, %71, %cst_55 {dimension_numbers = #tpu.dot_dimension_numbers<[1], [0], [0], [1], [0, 0, 1, 1], [], []>} : vector<32x128xbf16>, vector<128x256xbf16>, vector<32x256xf32> -> vector<32x256xf32>
    %73 = arith.addf %72, %3 : vector<32x256xf32>
    %cst_56 = arith.constant 0.000000e+00 : f32
    %74 = vector.broadcast %cst_56 : f32 to vector<32x256xf32>
    %75 = arith.cmpf ogt, %73, %74 : vector<32x256xf32>
    %cst_57 = arith.constant 2.000000e-01 : f32
    %76 = vector.broadcast %cst_57 : f32 to vector<32x256xf32>
    %77 = arith.mulf %76, %73 : vector<32x256xf32>
    %78 = arith.select %75, %73, %77 : vector<32x256xi1>, vector<32x256xf32>
    %79 = arith.maximumf %68, %78 : vector<32x256xf32>
    %c0_58 = arith.constant 0 : index
    %c7 = arith.constant 7 : index
    %c0_59 = arith.constant 0 : index
    %c0_60 = arith.constant 0 : index
    %80 = vector.load %arg3[%c0_58, %c7, %c0_59, %c0_60] : memref<1x8x32x128xbf16, #tpu.memory_space<vmem>>, vector<1x1x32x128xbf16>
    %81 = vector.shape_cast %80 : vector<1x1x32x128xbf16> to vector<32x128xbf16>
    %c0_61 = arith.constant 0 : index
    %c0_62 = arith.constant 0 : index
    %82 = vector.load %arg5[%c0_61, %c0_62] : memref<128x256xbf16, #tpu.memory_space<vmem>>, vector<128x256xbf16>
    %cst_63 = arith.constant dense<0.000000e+00> : vector<32x256xf32>
    %83 = tpu.matmul %81, %82, %cst_63 {dimension_numbers = #tpu.dot_dimension_numbers<[1], [0], [0], [1], [0, 0, 1, 1], [], []>} : vector<32x128xbf16>, vector<128x256xbf16>, vector<32x256xf32> -> vector<32x256xf32>
    %84 = arith.addf %83, %3 : vector<32x256xf32>
    %cst_64 = arith.constant 0.000000e+00 : f32
    %85 = vector.broadcast %cst_64 : f32 to vector<32x256xf32>
    %86 = arith.cmpf ogt, %84, %85 : vector<32x256xf32>
    %cst_65 = arith.constant 2.000000e-01 : f32
    %87 = vector.broadcast %cst_65 : f32 to vector<32x256xf32>
    %88 = arith.mulf %87, %84 : vector<32x256xf32>
    %89 = arith.select %86, %84, %88 : vector<32x256xi1>, vector<32x256xf32>
    %90 = arith.maximumf %79, %89 : vector<32x256xf32>
    %91 = arith.truncf %90 : vector<32x256xf32> to vector<32x256xbf16>
    %c0_i32_66 = arith.constant 0 : i32
    %92 = arith.cmpi eq, %arg2, %c0_i32_66 : i32
    %93 = arith.extui %92 : i1 to i32
    %c0_i32_67 = arith.constant 0 : i32
    %94 = arith.cmpi ne, %93, %c0_i32_67 : i32
    scf.if %94 {
      %c0_70 = arith.constant 0 : index
      %c0_71 = arith.constant 0 : index
      %c0_72 = arith.constant 0 : index
      %98 = vector.load %arg8[%c0_70, %c0_71, %c0_72] : memref<1x32x256xbf16, #tpu.memory_space<vmem>>, vector<1x32x256xbf16>
      %99 = vector.shape_cast %98 : vector<1x32x256xbf16> to vector<32x256xbf16>
      %100 = vector.shape_cast %91 : vector<32x256xbf16> to vector<1x32x256xbf16>
      tpu.vector_store %arg8[%c0_70, %c0_71, %c0_72], %100 {strides = array<i32>} : memref<1x32x256xbf16, #tpu.memory_space<vmem>>, vector<1x32x256xbf16>,
    } else {
    }
    %c0_i32_68 = arith.constant 0 : i32
    %95 = arith.cmpi sgt, %arg2, %c0_i32_68 : i32
    %96 = arith.extui %95 : i1 to i32
    %c0_i32_69 = arith.constant 0 : i32
    %97 = arith.cmpi ne, %96, %c0_i32_69 : i32
    scf.if %97 {
      %c0_70 = arith.constant 0 : index
      %c0_71 = arith.constant 0 : index
      %c0_72 = arith.constant 0 : index
      %98 = vector.load %arg8[%c0_70, %c0_71, %c0_72] : memref<1x32x256xbf16, #tpu.memory_space<vmem>>, vector<1x32x256xbf16>
      %99 = vector.shape_cast %98 : vector<1x32x256xbf16> to vector<32x256xbf16>
      %100 = arith.maximumf %99, %91 : vector<32x256xbf16>
      %c0_73 = arith.constant 0 : index
      %c0_74 = arith.constant 0 : index
      %c0_75 = arith.constant 0 : index
      %101 = vector.load %arg8[%c0_73, %c0_74, %c0_75] : memref<1x32x256xbf16, #tpu.memory_space<vmem>>, vector<1x32x256xbf16>
      %102 = vector.shape_cast %101 : vector<1x32x256xbf16> to vector<32x256xbf16>
      %103 = vector.shape_cast %100 : vector<32x256xbf16> to vector<1x32x256xbf16>
      tpu.vector_store %arg8[%c0_73, %c0_74, %c0_75], %103 {strides = array<i32>} : memref<1x32x256xbf16, #tpu.memory_space<vmem>>, vector<1x32x256xbf16>,
    } else {
    }
    return
  }
  func.func @transform_0(%arg0: i32, %arg1: i32, %arg2: i32) -> (i32, i32, i32, i32) {
    %c0_i32 = arith.constant 0 : i32
    %c0_i32_0 = arith.constant 0 : i32
    return %arg0, %arg2, %arg1, %c0_i32 : i32, i32, i32, i32
  }
  func.func @transform_1(%arg0: i32, %arg1: i32, %arg2: i32) -> (i32, i32, i32) {
    %c0_i32 = arith.constant 0 : i32
    %c0_i32_0 = arith.constant 0 : i32
    return %arg0, %arg1, %c0_i32 : i32, i32, i32
  }
  func.func @transform_2(%arg0: i32, %arg1: i32, %arg2: i32) -> (i32, i32) {
    %c0_i32 = arith.constant 0 : i32
    %c0_i32_0 = arith.constant 0 : i32
    %c0_i32_1 = arith.constant 0 : i32
    return %c0_i32, %c0_i32_0 : i32, i32
  }
  func.func @transform_3(%arg0: i32, %arg1: i32, %arg2: i32) -> (i32, i32) {
    %c0_i32 = arith.constant 0 : i32
    %c0_i32_0 = arith.constant 0 : i32
    %c0_i32_1 = arith.constant 0 : i32
    return %c0_i32, %c0_i32_0 : i32, i32
  }
  func.func @transform_4(%arg0: i32, %arg1: i32, %arg2: i32) -> (i32, i32) {
    %c0_i32 = arith.constant 0 : i32
    %c0_i32_0 = arith.constant 0 : i32
    %c0_i32_1 = arith.constant 0 : i32
    return %c0_i32, %c0_i32_0 : i32, i32
  }
  func.func @transform_5(%arg0: i32, %arg1: i32, %arg2: i32) -> (i32, i32, i32) {
    %c0_i32 = arith.constant 0 : i32
    %c0_i32_0 = arith.constant 0 : i32
    return %arg0, %arg1, %c0_i32 : i32, i32, i32
  }
}

module attributes {stable_mosaic.version = 11 : i64} {
  func.func @_head_kernel(%arg0: i32, %arg1: i32, %arg2: memref<1x32x64xbf16, #tpu.memory_space<vmem>>, %arg3: memref<1x1x128xf32, #tpu.memory_space<vmem>>, %arg4: memref<64x256xbf16, #tpu.memory_space<vmem>>, %arg5: memref<128x256xbf16, #tpu.memory_space<vmem>>, %arg6: memref<1x256xf32, #tpu.memory_space<vmem>>, %arg7: memref<256x256xbf16, #tpu.memory_space<vmem>>, %arg8: memref<1x256xf32, #tpu.memory_space<vmem>>, %arg9: memref<256x128xbf16, #tpu.memory_space<vmem>>, %arg10: memref<1x128xf32, #tpu.memory_space<vmem>>, %arg11: memref<1x32x128xf32, #tpu.memory_space<vmem>>) attributes {dimension_semantics = [#tpu.dimension_semantics<parallel>, #tpu.dimension_semantics<parallel>], iteration_bounds = array<i64: 2, 1>, scalar_prefetch = 0 : i64, scratch_operands = 0 : i64, tpu.core_type = #tpu.core_type<tc>, window_params = [{transform_indices = @transform_0, window_bounds = array<i64: 1, 32, 64>}, {transform_indices = @transform_1, window_bounds = array<i64: 1, 1, 128>}, {pipeline_mode = #tpu.pipeline_mode<synchronous>, transform_indices = @transform_2, window_bounds = array<i64: 64, 256>}, {pipeline_mode = #tpu.pipeline_mode<synchronous>, transform_indices = @transform_3, window_bounds = array<i64: 128, 256>}, {pipeline_mode = #tpu.pipeline_mode<synchronous>, transform_indices = @transform_4, window_bounds = array<i64: 1, 256>}, {pipeline_mode = #tpu.pipeline_mode<synchronous>, transform_indices = @transform_5, window_bounds = array<i64: 256, 256>}, {pipeline_mode = #tpu.pipeline_mode<synchronous>, transform_indices = @transform_6, window_bounds = array<i64: 1, 256>}, {pipeline_mode = #tpu.pipeline_mode<synchronous>, transform_indices = @transform_7, window_bounds = array<i64: 256, 128>}, {pipeline_mode = #tpu.pipeline_mode<synchronous>, transform_indices = @transform_8, window_bounds = array<i64: 1, 128>}, {transform_indices = @transform_9, window_bounds = array<i64: 1, 32, 128>}]} {
    %c0 = arith.constant 0 : index
    %c0_0 = arith.constant 0 : index
    %c0_1 = arith.constant 0 : index
    %0 = vector.load %arg3[%c0, %c0_0, %c0_1] : memref<1x1x128xf32, #tpu.memory_space<vmem>>, vector<1x1x128xf32>
    %1 = vector.shape_cast %0 : vector<1x1x128xf32> to vector<1x128xf32>
    %2 = arith.truncf %1 : vector<1x128xf32> to vector<1x128xbf16>
    %c0_2 = arith.constant 0 : index
    %c0_3 = arith.constant 0 : index
    %3 = vector.load %arg5[%c0_2, %c0_3] : memref<128x256xbf16, #tpu.memory_space<vmem>>, vector<128x256xbf16>
    %cst = arith.constant dense<0.000000e+00> : vector<1x256xf32>
    %4 = tpu.matmul %2, %3, %cst {dimension_numbers = #tpu.dot_dimension_numbers<[1], [0], [0], [1], [0, 0, 1, 1], [], []>} : vector<1x128xbf16>, vector<128x256xbf16>, vector<1x256xf32> -> vector<1x256xf32>
    %c0_4 = arith.constant 0 : index
    %c0_5 = arith.constant 0 : index
    %5 = vector.load %arg6[%c0_4, %c0_5] : memref<1x256xf32, #tpu.memory_space<vmem>>, vector<1x256xf32>
    %6 = arith.addf %4, %5 : vector<1x256xf32>
    %c0_6 = arith.constant 0 : index
    %c0_7 = arith.constant 0 : index
    %c0_8 = arith.constant 0 : index
    %7 = vector.load %arg2[%c0_6, %c0_7, %c0_8] : memref<1x32x64xbf16, #tpu.memory_space<vmem>>, vector<1x32x64xbf16>
    %8 = vector.shape_cast %7 : vector<1x32x64xbf16> to vector<32x64xbf16>
    %c0_9 = arith.constant 0 : index
    %c0_10 = arith.constant 0 : index
    %9 = vector.load %arg4[%c0_9, %c0_10] : memref<64x256xbf16, #tpu.memory_space<vmem>>, vector<64x256xbf16>
    %cst_11 = arith.constant dense<0.000000e+00> : vector<32x256xf32>
    %10 = tpu.matmul %8, %9, %cst_11 {dimension_numbers = #tpu.dot_dimension_numbers<[1], [0], [0], [1], [0, 0, 1, 1], [], []>} : vector<32x64xbf16>, vector<64x256xbf16>, vector<32x256xf32> -> vector<32x256xf32>
    %11 = vector.broadcast %6 : vector<1x256xf32> to vector<32x256xf32>
    %12 = arith.addf %10, %11 : vector<32x256xf32>
    %cst_12 = arith.constant 0.000000e+00 : f32
    %13 = vector.broadcast %cst_12 : f32 to vector<32x256xf32>
    %14 = arith.cmpf ogt, %12, %13 : vector<32x256xf32>
    %cst_13 = arith.constant 2.000000e-01 : f32
    %15 = vector.broadcast %cst_13 : f32 to vector<32x256xf32>
    %16 = arith.mulf %15, %12 : vector<32x256xf32>
    %17 = arith.select %14, %12, %16 : vector<32x256xi1>, vector<32x256xf32>
    %18 = arith.truncf %17 : vector<32x256xf32> to vector<32x256xbf16>
    %c0_14 = arith.constant 0 : index
    %c0_15 = arith.constant 0 : index
    %19 = vector.load %arg7[%c0_14, %c0_15] : memref<256x256xbf16, #tpu.memory_space<vmem>>, vector<256x256xbf16>
    %cst_16 = arith.constant dense<0.000000e+00> : vector<32x256xf32>
    %20 = tpu.matmul %18, %19, %cst_16 {dimension_numbers = #tpu.dot_dimension_numbers<[1], [0], [0], [1], [0, 0, 1, 1], [], []>} : vector<32x256xbf16>, vector<256x256xbf16>, vector<32x256xf32> -> vector<32x256xf32>
    %c0_17 = arith.constant 0 : index
    %c0_18 = arith.constant 0 : index
    %21 = vector.load %arg8[%c0_17, %c0_18] : memref<1x256xf32, #tpu.memory_space<vmem>>, vector<1x256xf32>
    %22 = vector.broadcast %21 : vector<1x256xf32> to vector<32x256xf32>
    %23 = arith.addf %20, %22 : vector<32x256xf32>
    %cst_19 = arith.constant 0.000000e+00 : f32
    %24 = vector.broadcast %cst_19 : f32 to vector<32x256xf32>
    %25 = arith.cmpf ogt, %23, %24 : vector<32x256xf32>
    %cst_20 = arith.constant 2.000000e-01 : f32
    %26 = vector.broadcast %cst_20 : f32 to vector<32x256xf32>
    %27 = arith.mulf %26, %23 : vector<32x256xf32>
    %28 = arith.select %25, %23, %27 : vector<32x256xi1>, vector<32x256xf32>
    %29 = arith.truncf %28 : vector<32x256xf32> to vector<32x256xbf16>
    %c0_21 = arith.constant 0 : index
    %c0_22 = arith.constant 0 : index
    %30 = vector.load %arg9[%c0_21, %c0_22] : memref<256x128xbf16, #tpu.memory_space<vmem>>, vector<256x128xbf16>
    %cst_23 = arith.constant dense<0.000000e+00> : vector<32x128xf32>
    %31 = tpu.matmul %29, %30, %cst_23 {dimension_numbers = #tpu.dot_dimension_numbers<[1], [0], [0], [1], [0, 0, 1, 1], [], []>} : vector<32x256xbf16>, vector<256x128xbf16>, vector<32x128xf32> -> vector<32x128xf32>
    %c0_24 = arith.constant 0 : index
    %c0_25 = arith.constant 0 : index
    %32 = vector.load %arg10[%c0_24, %c0_25] : memref<1x128xf32, #tpu.memory_space<vmem>>, vector<1x128xf32>
    %33 = vector.broadcast %32 : vector<1x128xf32> to vector<32x128xf32>
    %34 = arith.addf %31, %33 : vector<32x128xf32>
    %c0_26 = arith.constant 0 : index
    %c0_27 = arith.constant 0 : index
    %c0_28 = arith.constant 0 : index
    %35 = vector.load %arg11[%c0_26, %c0_27, %c0_28] : memref<1x32x128xf32, #tpu.memory_space<vmem>>, vector<1x32x128xf32>
    %36 = vector.shape_cast %35 : vector<1x32x128xf32> to vector<32x128xf32>
    %37 = vector.shape_cast %34 : vector<32x128xf32> to vector<1x32x128xf32>
    tpu.vector_store %arg11[%c0_26, %c0_27, %c0_28], %37 {strides = array<i32>} : memref<1x32x128xf32, #tpu.memory_space<vmem>>, vector<1x32x128xf32>,
    return
  }
  func.func @transform_0(%arg0: i32, %arg1: i32) -> (i32, i32, i32) {
    %c0_i32 = arith.constant 0 : i32
    %c0_i32_0 = arith.constant 0 : i32
    return %arg0, %arg1, %c0_i32 : i32, i32, i32
  }
  func.func @transform_1(%arg0: i32, %arg1: i32) -> (i32, i32, i32) {
    %c0_i32 = arith.constant 0 : i32
    %c0_i32_0 = arith.constant 0 : i32
    %c0_i32_1 = arith.constant 0 : i32
    return %arg0, %c0_i32, %c0_i32_0 : i32, i32, i32
  }
  func.func @transform_2(%arg0: i32, %arg1: i32) -> (i32, i32) {
    %c0_i32 = arith.constant 0 : i32
    %c0_i32_0 = arith.constant 0 : i32
    %c0_i32_1 = arith.constant 0 : i32
    return %c0_i32, %c0_i32_0 : i32, i32
  }
  func.func @transform_3(%arg0: i32, %arg1: i32) -> (i32, i32) {
    %c0_i32 = arith.constant 0 : i32
    %c0_i32_0 = arith.constant 0 : i32
    %c0_i32_1 = arith.constant 0 : i32
    return %c0_i32, %c0_i32_0 : i32, i32
  }
  func.func @transform_4(%arg0: i32, %arg1: i32) -> (i32, i32) {
    %c0_i32 = arith.constant 0 : i32
    %c0_i32_0 = arith.constant 0 : i32
    %c0_i32_1 = arith.constant 0 : i32
    return %c0_i32, %c0_i32_0 : i32, i32
  }
  func.func @transform_5(%arg0: i32, %arg1: i32) -> (i32, i32) {
    %c0_i32 = arith.constant 0 : i32
    %c0_i32_0 = arith.constant 0 : i32
    %c0_i32_1 = arith.constant 0 : i32
    return %c0_i32, %c0_i32_0 : i32, i32
  }
  func.func @transform_6(%arg0: i32, %arg1: i32) -> (i32, i32) {
    %c0_i32 = arith.constant 0 : i32
    %c0_i32_0 = arith.constant 0 : i32
    %c0_i32_1 = arith.constant 0 : i32
    return %c0_i32, %c0_i32_0 : i32, i32
  }
  func.func @transform_7(%arg0: i32, %arg1: i32) -> (i32, i32) {
    %c0_i32 = arith.constant 0 : i32
    %c0_i32_0 = arith.constant 0 : i32
    %c0_i32_1 = arith.constant 0 : i32
    return %c0_i32, %c0_i32_0 : i32, i32
  }
  func.func @transform_8(%arg0: i32, %arg1: i32) -> (i32, i32) {
    %c0_i32 = arith.constant 0 : i32
    %c0_i32_0 = arith.constant 0 : i32
    %c0_i32_1 = arith.constant 0 : i32
    return %c0_i32, %c0_i32_0 : i32, i32
  }
  func.func @transform_9(%arg0: i32, %arg1: i32) -> (i32, i32, i32) {
    %c0_i32 = arith.constant 0 : i32
    %c0_i32_0 = arith.constant 0 : i32
    return %arg0, %arg1, %c0_i32 : i32, i32, i32
  }
}

module attributes {stable_mosaic.version = 11 : i64} {
  func.func @kernel(%arg0: i32, %arg1: i32, %arg2: memref<1x32x64xbf16, #tpu.memory_space<vmem>>, %arg3: memref<1x32x64xbf16, #tpu.memory_space<vmem>>, %arg4: memref<1x32x128xbf16, #tpu.memory_space<vmem>>, %arg5: memref<1x32x256xbf16, #tpu.memory_space<vmem>>, %arg6: memref<64x64xbf16, #tpu.memory_space<vmem>>, %arg7: memref<64x64xbf16, #tpu.memory_space<vmem>>, %arg8: memref<128x64xbf16, #tpu.memory_space<vmem>>, %arg9: memref<256x64xbf16, #tpu.memory_space<vmem>>, %arg10: memref<1x64xf32, #tpu.memory_space<vmem>>, %arg11: memref<1x32x64xbf16, #tpu.memory_space<vmem>>, %arg12: memref<1x1x64xf32, #tpu.memory_space<vmem>>, %arg13: memref<1x1x64xf32, #tpu.memory_space<vmem>>) attributes {dimension_semantics = [#tpu.dimension_semantics<parallel>, #tpu.dimension_semantics<arbitrary>], iteration_bounds = array<i64: 2, 1>, scalar_prefetch = 0 : i64, scratch_operands = 0 : i64, tpu.core_type = #tpu.core_type<tc>, window_params = [{transform_indices = @transform_0, window_bounds = array<i64: 1, 32, 64>}, {transform_indices = @transform_1, window_bounds = array<i64: 1, 32, 64>}, {transform_indices = @transform_2, window_bounds = array<i64: 1, 32, 128>}, {transform_indices = @transform_3, window_bounds = array<i64: 1, 32, 256>}, {pipeline_mode = #tpu.pipeline_mode<synchronous>, transform_indices = @transform_4, window_bounds = array<i64: 64, 64>}, {pipeline_mode = #tpu.pipeline_mode<synchronous>, transform_indices = @transform_5, window_bounds = array<i64: 64, 64>}, {pipeline_mode = #tpu.pipeline_mode<synchronous>, transform_indices = @transform_6, window_bounds = array<i64: 128, 64>}, {pipeline_mode = #tpu.pipeline_mode<synchronous>, transform_indices = @transform_7, window_bounds = array<i64: 256, 64>}, {pipeline_mode = #tpu.pipeline_mode<synchronous>, transform_indices = @transform_8, window_bounds = array<i64: 1, 64>}, {transform_indices = @transform_9, window_bounds = array<i64: 1, 32, 64>}, {transform_indices = @transform_10, window_bounds = array<i64: 1, 1, 64>}, {transform_indices = @transform_11, window_bounds = array<i64: 1, 1, 64>}]} {
    %c0 = arith.constant 0 : index
    %c0_0 = arith.constant 0 : index
    %c0_1 = arith.constant 0 : index
    %0 = vector.load %arg2[%c0, %c0_0, %c0_1] : memref<1x32x64xbf16, #tpu.memory_space<vmem>>, vector<1x32x64xbf16>
    %1 = vector.shape_cast %0 : vector<1x32x64xbf16> to vector<32x64xbf16>
    %c0_2 = arith.constant 0 : index
    %c0_3 = arith.constant 0 : index
    %2 = vector.load %arg6[%c0_2, %c0_3] : memref<64x64xbf16, #tpu.memory_space<vmem>>, vector<64x64xbf16>
    %cst = arith.constant dense<0.000000e+00> : vector<32x64xf32>
    %3 = tpu.matmul %1, %2, %cst {dimension_numbers = #tpu.dot_dimension_numbers<[1], [0], [0], [1], [0, 0, 1, 1], [], []>} : vector<32x64xbf16>, vector<64x64xbf16>, vector<32x64xf32> -> vector<32x64xf32>
    %c0_4 = arith.constant 0 : index
    %c0_5 = arith.constant 0 : index
    %c0_6 = arith.constant 0 : index
    %4 = vector.load %arg3[%c0_4, %c0_5, %c0_6] : memref<1x32x64xbf16, #tpu.memory_space<vmem>>, vector<1x32x64xbf16>
    %5 = vector.shape_cast %4 : vector<1x32x64xbf16> to vector<32x64xbf16>
    %c0_7 = arith.constant 0 : index
    %c0_8 = arith.constant 0 : index
    %6 = vector.load %arg7[%c0_7, %c0_8] : memref<64x64xbf16, #tpu.memory_space<vmem>>, vector<64x64xbf16>
    %cst_9 = arith.constant dense<0.000000e+00> : vector<32x64xf32>
    %7 = tpu.matmul %5, %6, %cst_9 {dimension_numbers = #tpu.dot_dimension_numbers<[1], [0], [0], [1], [0, 0, 1, 1], [], []>} : vector<32x64xbf16>, vector<64x64xbf16>, vector<32x64xf32> -> vector<32x64xf32>
    %8 = arith.addf %3, %7 : vector<32x64xf32>
    %c0_10 = arith.constant 0 : index
    %c0_11 = arith.constant 0 : index
    %c0_12 = arith.constant 0 : index
    %9 = vector.load %arg4[%c0_10, %c0_11, %c0_12] : memref<1x32x128xbf16, #tpu.memory_space<vmem>>, vector<1x32x128xbf16>
    %10 = vector.shape_cast %9 : vector<1x32x128xbf16> to vector<32x128xbf16>
    %c0_13 = arith.constant 0 : index
    %c0_14 = arith.constant 0 : index
    %11 = vector.load %arg8[%c0_13, %c0_14] : memref<128x64xbf16, #tpu.memory_space<vmem>>, vector<128x64xbf16>
    %cst_15 = arith.constant dense<0.000000e+00> : vector<32x64xf32>
    %12 = tpu.matmul %10, %11, %cst_15 {dimension_numbers = #tpu.dot_dimension_numbers<[1], [0], [0], [1], [0, 0, 1, 1], [], []>} : vector<32x128xbf16>, vector<128x64xbf16>, vector<32x64xf32> -> vector<32x64xf32>
    %13 = arith.addf %8, %12 : vector<32x64xf32>
    %c0_16 = arith.constant 0 : index
    %c0_17 = arith.constant 0 : index
    %c0_18 = arith.constant 0 : index
    %14 = vector.load %arg5[%c0_16, %c0_17, %c0_18] : memref<1x32x256xbf16, #tpu.memory_space<vmem>>, vector<1x32x256xbf16>
    %15 = vector.shape_cast %14 : vector<1x32x256xbf16> to vector<32x256xbf16>
    %c0_19 = arith.constant 0 : index
    %c0_20 = arith.constant 0 : index
    %16 = vector.load %arg9[%c0_19, %c0_20] : memref<256x64xbf16, #tpu.memory_space<vmem>>, vector<256x64xbf16>
    %cst_21 = arith.constant dense<0.000000e+00> : vector<32x64xf32>
    %17 = tpu.matmul %15, %16, %cst_21 {dimension_numbers = #tpu.dot_dimension_numbers<[1], [0], [0], [1], [0, 0, 1, 1], [], []>} : vector<32x256xbf16>, vector<256x64xbf16>, vector<32x64xf32> -> vector<32x64xf32>
    %18 = arith.addf %13, %17 : vector<32x64xf32>
    %c0_22 = arith.constant 0 : index
    %c0_23 = arith.constant 0 : index
    %19 = vector.load %arg10[%c0_22, %c0_23] : memref<1x64xf32, #tpu.memory_space<vmem>>, vector<1x64xf32>
    %20 = vector.broadcast %19 : vector<1x64xf32> to vector<32x64xf32>
    %21 = arith.addf %18, %20 : vector<32x64xf32>
    %cst_24 = arith.constant 0.000000e+00 : f32
    %22 = vector.broadcast %cst_24 : f32 to vector<32x64xf32>
    %23 = arith.cmpf ogt, %21, %22 : vector<32x64xf32>
    %cst_25 = arith.constant 2.000000e-01 : f32
    %24 = vector.broadcast %cst_25 : f32 to vector<32x64xf32>
    %25 = arith.mulf %24, %21 : vector<32x64xf32>
    %26 = arith.select %23, %21, %25 : vector<32x64xi1>, vector<32x64xf32>
    %27 = arith.truncf %26 : vector<32x64xf32> to vector<32x64xbf16>
    %c0_26 = arith.constant 0 : index
    %c0_27 = arith.constant 0 : index
    %c0_28 = arith.constant 0 : index
    %28 = vector.load %arg11[%c0_26, %c0_27, %c0_28] : memref<1x32x64xbf16, #tpu.memory_space<vmem>>, vector<1x32x64xbf16>
    %29 = vector.shape_cast %28 : vector<1x32x64xbf16> to vector<32x64xbf16>
    %30 = vector.shape_cast %27 : vector<32x64xbf16> to vector<1x32x64xbf16>
    tpu.vector_store %arg11[%c0_26, %c0_27, %c0_28], %30 {strides = array<i32>} : memref<1x32x64xbf16, #tpu.memory_space<vmem>>, vector<1x32x64xbf16>,
    %cst_29 = arith.constant dense<0xFF800000> : vector<64xf32>
    %31 = vector.multi_reduction <maximumf>, %26, %cst_29 [0] : vector<32x64xf32> to vector<64xf32>
    %32 = vector.shape_cast %31 : vector<64xf32> to vector<1x64xf32>
    %cst_30 = arith.constant dense<0.000000e+00> : vector<64xf32>
    %33 = vector.multi_reduction <add>, %26, %cst_30 [0] : vector<32x64xf32> to vector<64xf32>
    %34 = vector.shape_cast %33 : vector<64xf32> to vector<1x64xf32>
    %c0_i32 = arith.constant 0 : i32
    %35 = arith.cmpi eq, %arg1, %c0_i32 : i32
    %36 = arith.extui %35 : i1 to i32
    %c0_i32_31 = arith.constant 0 : i32
    %37 = arith.cmpi ne, %36, %c0_i32_31 : i32
    scf.if %37 {
      %c0_36 = arith.constant 0 : index
      %c0_37 = arith.constant 0 : index
      %c0_38 = arith.constant 0 : index
      %44 = vector.load %arg12[%c0_36, %c0_37, %c0_38] : memref<1x1x64xf32, #tpu.memory_space<vmem>>, vector<1x1x64xf32>
      %45 = vector.shape_cast %44 : vector<1x1x64xf32> to vector<1x64xf32>
      %46 = vector.shape_cast %32 : vector<1x64xf32> to vector<1x1x64xf32>
      tpu.vector_store %arg12[%c0_36, %c0_37, %c0_38], %46 {strides = array<i32>} : memref<1x1x64xf32, #tpu.memory_space<vmem>>, vector<1x1x64xf32>,
      %c0_39 = arith.constant 0 : index
      %c0_40 = arith.constant 0 : index
      %c0_41 = arith.constant 0 : index
      %47 = vector.load %arg13[%c0_39, %c0_40, %c0_41] : memref<1x1x64xf32, #tpu.memory_space<vmem>>, vector<1x1x64xf32>
      %48 = vector.shape_cast %47 : vector<1x1x64xf32> to vector<1x64xf32>
      %49 = vector.shape_cast %34 : vector<1x64xf32> to vector<1x1x64xf32>
      tpu.vector_store %arg13[%c0_39, %c0_40, %c0_41], %49 {strides = array<i32>} : memref<1x1x64xf32, #tpu.memory_space<vmem>>, vector<1x1x64xf32>,
    } else {
    }
    %c0_i32_32 = arith.constant 0 : i32
    %38 = arith.cmpi sgt, %arg1, %c0_i32_32 : i32
    %39 = arith.extui %38 : i1 to i32
    %c0_i32_33 = arith.constant 0 : i32
    %40 = arith.cmpi ne, %39, %c0_i32_33 : i32
    scf.if %40 {
      %c0_36 = arith.constant 0 : index
      %c0_37 = arith.constant 0 : index
      %c0_38 = arith.constant 0 : index
      %44 = vector.load %arg12[%c0_36, %c0_37, %c0_38] : memref<1x1x64xf32, #tpu.memory_space<vmem>>, vector<1x1x64xf32>
      %45 = vector.shape_cast %44 : vector<1x1x64xf32> to vector<1x64xf32>
      %46 = arith.maximumf %45, %32 : vector<1x64xf32>
      %c0_39 = arith.constant 0 : index
      %c0_40 = arith.constant 0 : index
      %c0_41 = arith.constant 0 : index
      %47 = vector.load %arg12[%c0_39, %c0_40, %c0_41] : memref<1x1x64xf32, #tpu.memory_space<vmem>>, vector<1x1x64xf32>
      %48 = vector.shape_cast %47 : vector<1x1x64xf32> to vector<1x64xf32>
      %49 = vector.shape_cast %46 : vector<1x64xf32> to vector<1x1x64xf32>
      tpu.vector_store %arg12[%c0_39, %c0_40, %c0_41], %49 {strides = array<i32>} : memref<1x1x64xf32, #tpu.memory_space<vmem>>, vector<1x1x64xf32>,
      %c0_42 = arith.constant 0 : index
      %c0_43 = arith.constant 0 : index
      %c0_44 = arith.constant 0 : index
      %50 = vector.load %arg13[%c0_42, %c0_43, %c0_44] : memref<1x1x64xf32, #tpu.memory_space<vmem>>, vector<1x1x64xf32>
      %51 = vector.shape_cast %50 : vector<1x1x64xf32> to vector<1x64xf32>
      %52 = arith.addf %51, %34 : vector<1x64xf32>
      %c0_45 = arith.constant 0 : index
      %c0_46 = arith.constant 0 : index
      %c0_47 = arith.constant 0 : index
      %53 = vector.load %arg13[%c0_45, %c0_46, %c0_47] : memref<1x1x64xf32, #tpu.memory_space<vmem>>, vector<1x1x64xf32>
      %54 = vector.shape_cast %53 : vector<1x1x64xf32> to vector<1x64xf32>
      %55 = vector.shape_cast %52 : vector<1x64xf32> to vector<1x1x64xf32>
      tpu.vector_store %arg13[%c0_45, %c0_46, %c0_47], %55 {strides = array<i32>} : memref<1x1x64xf32, #tpu.memory_space<vmem>>, vector<1x1x64xf32>,
    } else {
    }
    %c0_i32_34 = arith.constant 0 : i32
    %41 = arith.cmpi eq, %arg1, %c0_i32_34 : i32
    %42 = arith.extui %41 : i1 to i32
    %c0_i32_35 = arith.constant 0 : i32
    %43 = arith.cmpi ne, %42, %c0_i32_35 : i32
    scf.if %43 {
      %c0_36 = arith.constant 0 : index
      %c0_37 = arith.constant 0 : index
      %c0_38 = arith.constant 0 : index
      %44 = vector.load %arg13[%c0_36, %c0_37, %c0_38] : memref<1x1x64xf32, #tpu.memory_space<vmem>>, vector<1x1x64xf32>
      %45 = vector.shape_cast %44 : vector<1x1x64xf32> to vector<1x64xf32>
      %cst_39 = arith.constant 3.125000e-02 : f32
      %46 = vector.broadcast %cst_39 : f32 to vector<1x64xf32>
      %47 = arith.mulf %45, %46 : vector<1x64xf32>
      %c0_40 = arith.constant 0 : index
      %c0_41 = arith.constant 0 : index
      %c0_42 = arith.constant 0 : index
      %48 = vector.load %arg13[%c0_40, %c0_41, %c0_42] : memref<1x1x64xf32, #tpu.memory_space<vmem>>, vector<1x1x64xf32>
      %49 = vector.shape_cast %48 : vector<1x1x64xf32> to vector<1x64xf32>
      %50 = vector.shape_cast %47 : vector<1x64xf32> to vector<1x1x64xf32>
      tpu.vector_store %arg13[%c0_40, %c0_41, %c0_42], %50 {strides = array<i32>} : memref<1x1x64xf32, #tpu.memory_space<vmem>>, vector<1x1x64xf32>,
    } else {
    }
    return
  }
  func.func @transform_0(%arg0: i32, %arg1: i32) -> (i32, i32, i32) {
    %c0_i32 = arith.constant 0 : i32
    %c0_i32_0 = arith.constant 0 : i32
    return %arg0, %arg1, %c0_i32 : i32, i32, i32
  }
  func.func @transform_1(%arg0: i32, %arg1: i32) -> (i32, i32, i32) {
    %c0_i32 = arith.constant 0 : i32
    %c0_i32_0 = arith.constant 0 : i32
    return %arg0, %arg1, %c0_i32 : i32, i32, i32
  }
  func.func @transform_2(%arg0: i32, %arg1: i32) -> (i32, i32, i32) {
    %c0_i32 = arith.constant 0 : i32
    %c0_i32_0 = arith.constant 0 : i32
    return %arg0, %arg1, %c0_i32 : i32, i32, i32
  }
  func.func @transform_3(%arg0: i32, %arg1: i32) -> (i32, i32, i32) {
    %c0_i32 = arith.constant 0 : i32
    %c0_i32_0 = arith.constant 0 : i32
    return %arg0, %arg1, %c0_i32 : i32, i32, i32
  }
  func.func @transform_4(%arg0: i32, %arg1: i32) -> (i32, i32) {
    %c0_i32 = arith.constant 0 : i32
    %c0_i32_0 = arith.constant 0 : i32
    %c0_i32_1 = arith.constant 0 : i32
    return %c0_i32, %c0_i32_0 : i32, i32
  }
  func.func @transform_5(%arg0: i32, %arg1: i32) -> (i32, i32) {
    %c0_i32 = arith.constant 0 : i32
    %c0_i32_0 = arith.constant 0 : i32
    %c0_i32_1 = arith.constant 0 : i32
    return %c0_i32, %c0_i32_0 : i32, i32
  }
  func.func @transform_6(%arg0: i32, %arg1: i32) -> (i32, i32) {
    %c0_i32 = arith.constant 0 : i32
    %c0_i32_0 = arith.constant 0 : i32
    %c0_i32_1 = arith.constant 0 : i32
    return %c0_i32, %c0_i32_0 : i32, i32
  }
  func.func @transform_7(%arg0: i32, %arg1: i32) -> (i32, i32) {
    %c0_i32 = arith.constant 0 : i32
    %c0_i32_0 = arith.constant 0 : i32
    %c0_i32_1 = arith.constant 0 : i32
    return %c0_i32, %c0_i32_0 : i32, i32
  }
  func.func @transform_8(%arg0: i32, %arg1: i32) -> (i32, i32) {
    %c0_i32 = arith.constant 0 : i32
    %c0_i32_0 = arith.constant 0 : i32
    %c0_i32_1 = arith.constant 0 : i32
    return %c0_i32, %c0_i32_0 : i32, i32
  }
  func.func @transform_9(%arg0: i32, %arg1: i32) -> (i32, i32, i32) {
    %c0_i32 = arith.constant 0 : i32
    %c0_i32_0 = arith.constant 0 : i32
    return %arg0, %arg1, %c0_i32 : i32, i32, i32
  }
  func.func @transform_10(%arg0: i32, %arg1: i32) -> (i32, i32, i32) {
    %c0_i32 = arith.constant 0 : i32
    %c0_i32_0 = arith.constant 0 : i32
    %c0_i32_1 = arith.constant 0 : i32
    return %arg0, %c0_i32, %c0_i32_0 : i32, i32, i32
  }
  func.func @transform_11(%arg0: i32, %arg1: i32) -> (i32, i32, i32) {
    %c0_i32 = arith.constant 0 : i32
    %c0_i32_0 = arith.constant 0 : i32
    %c0_i32_1 = arith.constant 0 : i32
    return %arg0, %c0_i32, %c0_i32_0 : i32, i32, i32
  }
}

</mosaic_0001>

<bundles_post_ra>
// kernel: _lambda_.10
= control target key start
LH: loop header
LB: loop body
LE: loop exit
PB: predicated region body
PF: predicated region fallthrough
CT: control target
= control target key end

     0   :  { %s702_s15 = smov 0   ;;  %s704_s16 = smov 0   ;;  %s764_s0 = inlined_call_operand.vmem [shape: bf16[2,32,3], index: 0, kind: input, shape index: {}, may-alias: {0,1}]   ;;  %s765_s1 = inlined_call_operand.vmem [shape: bf16[2,32,3], index: 1, kind: input, shape index: {}, may-alias: {0,1}]   ;;  %s766_s2 = inlined_call_operand.vmem [shape: f32[2,32,1], index: 2, kind: input, shape index: {}]   ;;  %s767_s3 = inlined_call_operand.vmem [shape: f32[2,1,32], index: 3, kind: input, shape index: {}]   ;;  %s768_s4 = inlined_call_operand.vmem [shape: bf16[2,32,32], index: 4, kind: output, shape index: {}]  }
   0x1   :  { %s706_s17 = smov 0  }
   0x2 LB: > { %s26_s18 = sadd.s32 1, %s670_s16  ;;  %p577_p0 = scmp.ge.s32.totalorder %s674_s17, 1  ;;  %s674_s17 = sphi %s706_s17, %s14_s17   ;;  %s670_s16 = sphi %s704_s16, %s770_s16   ;;  %s666_s15 = sphi %s702_s15, %s769_s15  }
   0x3   : > { %p28_p1 = scmp.ge.s32.totalorder %s26_s18, 2  ;;  %p216_p2 = scmp.lt.s32.totalorder %s674_s17, 3 }
   0x5   : > { %s772_s18 = smov (%p28_p1, %s26_s18), 0  ;;  %p217_p3 = pnand %p577_p0, %p216_p2 }
   0x6   : > { %p265_p4 = scmp.lt.s32.totalorder (!%p217_p3), %s666_s15, 1 }
   0x7   : > { %220 = sbr.rel (%p217_p3) target bundleno = 240 (0xf0), region = 36 }
   0xc   : > { %v676_v0 = vmov 0   ;;  %s774_s15 = smov (!%p265_p4, %s666_s15), 1  ;;  %vm328_vm0 = vcmask 23552   ;;  %vm449_vm1 = vcmask 257024  }
   0xd   : > { %647 = vset.pattern.permute.xlu1 %v676_v0  ;;  %646 = vset.pattern.permute.xlu0 %v676_v0  ;;  %s723_s19 = sshll.u32 %s774_s15, 4  ;;  %s601_s20 = sshll.u32 %s774_s15, 5 }
   0xe   : > { %s278_s23 = scalar_lea.vmem %s765_s1, %s723_s19  ;;  %s269_s26 = scalar_lea.vmem %s764_s0, %s723_s19 }
   0xf   : > { %v648_v1 = vld [vmem:[%s278_s23 + $0x8] sm:$0xff]   ;;  %v649_v2 = vld [vmem:[%s278_s23] sm:$0xff]   ;;  %s284_s29 = scalar_lea.vmem %s766_s2, %s601_s20  ;;  %s290_s6 = scalar_lea.vmem %s767_s3, %s774_s15 }
  0x10   : > { %619 = vmatprep.subr.msk.bf16.mxu0 %vm328_vm0, %v648_v1  ;;  %v339_v3 = vsel %vm328_vm0, %v648_v1, 0  ;;  %v650_v4 = vld [vmem:[%s269_s26] sm:$0xff]   ;;  %v396_v5 = vld [vmem:[%s284_s29 + $0x10] sm:$0xff]  ;;  %v397_v7 = vld [vmem:[%s284_s29 + $0x18] sm:$0xff]  ;;  %v336_v9 = vsel %vm328_vm0, %v649_v2, 0  ;;  %s298_s9 = scalar_lea.vmem %s768_s4, %s723_s19 }
  0x11   : > { %612 = vmatpush3.bf16.xpose.msra.mxu0 %v339_v3  ;;  %615 = vmatprep.mubr.msk.bf16.mxu0 %vm328_vm0, %v650_v4  ;;  %v394_v6 = vld [vmem:[%s284_s29] sm:$0xff]  ;;  %v395_v8 = vld [vmem:[%s284_s29 + $0x8] sm:$0xff] }
  0x12   : > { %620 = vmatprep.subr.msk.bf16.mxu0 %vm328_vm0, %v649_v2  ;;  %410 = vperm.xlu1 %647, %v396_v5   ;;  %v651_v10 = vld [vmem:[%s269_s26 + $0x8] sm:$0xff]   ;;  %v592_v15 = vld [vmem:[%s290_s6] ss:$0 sm:$0xff] }
  0x13   : > { %400 = vperm.xlu0 %646, %v394_v6  }
  0x16   : > { %415 = vperm.xlu1 %647, %v397_v7  }
  0x17   : > { %405 = vperm.xlu0 %646, %v395_v8  }
  0x19   : > { %614 = vmatpush3.bf16.xpose.msra.mxu0 %v336_v9 }
  0x20   : > { %616 = vmatmul.mubr.msk.bf16.vlgmr.msra.gmra.mxu0 %vm328_vm0, %v651_v10 }
  0x8d   : > { %v411_v11 = vpop.permute.xlu1 %410 }
  0x8e   : > { %v401_v14 = vpop.permute.xlu0 %400 }
  0x91   : > { %v416_v23 = vpop.permute.xlu1 %415 }
  0x92   : > { %v406_v29 = vpop.permute.xlu0 %405 }
  0xe0   : > { %v617_v12 = vpop.f32.mrf.mxu0 }
  0xe1   : > { %v392_v13 = vmul.f32 2.0, %v617_v12 }
  0xe2   : > { %v375_v16 = vpop.f32.mrf.mxu0 }
  0xe3   : > { %v420_v17 = vsub.f32 %v392_v13, %v411_v11  ;;  %v390_v18 = vmul.f32 2.0, %v375_v16 }
  0xe4   : > { %v618_v19 = vpop.f32.mrf.mxu0 }
  0xe5   : > { %v431_v20 = vsub.f32 %v420_v17, %v592_v15  ;;  %v418_v21 = vsub.f32 %v390_v18, %v401_v14  ;;  %v393_v22 = vmul.f32 2.0, %v618_v19 }
  0xe6   : > { %v378_v24 = vpop.f32.mrf.mxu0 }
  0xe7   : > { %v605_v25 = vpack.c.bf16 %v431_v20, %v431_v20  ;;  %v429_v26 = vsub.f32 %v418_v21, %v592_v15  ;;  %v421_v27 = vsub.f32 %v393_v22, %v416_v23  ;;  %v391_v28 = vmul.f32 2.0, %v378_v24 }
  0xe9   : > { %452 = vst.msk [vmem:[%s298_s9 + $0x8] sm:$0xf] %vm449_vm1, %v605_v25  ;;  %v603_v30 = vpack.c.bf16 %v429_v26, %v429_v26  ;;  %v432_v31 = vsub.f32 %v421_v27, %v592_v15  ;;  %v419_v32 = vsub.f32 %v391_v28, %v406_v29 }
  0xeb   : > { %450 = vst.msk [vmem:[%s298_s9] sm:$0xf] %vm449_vm1, %v603_v30  ;;  %v606_v33 = vpack.c.bf16 %v432_v31, %v432_v31  ;;  %v430_v34 = vsub.f32 %v419_v32, %v592_v15 }
  0xed   : > { %453 = vst.msk [vmem:[%s298_s9 + $0xc] sm:$0xf] %vm449_vm1, %v606_v33  ;;  %v604_v35 = vpack.c.bf16 %v430_v34, %v430_v34 }
  0xef   : > { %451 = vst.msk [vmem:[%s298_s9 + $0x4] sm:$0xf] %vm449_vm1, %v604_v35 }
  0xf0 PF: > { %s14_s17 = sadd.s32 1, %s674_s17   ;;  %s769_s15 = smov %s670_s16 }
  0xf1   : > { %p11_p5 = scmp.ge.s32.totalorder %s14_s17, 4   ;;  %s770_s16 = smov %s772_s18 }
  0xf3   :  { %13 = sbr.rel (!%p11_p5) target bundleno = 2 (0x2), region = 75 }

// kernel: _lambda_.11
= control target key start
LH: loop header
LB: loop body
LE: loop exit
PB: predicated region body
PF: predicated region fallthrough
CT: control target
= control target key end

     0   :  { %s1562_s18 = smov 0   ;;  %s1564_s19 = smov 0   ;;  %s1703_s0 = inlined_call_operand.vmem [shape: bf16[2,8,32,3], index: 0, kind: input, shape index: {}]   ;;  %s1704_s1 = inlined_call_operand.vmem [shape: bf16[2,32,3], index: 1, kind: input, shape index: {}]   ;;  %s1705_s2 = inlined_call_operand.vmem [shape: bf16[3,64], index: 2, kind: input, shape index: {}]   ;;  %s1706_s3 = inlined_call_operand.vmem [shape: bf16[3,64], index: 3, kind: input, shape index: {}]   ;;  %s1707_s4 = inlined_call_operand.vmem [shape: f32[1,64], index: 4, kind: input, shape index: {}]   ;;  %s1708_s5 = inlined_call_operand.vmem [shape: bf16[2,32,64], index: 5, kind: output, shape index: {}]  }
   0x1   :  { %s1566_s20 = smov 0  }
   0x2 LB: > { %s34_s21 = sadd.s32 1, %s1525_s19  ;;  %p1290_p0 = scmp.ge.s32.totalorder %s1529_s20, 1  ;;  %s1529_s20 = sphi %s1566_s20, %s15_s20   ;;  %s1525_s19 = sphi %s1564_s19, %s1710_s19   ;;  %s1521_s18 = sphi %s1562_s18, %s1709_s18  }
   0x3   : > { %p36_p1 = scmp.ge.s32.totalorder %s34_s21, 2  ;;  %p240_p2 = scmp.lt.s32.totalorder %s1529_s20, 3 }
   0x5   : > { %s1712_s21 = smov (%p36_p1, %s34_s21), 0  ;;  %p241_p3 = pnand %p1290_p0, %p240_p2 }
   0x6   : > { %p292_p4 = scmp.lt.s32.totalorder (!%p241_p3), %s1521_s18, 1 }
   0x7   : > { %244 = sbr.rel (%p241_p3) target bundleno = 271 (0x10f), region = 40 }
   0xc   : > { %v335_v0 = vld [vmem:[%s1706_s3] sm:$0x3]  ;;  %vm360_vm0 = vcmask 1040384   ;;  %vm361_vm1 = vcmask 1041408   ;;  %v1531_v1 = vmov 65535   ;;  %s1714_s18 = smov (!%p292_p4, %s1521_s18), 1 }
   0xd   : > { %v362_v2 = vsel %vm360_vm0, 4294967295, %v1531_v1  ;;  %v429_v3 = vld [vmem:[%s1705_s2] sm:$0x3]  ;;  %s1372_s26 = sshll.u32 %s1714_s18, 7  ;;  %s1373_s27 = sshll.u32 %s1714_s18, 4  ;;  %vm353_vm2 = vcmask 23552  }
   0xe   : > { %v363_v4 = vsel %vm361_vm1, %v362_v2, 0  ;;  %s1593_s30 = scalar_lea.vmem %s1703_s0, %s1372_s26  ;;  %s314_s8 = scalar_lea.vmem %s1704_s1, %s1373_s27  ;;  %v1297_v25 = vld [vmem:[%s1707_s4] ss:$0 sm:$0xff]  ;;  %vm416_vm3 = vcmask 523264  }
   0xf   : > { %v365_v5 = vand.u32 %v363_v4, %v335_v0  ;;  %v452_v6 = vand.u32 %v429_v3, %v363_v4  ;;  %v1489_v7 = vld [vmem:[%s314_s8] sm:$0xff]   ;;  %v1491_v9 = vld [vmem:[%s314_s8 + $0x8] sm:$0xff]   ;;  %v1493_v11 = vld [vmem:[%s1593_s30 + $0x10] sm:$0xff]   ;;  %s324_s13 = scalar_lea.vmem %s1708_s5, %s1373_s27 }
  0x10   : > { %v1490_v8 = vld [vmem:[%s1593_s30] sm:$0xff]   ;;  %1412 = vmatprep.mubr.msk.bf16.mxu0 %vm353_vm2, %v1489_v7  ;;  %v1492_v10 = vld [vmem:[%s1593_s30 + $0x8] sm:$0xff]   ;;  %v1495_v13 = vld [vmem:[%s1593_s30 + $0x18] sm:$0xff]  }
  0x11   : > { %1410 = vmatprep.subr.bf16.mxu0 %v365_v5  ;;  %1416 = vmatprep.subr.bf16.mxu1 %v452_v6  ;;  %v1494_v12 = vld [vmem:[%s1593_s30 + $0x20] sm:$0xff]   ;;  %v1496_v14 = vld [vmem:[%s1593_s30 + $0x28] sm:$0xff]   ;;  %v1497_v15 = vld [vmem:[%s1593_s30 + $0x30] sm:$0xff]  }
  0x12   : > { %1411 = vmatpush3.bf16.msra.mxu0 %v365_v5  ;;  %1417 = vmatpush3.bf16.msra.mxu1 %v452_v6  ;;  %v1498_v16 = vld [vmem:[%s1593_s30 + $0x40] sm:$0xff]   ;;  %v1499_v17 = vld [vmem:[%s1593_s30 + $0x38] sm:$0xff]   ;;  %v1500_v18 = vld [vmem:[%s1593_s30 + $0x48] sm:$0xff]  }
  0x13   : > { %1422 = vmatprep.subr.bf16.mxu0 %v452_v6  ;;  %1428 = vmatprep.subr.bf16.mxu1 %v452_v6  ;;  %v1501_v19 = vld [vmem:[%s1593_s30 + $0x50] sm:$0xff]   ;;  %v1502_v20 = vld [vmem:[%s1593_s30 + $0x60] sm:$0xff]   ;;  %v1503_v21 = vld [vmem:[%s1593_s30 + $0x58] sm:$0xff]  }
  0x14   : > { %1418 = vmatprep.mubr.msk.bf16.mxu1 %vm353_vm2, %v1490_v8  ;;  %v1504_v22 = vld [vmem:[%s1593_s30 + $0x68] sm:$0xff]   ;;  %v1505_v23 = vld [vmem:[%s1593_s30 + $0x70] sm:$0xff]   ;;  %v1506_v24 = vld [vmem:[%s1593_s30 + $0x78] sm:$0xff]  }
  0x15   : > { %1413 = vmatmul.mubr.msk.bf16.vlgmr.msra.gmra.mxu0 %vm353_vm2, %v1491_v9  ;;  %1419 = vmatmul.mubr.msk.bf16.vlgmr.msra.gmra.mxu1 %vm353_vm2, %v1492_v10 }
  0x16   : > { %1423 = vmatpush3.bf16.msra.mxu0 %v452_v6  ;;  %1429 = vmatpush3.bf16.msra.mxu1 %v452_v6 }
  0x17   : > { %1424 = vmatprep.mubr.msk.bf16.mxu0 %vm353_vm2, %v1493_v11  ;;  %1430 = vmatprep.mubr.msk.bf16.mxu1 %vm353_vm2, %v1494_v12 }
  0x18   : > { %1434 = vmatprep.subr.bf16.mxu0 %v452_v6  ;;  %1440 = vmatprep.subr.bf16.mxu1 %v452_v6 }
  0x1d   : > { %1425 = vmatmul.mubr.msk.bf16.vlgmr.msra.gmra.mxu0 %vm353_vm2, %v1495_v13  ;;  %1431 = vmatmul.mubr.msk.bf16.vlgmr.msra.gmra.mxu1 %vm353_vm2, %v1496_v14 }
  0x1e   : > { %1435 = vmatpush3.bf16.msra.mxu0 %v452_v6  ;;  %1441 = vmatpush3.bf16.msra.mxu1 %v452_v6 }
  0x1f   : > { %1436 = vmatprep.mubr.msk.bf16.mxu0 %vm353_vm2, %v1497_v15  ;;  %1442 = vmatprep.mubr.msk.bf16.mxu1 %vm353_vm2, %v1498_v16 }
  0x20   : > { %1446 = vmatprep.subr.bf16.mxu0 %v452_v6  ;;  %1452 = vmatprep.subr.bf16.mxu1 %v452_v6 }
  0x25   : > { %1437 = vmatmul.mubr.msk.bf16.vlgmr.msra.gmra.mxu0 %vm353_vm2, %v1499_v17  ;;  %1443 = vmatmul.mubr.msk.bf16.vlgmr.msra.gmra.mxu1 %vm353_vm2, %v1500_v18 }
  0x26   : > { %1447 = vmatpush3.bf16.msra.mxu0 %v452_v6  ;;  %1453 = vmatpush3.bf16.msra.mxu1 %v452_v6 }
  0x27   : > { %1448 = vmatprep.mubr.msk.bf16.mxu0 %vm353_vm2, %v1501_v19  ;;  %1454 = vmatprep.mubr.msk.bf16.mxu1 %vm353_vm2, %v1502_v20 }
  0x28   : > { %1458 = vmatprep.subr.bf16.mxu0 %v452_v6 }
  0x2d   : > { %1449 = vmatmul.mubr.msk.bf16.vlgmr.msra.gmra.mxu0 %vm353_vm2, %v1503_v21  ;;  %1455 = vmatmul.mubr.msk.bf16.vlgmr.msra.gmra.mxu1 %vm353_vm2, %v1504_v22 }
  0x2e   : > { %1459 = vmatpush3.bf16.msra.mxu0 %v452_v6  ;;  %1460 = vmatprep.mubr.msk.bf16.mxu0 %vm353_vm2, %v1505_v23 }
  0x35   : > { %1461 = vmatmul.mubr.msk.bf16.vlgmr.msra.gmra.mxu0 %vm353_vm2, %v1506_v24 }
  0xd5   : > { %v1414_v26 = vpop.f32.mrf.mxu0  ;;  %v1420_v28 = vpop.f32.mrf.mxu1 }
  0xd6   : > { %v410_v27 = vadd.f32 %v1414_v26, %v1297_v25 }
  0xd7   : > { %v401_v29 = vpop.f32.mrf.mxu0  ;;  %v488_v31 = vpop.f32.mrf.mxu1 }
  0xd8   : > { %419 = vst.msk [vmem:[#allocation2 + $0x10] sm:$0xff] %vm416_vm3, %v410_v27  ;;  %v402_v30 = vadd.f32 %v1297_v25, %v401_v29 }
  0xd9   : > { %v1415_v32 = vpop.f32.mrf.mxu0  ;;  %v1421_v34 = vpop.f32.mrf.mxu1 }
  0xda   : > { %417 = vst.msk [vmem:[#allocation2] sm:$0xff] %vm416_vm3, %v402_v30  ;;  %v413_v33 = vadd.f32 %v1415_v32, %v1297_v25 }
  0xdb   : > { %v404_v35 = vpop.f32.mrf.mxu0  ;;  %v491_v37 = vpop.f32.mrf.mxu1 }
  0xdc   : > { %420 = vst.msk [vmem:[#allocation2 + $0x18] sm:$0xff] %vm416_vm3, %v413_v33  ;;  %v405_v36 = vadd.f32 %v1297_v25, %v404_v35 }
  0xdd   : > { %v1426_v38 = vpop.f32.mrf.mxu0  ;;  %v1432_v39 = vpop.f32.mrf.mxu1 }
  0xde   : > { %418 = vst.msk [vmem:[#allocation2 + $0x8] sm:$0xff] %vm416_vm3, %v405_v36 }
  0xdf   : > { %v1641_v40 = vld [vmem:[#allocation2 + $0x10] sm:$0xff]  ;;  %v570_v41 = vpop.f32.mrf.mxu0  ;;  %v656_v45 = vpop.f32.mrf.mxu1 }
  0xe0   : > { %v497_v42 = vadd.f32 %v1420_v28, %v1641_v40  ;;  %v579_v43 = vadd.f32 %v1426_v38, %v1641_v40  ;;  %v665_v44 = vadd.f32 %v1432_v39, %v1641_v40 }
  0xe1   : > { %v1646_v46 = vld [vmem:[#allocation2] sm:$0xff]  ;;  %v1427_v47 = vpop.f32.mrf.mxu0  ;;  %v1433_v50 = vpop.f32.mrf.mxu1 }
  0xe2   : > { %vm505_vm4 = vcmp.gt.f32.partialorder %v497_v42, 0.0  ;;  %v509_v48 = vmul.f32 0.2, %v497_v42  ;;  %v489_v49 = vadd.f32 %v488_v31, %v1646_v46  ;;  %vm587_vm5 = vcmp.gt.f32.partialorder %v579_v43, 0.0 }
  0xe3   : > { %v1649_v51 = vld [vmem:[#allocation2 + $0x18] sm:$0xff]  ;;  %v591_v52 = vmul.f32 0.2, %v579_v43  ;;  %vm673_vm6 = vcmp.gt.f32.partialorder %v665_v44, 0.0  ;;  %v571_v53 = vadd.f32 %v570_v41, %v1646_v46  ;;  %v573_v54 = vpop.f32.mrf.mxu0  ;;  %v677_v57 = vmul.f32 0.2, %v665_v44  ;;  %v659_v58 = vpop.f32.mrf.mxu1 }
  0xe4   : > { %vm503_vm7 = vcmp.gt.f32.partialorder %v489_v49, 0.0  ;;  %v507_v55 = vmul.f32 0.2, %v489_v49  ;;  %v500_v56 = vadd.f32 %v1421_v34, %v1649_v51  ;;  %v513_v59 = vsel %vm505_vm4, %v497_v42, %v509_v48 }
  0xe5   : > { %v1653_v60 = vld [vmem:[#allocation2 + $0x8] sm:$0xff]  ;;  %v595_v61 = vsel %vm587_vm5, %v579_v43, %v591_v52  ;;  %vm585_vm8 = vcmp.gt.f32.partialorder %v571_v53, 0.0  ;;  %v589_v62 = vmul.f32 0.2, %v571_v53  ;;  %v1438_v63 = vpop.f32.mrf.mxu0  ;;  %v1444_v2 = vpop.f32.mrf.mxu1  ;;  %v657_v5 = vadd.f32 %v656_v45, %v1646_v46 }
  0xe6   : > { %vm506_vm9 = vcmp.gt.f32.partialorder %v500_v56, 0.0  ;;  %v510_v0 = vmul.f32 0.2, %v500_v56  ;;  %v492_v1 = vadd.f32 %v491_v37, %v1653_v60  ;;  %v511_v3 = vsel %vm503_vm7, %v489_v49, %v507_v55 }
  0xe7   : > { %v593_v4 = vsel %vm585_vm8, %v571_v53, %v589_v62  ;;  %v582_v6 = vadd.f32 %v1427_v47, %v1649_v51  ;;  %v742_v7 = vpop.f32.mrf.mxu0  ;;  %v599_v9 = vmax.f32 %v513_v59, %v595_v61  ;;  %v681_v10 = vsel %vm673_vm6, %v665_v44, %v677_v57  ;;  %v828_v11 = vpop.f32.mrf.mxu1 }
  0xe8   : > { %v514_v8 = vsel %vm506_vm9, %v500_v56, %v510_v0  ;;  %v508_v12 = vmul.f32 0.2, %v492_v1  ;;  %vm671_vm10 = vcmp.gt.f32.partialorder %v657_v5, 0.0  ;;  %v675_v13 = vmul.f32 0.2, %v657_v5 }
  0xe9   : > { %vm588_vm11 = vcmp.gt.f32.partialorder %v582_v6, 0.0  ;;  %v1439_v14 = vpop.f32.mrf.mxu0  ;;  %v597_v15 = vmax.f32 %v511_v3, %v593_v4  ;;  %v592_v16 = vmul.f32 0.2, %v582_v6  ;;  %v668_v17 = vadd.f32 %v1433_v50, %v1649_v51  ;;  %v1445_v19 = vpop.f32.mrf.mxu1 }
  0xea   : > { %v574_v18 = vadd.f32 %v573_v54, %v1653_v60  ;;  %vm504_vm12 = vcmp.gt.f32.partialorder %v492_v1, 0.0  ;;  %v660_v20 = vadd.f32 %v659_v58, %v1653_v60  ;;  %v751_v21 = vadd.f32 %v1438_v63, %v1641_v40 }
  0xeb   : > { %v837_v22 = vadd.f32 %v1444_v2, %v1641_v40  ;;  %v745_v23 = vpop.f32.mrf.mxu0  ;;  %v685_v24 = vmax.f32 %v599_v9, %v681_v10  ;;  %v679_v25 = vsel %vm671_vm10, %v657_v5, %v675_v13  ;;  %v596_v26 = vsel %vm588_vm11, %v582_v6, %v592_v16  ;;  %v831_v28 = vpop.f32.mrf.mxu1 }
  0xec   : > { %v678_v27 = vmul.f32 0.2, %v668_v17  ;;  %v600_v29 = vmax.f32 %v514_v8, %v596_v26  ;;  %vm674_vm13 = vcmp.gt.f32.partialorder %v668_v17, 0.0  ;;  %vm586_vm14 = vcmp.gt.f32.partialorder %v574_v18, 0.0 }
  0xed   : > { %v590_v30 = vmul.f32 0.2, %v574_v18  ;;  %v1450_v31 = vpop.f32.mrf.mxu0  ;;  %v512_v32 = vsel %vm504_vm12, %v492_v1, %v508_v12  ;;  %v683_v33 = vmax.f32 %v597_v15, %v679_v25  ;;  %vm759_vm15 = vcmp.gt.f32.partialorder %v751_v21, 0.0  ;;  %v1456_v43 = vpop.f32.mrf.mxu1 }
  0xee   : > { %v763_v34 = vmul.f32 0.2, %v751_v21  ;;  %vm672_vm0 = vcmp.gt.f32.partialorder %v660_v20, 0.0  ;;  %v676_v36 = vmul.f32 0.2, %v660_v20  ;;  %v682_v39 = vsel %vm674_vm13, %v668_v17, %v678_v27 }
  0xef   : > { %v594_v35 = vsel %vm586_vm14, %v574_v18, %v590_v30  ;;  %v849_v37 = vmul.f32 0.2, %v837_v22  ;;  %v914_v38 = vpop.f32.mrf.mxu0  ;;  %vm845_vm1 = vcmp.gt.f32.partialorder %v837_v22, 0.0  ;;  %v743_v42 = vadd.f32 %v742_v7, %v1646_v46  ;;  %v1000_v62 = vpop.f32.mrf.mxu1 }
  0xf0   : > { %v767_v41 = vsel %vm759_vm15, %v751_v21, %v763_v34  ;;  %v686_v44 = vmax.f32 %v600_v29, %v682_v39  ;;  %v598_v45 = vmax.f32 %v512_v32, %v594_v35  ;;  %v829_v47 = vadd.f32 %v828_v11, %v1646_v46 }
  0xf1   : > { %v754_v48 = vadd.f32 %v1439_v14, %v1649_v51  ;;  %v1451_v49 = vpop.f32.mrf.mxu0  ;;  %v771_v50 = vmax.f32 %v685_v24, %v767_v41  ;;  %vm757_vm2 = vcmp.gt.f32.partialorder %v743_v42, 0.0  ;;  %v761_v52 = vmul.f32 0.2, %v743_v42  ;;  %v1457_v13 = vpop.f32.mrf.mxu1 }
  0xf2   : > { %v840_v53 = vadd.f32 %v1445_v19, %v1649_v51  ;;  %v680_v54 = vsel %vm672_vm0, %v660_v20, %v676_v36  ;;  %v853_v55 = vsel %vm845_vm1, %v837_v22, %v849_v37  ;;  %v847_v56 = vmul.f32 0.2, %v829_v47 }
  0xf3   : > { %vm760_vm3 = vcmp.gt.f32.partialorder %v754_v48, 0.0  ;;  %v917_v57 = vpop.f32.mrf.mxu0  ;;  %v765_v58 = vsel %vm757_vm2, %v743_v42, %v761_v52  ;;  %vm843_vm4 = vcmp.gt.f32.partialorder %v829_v47, 0.0  ;;  %v764_v59 = vmul.f32 0.2, %v754_v48 }
  0xf4   : > { %v850_v61 = vmul.f32 0.2, %v840_v53  ;;  %v684_v63 = vmax.f32 %v598_v45, %v680_v54  ;;  %vm846_vm5 = vcmp.gt.f32.partialorder %v840_v53, 0.0  ;;  %v746_v0 = vadd.f32 %v745_v23, %v1653_v60 }
  0xf5   : > { %v832_v1 = vadd.f32 %v831_v28, %v1653_v60  ;;  %v857_v2 = vmax.f32 %v771_v50, %v853_v55  ;;  %v768_v3 = vsel %vm760_vm3, %v754_v48, %v764_v59  ;;  %v923_v4 = vadd.f32 %v1450_v31, %v1641_v40  ;;  %v1462_v6 = vpop.f32.mrf.mxu0  ;;  %v1003_v28 = vpop.f32.mrf.mxu1 }
  0xf6   : > { %v1009_v5 = vadd.f32 %v1456_v43, %v1641_v40  ;;  %v769_v7 = vmax.f32 %v683_v33, %v765_v58  ;;  %v851_v8 = vsel %vm843_vm4, %v829_v47, %v847_v56  ;;  %vm758_vm6 = vcmp.gt.f32.partialorder %v746_v0, 0.0 }
  0xf7   : > { %v762_v9 = vmul.f32 0.2, %v746_v0  ;;  %v772_v10 = vmax.f32 %v686_v44, %v768_v3  ;;  %v854_v11 = vsel %vm846_vm5, %v840_v53, %v850_v61  ;;  %vm931_vm7 = vcmp.gt.f32.partialorder %v923_v4, 0.0  ;;  %v1086_v20 = vpop.f32.mrf.mxu0 }
  0xf8   : > { %v935_v12 = vmul.f32 0.2, %v923_v4  ;;  %vm844_vm8 = vcmp.gt.f32.partialorder %v832_v1, 0.0  ;;  %v848_v15 = vmul.f32 0.2, %v832_v1  ;;  %vm1017_vm9 = vcmp.gt.f32.partialorder %v1009_v5, 0.0 }
  0xf9   : > { %v766_v14 = vsel %vm758_vm6, %v746_v0, %v762_v9  ;;  %v1021_v16 = vmul.f32 0.2, %v1009_v5  ;;  %v915_v19 = vadd.f32 %v914_v38, %v1646_v46  ;;  %v855_v21 = vmax.f32 %v769_v7, %v851_v8  ;;  %v1463_v35 = vpop.f32.mrf.mxu0 }
  0xfa   : > { %v770_v17 = vmax.f32 %v684_v63, %v766_v14  ;;  %v939_v18 = vsel %vm931_vm7, %v923_v4, %v935_v12  ;;  %v1001_v23 = vadd.f32 %v1000_v62, %v1646_v46  ;;  %v926_v24 = vadd.f32 %v1451_v49, %v1649_v51 }
  0xfb   : > { %v943_v22 = vmax.f32 %v857_v2, %v939_v18  ;;  %v858_v25 = vmax.f32 %v772_v10, %v854_v11  ;;  %vm929_vm10 = vcmp.gt.f32.partialorder %v915_v19, 0.0  ;;  %v933_v26 = vmul.f32 0.2, %v915_v19  ;;  %v1089_v52 = vpop.f32.mrf.mxu0 }
  0xfc   : > { %v1012_v27 = vadd.f32 %v1457_v13, %v1649_v51  ;;  %v852_v29 = vsel %vm844_vm8, %v832_v1, %v848_v15  ;;  %v1025_v30 = vsel %vm1017_vm9, %v1009_v5, %v1021_v16  ;;  %v1019_v31 = vmul.f32 0.2, %v1001_v23 }
  0xfd   : > { %vm932_vm11 = vcmp.gt.f32.partialorder %v926_v24, 0.0  ;;  %v856_v32 = vmax.f32 %v770_v17, %v852_v29  ;;  %v937_v33 = vsel %vm929_vm10, %v915_v19, %v933_v26  ;;  %vm1015_vm12 = vcmp.gt.f32.partialorder %v1001_v23, 0.0 }
  0xfe   : > { %v936_v34 = vmul.f32 0.2, %v926_v24  ;;  %vm1136_vm13 = vcmask 519168   ;;  %v1029_v36 = vmax.f32 %v943_v22, %v1025_v30  ;;  %v941_v37 = vmax.f32 %v855_v21, %v937_v33 }
  0xff   : > { %v918_v38 = vadd.f32 %v917_v57, %v1653_v60  ;;  %v1004_v39 = vadd.f32 %v1003_v28, %v1653_v60  ;;  %vm1018_vm14 = vcmp.gt.f32.partialorder %v1012_v27, 0.0  ;;  %v1095_v42 = vadd.f32 %v1462_v6, %v1641_v40 }
 0x100   : > { %v940_v41 = vsel %vm932_vm11, %v926_v24, %v936_v34  ;;  %v1087_v43 = vadd.f32 %v1086_v20, %v1646_v46  ;;  %v1023_v44 = vsel %vm1015_vm12, %v1001_v23, %v1019_v31  ;;  %v1022_v45 = vmul.f32 0.2, %v1012_v27 }
 0x101   : > { %vm930_vm15 = vcmp.gt.f32.partialorder %v918_v38, 0.0  ;;  %v934_v47 = vmul.f32 0.2, %v918_v38  ;;  %v1027_v48 = vmax.f32 %v941_v37, %v1023_v44  ;;  %v944_v49 = vmax.f32 %v858_v25, %v940_v41 }
 0x102   : > { %vm1103_vm0 = vcmp.gt.f32.partialorder %v1095_v42, 0.0  ;;  %v1107_v50 = vmul.f32 0.2, %v1095_v42  ;;  %v1020_v54 = vmul.f32 0.2, %v1004_v39  ;;  %vm1101_vm1 = vcmp.gt.f32.partialorder %v1087_v43, 0.0 }
 0x103   : > { %v938_v53 = vsel %vm930_vm15, %v918_v38, %v934_v47  ;;  %v1105_v55 = vmul.f32 0.2, %v1087_v43  ;;  %vm1016_vm2 = vcmp.gt.f32.partialorder %v1004_v39, 0.0  ;;  %v1098_v40 = vadd.f32 %v1463_v35, %v1649_v51 }
 0x104   : > { %v942_v56 = vmax.f32 %v856_v32, %v938_v53  ;;  %v1111_v57 = vsel %vm1103_vm0, %v1095_v42, %v1107_v50  ;;  %v1026_v46 = vsel %vm1018_vm14, %v1012_v27, %v1022_v45  ;;  %v1090_v61 = vadd.f32 %v1089_v52, %v1653_v60 }
 0x105   : > { %v1115_v58 = vmax.f32 %v1029_v36, %v1111_v57  ;;  %v1109_v59 = vsel %vm1101_vm1, %v1087_v43, %v1105_v55  ;;  %v1030_v62 = vmax.f32 %v944_v49, %v1026_v46  ;;  %vm1104_vm3 = vcmp.gt.f32.partialorder %v1098_v40, 0.0 }
 0x106   : > { %v1113_v63 = vmax.f32 %v1027_v48, %v1109_v59  ;;  %v1108_v0 = vmul.f32 0.2, %v1098_v40  ;;  %v1024_v1 = vsel %vm1016_vm2, %v1004_v39, %v1020_v54  ;;  %vm1102_vm4 = vcmp.gt.f32.partialorder %v1090_v61, 0.0 }
 0x107   : > { %v1377_v2 = vpack.c.bf16 %v1115_v58, %v1115_v58  ;;  %v1106_v3 = vmul.f32 0.2, %v1090_v61  ;;  %v1028_v51 = vmax.f32 %v942_v56, %v1024_v1 }
 0x108   : > { %v1375_v4 = vpack.c.bf16 %v1113_v63, %v1113_v63  ;;  %v1112_v5 = vsel %vm1104_vm3, %v1098_v40, %v1108_v0 }
 0x109   : > { %1139 = vst.msk [vmem:[%s324_s13 + $0x8] sm:$0xf] %vm1136_vm13, %v1377_v2  ;;  %v1116_v6 = vmax.f32 %v1030_v62, %v1112_v5  ;;  %v1110_v60 = vsel %vm1102_vm4, %v1090_v61, %v1106_v3 }
 0x10a   : > { %1137 = vst.msk [vmem:[%s324_s13] sm:$0xf] %vm1136_vm13, %v1375_v4  ;;  %v1114_v7 = vmax.f32 %v1028_v51, %v1110_v60 }
 0x10b   : > { %v1378_v8 = vpack.c.bf16 %v1116_v6, %v1116_v6 }
 0x10c   : > { %v1376_v9 = vpack.c.bf16 %v1114_v7, %v1114_v7 }
 0x10d   : > { %1140 = vst.msk [vmem:[%s324_s13 + $0xc] sm:$0xf] %vm1136_vm13, %v1378_v8 }
 0x10e   : > { %1138 = vst.msk [vmem:[%s324_s13 + $0x4] sm:$0xf] %vm1136_vm13, %v1376_v9 }
 0x10f PF: > { %s15_s20 = sadd.s32 1, %s1529_s20   ;;  %s1709_s18 = smov %s1525_s19 }
 0x110   : > { %p12_p5 = scmp.ge.s32.totalorder %s15_s20, 4   ;;  %s1710_s19 = smov %s1712_s21 }
 0x112   :  { %14 = sbr.rel (!%p12_p5) target bundleno = 2 (0x2), region = 92 }

// kernel: _lambda_.12
= control target key start
LH: loop header
LB: loop body
LE: loop exit
PB: predicated region body
PF: predicated region fallthrough
CT: control target
= control target key end

     0   :  { %s702_s15 = smov 0   ;;  %s704_s16 = smov 0   ;;  %s764_s0 = inlined_call_operand.vmem [shape: bf16[2,32,64], index: 0, kind: input, shape index: {}, may-alias: {0,1}]   ;;  %s765_s1 = inlined_call_operand.vmem [shape: bf16[2,32,64], index: 1, kind: input, shape index: {}, may-alias: {0,1}]   ;;  %s766_s2 = inlined_call_operand.vmem [shape: f32[2,32,1], index: 2, kind: input, shape index: {}]   ;;  %s767_s3 = inlined_call_operand.vmem [shape: f32[2,1,32], index: 3, kind: input, shape index: {}]   ;;  %s768_s4 = inlined_call_operand.vmem [shape: bf16[2,32,32], index: 4, kind: output, shape index: {}]  }
   0x1   :  { %s706_s17 = smov 0  }
   0x2 LB: > { %s26_s18 = sadd.s32 1, %s670_s16  ;;  %p577_p0 = scmp.ge.s32.totalorder %s674_s17, 1  ;;  %s674_s17 = sphi %s706_s17, %s14_s17   ;;  %s670_s16 = sphi %s704_s16, %s770_s16   ;;  %s666_s15 = sphi %s702_s15, %s769_s15  }
   0x3   : > { %p28_p1 = scmp.ge.s32.totalorder %s26_s18, 2  ;;  %p216_p2 = scmp.lt.s32.totalorder %s674_s17, 3 }
   0x5   : > { %s772_s18 = smov (%p28_p1, %s26_s18), 0  ;;  %p217_p3 = pnand %p577_p0, %p216_p2 }
   0x6   : > { %p265_p4 = scmp.lt.s32.totalorder (!%p217_p3), %s666_s15, 1 }
   0x7   : > { %220 = sbr.rel (%p217_p3) target bundleno = 240 (0xf0), region = 36 }
   0xc   : > { %v676_v0 = vmov 0   ;;  %s774_s15 = smov (!%p265_p4, %s666_s15), 1  ;;  %vm328_vm0 = vcmask 523264   ;;  %vm449_vm1 = vcmask 257024  }
   0xd   : > { %647 = vset.pattern.permute.xlu1 %v676_v0  ;;  %646 = vset.pattern.permute.xlu0 %v676_v0  ;;  %s723_s19 = sshll.u32 %s774_s15, 4  ;;  %s601_s20 = sshll.u32 %s774_s15, 5 }
   0xe   : > { %s278_s23 = scalar_lea.vmem %s765_s1, %s723_s19  ;;  %s269_s26 = scalar_lea.vmem %s764_s0, %s723_s19 }
   0xf   : > { %v648_v1 = vld [vmem:[%s278_s23 + $0x8] sm:$0xff]   ;;  %v649_v2 = vld [vmem:[%s278_s23] sm:$0xff]   ;;  %s284_s29 = scalar_lea.vmem %s766_s2, %s601_s20  ;;  %s290_s6 = scalar_lea.vmem %s767_s3, %s774_s15 }
  0x10   : > { %619 = vmatprep.subr.msk.bf16.mxu0 %vm328_vm0, %v648_v1  ;;  %v339_v3 = vsel %vm328_vm0, %v648_v1, 0  ;;  %v650_v4 = vld [vmem:[%s269_s26] sm:$0xff]   ;;  %v396_v5 = vld [vmem:[%s284_s29 + $0x10] sm:$0xff]  ;;  %v397_v7 = vld [vmem:[%s284_s29 + $0x18] sm:$0xff]  ;;  %v336_v9 = vsel %vm328_vm0, %v649_v2, 0  ;;  %s298_s9 = scalar_lea.vmem %s768_s4, %s723_s19 }
  0x11   : > { %612 = vmatpush3.bf16.xpose.msra.mxu0 %v339_v3  ;;  %615 = vmatprep.mubr.msk.bf16.mxu0 %vm328_vm0, %v650_v4  ;;  %v394_v6 = vld [vmem:[%s284_s29] sm:$0xff]  ;;  %v395_v8 = vld [vmem:[%s284_s29 + $0x8] sm:$0xff] }
  0x12   : > { %620 = vmatprep.subr.msk.bf16.mxu0 %vm328_vm0, %v649_v2  ;;  %410 = vperm.xlu1 %647, %v396_v5   ;;  %v651_v10 = vld [vmem:[%s269_s26 + $0x8] sm:$0xff]   ;;  %v592_v15 = vld [vmem:[%s290_s6] ss:$0 sm:$0xff] }
  0x13   : > { %400 = vperm.xlu0 %646, %v394_v6  }
  0x16   : > { %415 = vperm.xlu1 %647, %v397_v7  }
  0x17   : > { %405 = vperm.xlu0 %646, %v395_v8  }
  0x19   : > { %614 = vmatpush3.bf16.xpose.msra.mxu0 %v336_v9 }
  0x20   : > { %616 = vmatmul.mubr.msk.bf16.vlgmr.msra.gmra.mxu0 %vm328_vm0, %v651_v10 }
  0x8d   : > { %v411_v11 = vpop.permute.xlu1 %410 }
  0x8e   : > { %v401_v14 = vpop.permute.xlu0 %400 }
  0x91   : > { %v416_v23 = vpop.permute.xlu1 %415 }
  0x92   : > { %v406_v29 = vpop.permute.xlu0 %405 }
  0xe0   : > { %v617_v12 = vpop.f32.mrf.mxu0 }
  0xe1   : > { %v392_v13 = vmul.f32 2.0, %v617_v12 }
  0xe2   : > { %v375_v16 = vpop.f32.mrf.mxu0 }
  0xe3   : > { %v420_v17 = vsub.f32 %v392_v13, %v411_v11  ;;  %v390_v18 = vmul.f32 2.0, %v375_v16 }
  0xe4   : > { %v618_v19 = vpop.f32.mrf.mxu0 }
  0xe5   : > { %v431_v20 = vsub.f32 %v420_v17, %v592_v15  ;;  %v418_v21 = vsub.f32 %v390_v18, %v401_v14  ;;  %v393_v22 = vmul.f32 2.0, %v618_v19 }
  0xe6   : > { %v378_v24 = vpop.f32.mrf.mxu0 }
  0xe7   : > { %v605_v25 = vpack.c.bf16 %v431_v20, %v431_v20  ;;  %v429_v26 = vsub.f32 %v418_v21, %v592_v15  ;;  %v421_v27 = vsub.f32 %v393_v22, %v416_v23  ;;  %v391_v28 = vmul.f32 2.0, %v378_v24 }
  0xe9   : > { %452 = vst.msk [vmem:[%s298_s9 + $0x8] sm:$0xf] %vm449_vm1, %v605_v25  ;;  %v603_v30 = vpack.c.bf16 %v429_v26, %v429_v26  ;;  %v432_v31 = vsub.f32 %v421_v27, %v592_v15  ;;  %v419_v32 = vsub.f32 %v391_v28, %v406_v29 }
  0xeb   : > { %450 = vst.msk [vmem:[%s298_s9] sm:$0xf] %vm449_vm1, %v603_v30  ;;  %v606_v33 = vpack.c.bf16 %v432_v31, %v432_v31  ;;  %v430_v34 = vsub.f32 %v419_v32, %v592_v15 }
  0xed   : > { %453 = vst.msk [vmem:[%s298_s9 + $0xc] sm:$0xf] %vm449_vm1, %v606_v33  ;;  %v604_v35 = vpack.c.bf16 %v430_v34, %v430_v34 }
  0xef   : > { %451 = vst.msk [vmem:[%s298_s9 + $0x4] sm:$0xf] %vm449_vm1, %v604_v35 }
  0xf0 PF: > { %s14_s17 = sadd.s32 1, %s674_s17   ;;  %s769_s15 = smov %s670_s16 }
  0xf1   : > { %p11_p5 = scmp.ge.s32.totalorder %s14_s17, 4   ;;  %s770_s16 = smov %s772_s18 }
  0xf3   :  { %13 = sbr.rel (!%p11_p5) target bundleno = 2 (0x2), region = 75 }

// kernel: _lambda_.13
= control target key start
LH: loop header
LB: loop body
LE: loop exit
PB: predicated region body
PF: predicated region fallthrough
CT: control target
= control target key end

     0   :  { %s1704_s18 = smov 0   ;;  %s1706_s19 = smov 0   ;;  %s1938_s0 = inlined_call_operand.vmem [shape: bf16[2,8,32,64], index: 0, kind: input, shape index: {}]   ;;  %s1939_s1 = inlined_call_operand.vmem [shape: bf16[2,32,64], index: 1, kind: input, shape index: {}]   ;;  %s1940_s2 = inlined_call_operand.vmem [shape: bf16[64,64], index: 2, kind: input, shape index: {}]   ;;  %s1941_s3 = inlined_call_operand.vmem [shape: bf16[64,64], index: 3, kind: input, shape index: {}]   ;;  %s1942_s4 = inlined_call_operand.vmem [shape: f32[1,64], index: 4, kind: input, shape index: {}]   ;;  %s1943_s5 = inlined_call_operand.vmem [shape: bf16[2,32,64], index: 5, kind: output, shape index: {}]  }
   0x1   :  { %s1708_s20 = smov 0  }
   0x2 LB: > { %s34_s21 = sadd.s32 1, %s1668_s19  ;;  %p1337_p0 = scmp.ge.s32.totalorder %s1672_s20, 1  ;;  %s1672_s20 = sphi %s1708_s20, %s15_s20   ;;  %s1668_s19 = sphi %s1706_s19, %s1945_s19   ;;  %s1664_s18 = sphi %s1704_s18, %s1944_s18  }
   0x3   : > { %p36_p1 = scmp.ge.s32.totalorder %s34_s21, 2  ;;  %p240_p2 = scmp.lt.s32.totalorder %s1672_s20, 3 }
   0x5   : > { %s1947_s21 = smov (%p36_p1, %s34_s21), 0  ;;  %p241_p3 = pnand %p1337_p0, %p240_p2 }
   0x6   : > { %p292_p4 = scmp.lt.s32.totalorder (!%p241_p3), %s1664_s18, 1 }
   0x7   : > { %244 = sbr.rel (%p241_p3) target bundleno = 302 (0x12e), region = 40 }
   0xc   : > { %v1624_v0 = vld [vmem:[%s1941_s3 + $0x18] sm:$0xff]   ;;  %v1626_v2 = vld [vmem:[%s1941_s3 + $0x10] sm:$0xff]   ;;  %s1949_s18 = smov (!%p292_p4, %s1664_s18), 1  ;;  %v1628_v4 = vld [vmem:[%s1941_s3 + $0x8] sm:$0xff]   ;;  %vm384_vm0 = vcmask 523264  }
   0xd   : > { %v1728_v1 = vld [vmem:[%s1940_s2 + $0x18] sm:$0xff]   ;;  %1492 = vmatprep.subr.bf16.mxu0 %v1624_v0  ;;  %v1739_v3 = vld [vmem:[%s1940_s2 + $0x10] sm:$0xff]   ;;  %s1427_s7 = sshll.u32 %s1949_s18, 7  ;;  %v1750_v5 = vld [vmem:[%s1940_s2 + $0x8] sm:$0xff]   ;;  %s1428_s10 = sshll.u32 %s1949_s18, 4 }
   0xe   : > { %1504 = vmatprep.subr.bf16.mxu1 %v1728_v1  ;;  %1493 = vmatpush3.bf16.msra.mxu0 %v1624_v0  ;;  %s314_s13 = scalar_lea.vmem %s1939_s1, %s1428_s10  ;;  %v1630_v6 = vld [vmem:[%s1941_s3] sm:$0xff]   ;;  %s1764_s22 = scalar_lea.vmem %s1938_s0, %s1427_s7 }
   0xf   : > { %1505 = vmatpush3.bf16.msra.mxu1 %v1728_v1  ;;  %1494 = vmatprep.subr.bf16.mxu0 %v1626_v2  ;;  %v1632_v7 = vld [vmem:[%s314_s13] sm:$0xff]   ;;  %v1633_v10 = vld [vmem:[%s314_s13 + $0x8] sm:$0xff]   ;;  %v1636_v12 = vld [vmem:[%s1764_s22 + $0x10] sm:$0xff]   ;;  %s324_s29 = scalar_lea.vmem %s1943_s5, %s1428_s10 }
  0x10   : > { %1506 = vmatprep.subr.bf16.mxu1 %v1739_v3  ;;  %v1771_v8 = vld [vmem:[%s1940_s2] sm:$0xff]   ;;  %1500 = vmatprep.mubr.msk.bf16.mxu0 %vm384_vm0, %v1632_v7  ;;  %v1635_v11 = vld [vmem:[%s1764_s22 + $0x8] sm:$0xff]   ;;  %v1638_v14 = vld [vmem:[%s1764_s22 + $0x18] sm:$0xff]  }
  0x11   : > { %v1634_v9 = vld [vmem:[%s1764_s22] sm:$0xff]   ;;  %v1639_v15 = vld [vmem:[%s1764_s22 + $0x28] sm:$0xff]   ;;  %v1640_v16 = vld [vmem:[%s1764_s22 + $0x30] sm:$0xff]  }
  0x12   : > { %1495 = vmatpush3.bf16.msra.mxu0 %v1626_v2  ;;  %1512 = vmatprep.mubr.msk.bf16.mxu1 %vm384_vm0, %v1634_v9  ;;  %v1637_v13 = vld [vmem:[%s1764_s22 + $0x20] sm:$0xff]   ;;  %v1642_v18 = vld [vmem:[%s1764_s22 + $0x38] sm:$0xff]   ;;  %v1643_v19 = vld [vmem:[%s1764_s22 + $0x48] sm:$0xff]  }
  0x13   : > { %1507 = vmatpush3.bf16.msra.mxu1 %v1739_v3  ;;  %1496 = vmatprep.subr.bf16.mxu0 %v1628_v4  ;;  %v1641_v17 = vld [vmem:[%s1764_s22 + $0x40] sm:$0xff]   ;;  %v1644_v20 = vld [vmem:[%s1764_s22 + $0x50] sm:$0xff]   ;;  %v1646_v22 = vld [vmem:[%s1764_s22 + $0x58] sm:$0xff]  }
  0x14   : > { %1508 = vmatprep.subr.bf16.mxu1 %v1750_v5  ;;  %v1645_v21 = vld [vmem:[%s1764_s22 + $0x60] sm:$0xff]   ;;  %v1647_v23 = vld [vmem:[%s1764_s22 + $0x68] sm:$0xff]   ;;  %v1648_v24 = vld [vmem:[%s1764_s22 + $0x70] sm:$0xff]  }
  0x15   : > { %v1649_v25 = vld [vmem:[%s1764_s22 + $0x78] sm:$0xff]   ;;  %v1344_v26 = vld [vmem:[%s1942_s4] ss:$0 sm:$0xff] }
  0x16   : > { %1497 = vmatpush3.bf16.msra.mxu0 %v1628_v4 }
  0x17   : > { %1509 = vmatpush3.bf16.msra.mxu1 %v1750_v5  ;;  %1498 = vmatprep.subr.bf16.mxu0 %v1630_v6 }
  0x18   : > { %1510 = vmatprep.subr.bf16.mxu1 %v1771_v8 }
  0x1a   : > { %1499 = vmatpush3.bf16.msra.mxu0 %v1630_v6 }
  0x1b   : > { %1511 = vmatpush3.bf16.msra.mxu1 %v1771_v8  ;;  %1516 = vmatprep.subr.bf16.mxu0 %v1728_v1 }
  0x1c   : > { %1528 = vmatprep.subr.bf16.mxu1 %v1728_v1 }
  0x1d   : > { %1501 = vmatmul.mubr.msk.bf16.vlgmr.msra.gmra.mxu0 %vm384_vm0, %v1633_v10 }
  0x1e   : > { %1513 = vmatmul.mubr.msk.bf16.vlgmr.msra.gmra.mxu1 %vm384_vm0, %v1635_v11  ;;  %1517 = vmatpush3.bf16.msra.mxu0 %v1728_v1 }
  0x1f   : > { %1529 = vmatpush3.bf16.msra.mxu1 %v1728_v1  ;;  %1518 = vmatprep.subr.bf16.mxu0 %v1739_v3 }
  0x20   : > { %1530 = vmatprep.subr.bf16.mxu1 %v1739_v3  ;;  %1524 = vmatprep.mubr.msk.bf16.mxu0 %vm384_vm0, %v1636_v12 }
  0x21   : > { %1536 = vmatprep.mubr.msk.bf16.mxu1 %vm384_vm0, %v1637_v13 }
  0x22   : > { %1519 = vmatpush3.bf16.msra.mxu0 %v1739_v3 }
  0x23   : > { %1531 = vmatpush3.bf16.msra.mxu1 %v1739_v3  ;;  %1520 = vmatprep.subr.bf16.mxu0 %v1750_v5 }
  0x24   : > { %1532 = vmatprep.subr.bf16.mxu1 %v1750_v5 }
  0x26   : > { %1521 = vmatpush3.bf16.msra.mxu0 %v1750_v5 }
  0x27   : > { %1533 = vmatpush3.bf16.msra.mxu1 %v1750_v5  ;;  %1522 = vmatprep.subr.bf16.mxu0 %v1771_v8 }
  0x28   : > { %1534 = vmatprep.subr.bf16.mxu1 %v1771_v8 }
  0x2a   : > { %1523 = vmatpush3.bf16.msra.mxu0 %v1771_v8 }
  0x2b   : > { %1535 = vmatpush3.bf16.msra.mxu1 %v1771_v8  ;;  %1540 = vmatprep.subr.bf16.mxu0 %v1728_v1 }
  0x2c   : > { %1552 = vmatprep.subr.bf16.mxu1 %v1728_v1 }
  0x2d   : > { %1525 = vmatmul.mubr.msk.bf16.vlgmr.msra.gmra.mxu0 %vm384_vm0, %v1638_v14 }
  0x2e   : > { %1537 = vmatmul.mubr.msk.bf16.vlgmr.msra.gmra.mxu1 %vm384_vm0, %v1639_v15  ;;  %1541 = vmatpush3.bf16.msra.mxu0 %v1728_v1 }
  0x2f   : > { %1553 = vmatpush3.bf16.msra.mxu1 %v1728_v1  ;;  %1542 = vmatprep.subr.bf16.mxu0 %v1739_v3 }
  0x30   : > { %1554 = vmatprep.subr.bf16.mxu1 %v1739_v3  ;;  %1548 = vmatprep.mubr.msk.bf16.mxu0 %vm384_vm0, %v1640_v16 }
  0x31   : > { %1560 = vmatprep.mubr.msk.bf16.mxu1 %vm384_vm0, %v1641_v17 }
  0x32   : > { %1543 = vmatpush3.bf16.msra.mxu0 %v1739_v3 }
  0x33   : > { %1555 = vmatpush3.bf16.msra.mxu1 %v1739_v3  ;;  %1544 = vmatprep.subr.bf16.mxu0 %v1750_v5 }
  0x34   : > { %1556 = vmatprep.subr.bf16.mxu1 %v1750_v5 }
  0x36   : > { %1545 = vmatpush3.bf16.msra.mxu0 %v1750_v5 }
  0x37   : > { %1557 = vmatpush3.bf16.msra.mxu1 %v1750_v5  ;;  %1546 = vmatprep.subr.bf16.mxu0 %v1771_v8 }
  0x38   : > { %1558 = vmatprep.subr.bf16.mxu1 %v1771_v8 }
  0x3a   : > { %1547 = vmatpush3.bf16.msra.mxu0 %v1771_v8 }
  0x3b   : > { %1559 = vmatpush3.bf16.msra.mxu1 %v1771_v8  ;;  %1564 = vmatprep.subr.bf16.mxu0 %v1728_v1 }
  0x3c   : > { %1576 = vmatprep.subr.bf16.mxu1 %v1728_v1 }
  0x3d   : > { %1549 = vmatmul.mubr.msk.bf16.vlgmr.msra.gmra.mxu0 %vm384_vm0, %v1642_v18 }
  0x3e   : > { %1561 = vmatmul.mubr.msk.bf16.vlgmr.msra.gmra.mxu1 %vm384_vm0, %v1643_v19  ;;  %1565 = vmatpush3.bf16.msra.mxu0 %v1728_v1 }
  0x3f   : > { %1577 = vmatpush3.bf16.msra.mxu1 %v1728_v1  ;;  %1566 = vmatprep.subr.bf16.mxu0 %v1739_v3 }
  0x40   : > { %1578 = vmatprep.subr.bf16.mxu1 %v1739_v3  ;;  %1572 = vmatprep.mubr.msk.bf16.mxu0 %vm384_vm0, %v1644_v20 }
  0x41   : > { %1584 = vmatprep.mubr.msk.bf16.mxu1 %vm384_vm0, %v1645_v21 }
  0x42   : > { %1567 = vmatpush3.bf16.msra.mxu0 %v1739_v3 }
  0x43   : > { %1579 = vmatpush3.bf16.msra.mxu1 %v1739_v3  ;;  %1568 = vmatprep.subr.bf16.mxu0 %v1750_v5 }
  0x44   : > { %1580 = vmatprep.subr.bf16.mxu1 %v1750_v5 }
  0x46   : > { %1569 = vmatpush3.bf16.msra.mxu0 %v1750_v5 }
  0x47   : > { %1581 = vmatpush3.bf16.msra.mxu1 %v1750_v5  ;;  %1570 = vmatprep.subr.bf16.mxu0 %v1771_v8 }
  0x48   : > { %1582 = vmatprep.subr.bf16.mxu1 %v1771_v8 }
  0x4a   : > { %1571 = vmatpush3.bf16.msra.mxu0 %v1771_v8 }
  0x4b   : > { %1583 = vmatpush3.bf16.msra.mxu1 %v1771_v8  ;;  %1588 = vmatprep.subr.bf16.mxu0 %v1728_v1 }
  0x4d   : > { %1573 = vmatmul.mubr.msk.bf16.vlgmr.msra.gmra.mxu0 %vm384_vm0, %v1646_v22 }
  0x4e   : > { %1585 = vmatmul.mubr.msk.bf16.vlgmr.msra.gmra.mxu1 %vm384_vm0, %v1647_v23  ;;  %1589 = vmatpush3.bf16.msra.mxu0 %v1728_v1 }
  0x4f   : > { %1590 = vmatprep.subr.bf16.mxu0 %v1739_v3  ;;  %1596 = vmatprep.mubr.msk.bf16.mxu0 %vm384_vm0, %v1648_v24 }
  0x52   : > { %1591 = vmatpush3.bf16.msra.mxu0 %v1739_v3 }
  0x53   : > { %1592 = vmatprep.subr.bf16.mxu0 %v1750_v5 }
  0x56   : > { %1593 = vmatpush3.bf16.msra.mxu0 %v1750_v5 }
  0x57   : > { %1594 = vmatprep.subr.bf16.mxu0 %v1771_v8 }
  0x5a   : > { %1595 = vmatpush3.bf16.msra.mxu0 %v1771_v8 }
  0x5d   : > { %1597 = vmatmul.mubr.msk.bf16.vlgmr.msra.gmra.mxu0 %vm384_vm0, %v1649_v25 }
  0xdd   : > { %v1502_v27 = vpop.f32.mrf.mxu0 }
  0xde   : > { %v434_v28 = vadd.f32 %v1502_v27, %v1344_v26  ;;  %v1514_v33 = vpop.f32.mrf.mxu1 }
  0xdf   : > { %v425_v29 = vpop.f32.mrf.mxu0 }
  0xe0   : > { %442 = vst.msk [vmem:[#allocation2 + $0x10] sm:$0xff] %vm384_vm0, %v434_v28  ;;  %v426_v30 = vadd.f32 %v1344_v26, %v425_v29  ;;  %v535_v36 = vpop.f32.mrf.mxu1 }
  0xe1   : > { %v1503_v31 = vpop.f32.mrf.mxu0 }
  0xe2   : > { %440 = vst.msk [vmem:[#allocation2] sm:$0xff] %vm384_vm0, %v426_v30  ;;  %v437_v32 = vadd.f32 %v1503_v31, %v1344_v26  ;;  %v1515_v37 = vpop.f32.mrf.mxu1 }
  0xe3   : > { %v428_v34 = vpop.f32.mrf.mxu0 }
  0xe4   : > { %443 = vst.msk [vmem:[#allocation2 + $0x18] sm:$0xff] %vm384_vm0, %v437_v32  ;;  %v429_v35 = vadd.f32 %v1344_v26, %v428_v34  ;;  %v538_v38 = vpop.f32.mrf.mxu1 }
  0xe6   : > { %441 = vst.msk [vmem:[#allocation2 + $0x8] sm:$0xff] %vm384_vm0, %v429_v35 }
  0xe7   : > { %v1873_v43 = vld [vmem:[#allocation2 + $0x10] sm:$0xff] }
  0xe8   : > { %v544_v47 = vadd.f32 %v1514_v33, %v1873_v43 }
  0xe9   : > { %v1875_v45 = vld [vmem:[#allocation2] sm:$0xff] }
  0xea   : > { %v536_v48 = vadd.f32 %v535_v36, %v1875_v45  ;;  %v556_v56 = vmul.f32 0.2, %v544_v47  ;;  %vm552_vm1 = vcmp.gt.f32.partialorder %v544_v47, 0.0 }
  0xeb   : > { %v1879_v50 = vld [vmem:[#allocation2 + $0x18] sm:$0xff] }
  0xec   : > { %v554_v58 = vmul.f32 0.2, %v536_v48  ;;  %v547_v59 = vadd.f32 %v1515_v37, %v1879_v50  ;;  %vm550_vm2 = vcmp.gt.f32.partialorder %v536_v48, 0.0  ;;  %v560_v2 = vsel %vm552_vm1, %v544_v47, %v556_v56 }
  0xed   : > { %v1526_v39 = vpop.f32.mrf.mxu0  ;;  %v1881_v51 = vld [vmem:[#allocation2 + $0x8] sm:$0xff] }
  0xee   : > { %v1538_v40 = vpop.f32.mrf.mxu1  ;;  %v626_v53 = vadd.f32 %v1526_v39, %v1873_v43  ;;  %v539_v60 = vadd.f32 %v538_v38, %v1881_v51  ;;  %v558_v5 = vsel %vm550_vm2, %v536_v48, %v554_v58  ;;  %vm553_vm5 = vcmp.gt.f32.partialorder %v547_v59, 0.0 }
  0xef   : > { %v617_v41 = vpop.f32.mrf.mxu0  ;;  %v712_v61 = vadd.f32 %v1538_v40, %v1873_v43  ;;  %v557_v6 = vmul.f32 0.2, %v547_v59 }
  0xf0   : > { %v703_v42 = vpop.f32.mrf.mxu1  ;;  %v618_v54 = vadd.f32 %v617_v41, %v1875_v45  ;;  %v638_v62 = vmul.f32 0.2, %v626_v53  ;;  %vm634_vm3 = vcmp.gt.f32.partialorder %v626_v53, 0.0  ;;  %v555_v7 = vmul.f32 0.2, %v539_v60 }
  0xf1   : > { %v1527_v44 = vpop.f32.mrf.mxu0  ;;  %vm551_vm6 = vcmp.gt.f32.partialorder %v539_v60, 0.0  ;;  %vm720_vm7 = vcmp.gt.f32.partialorder %v712_v61, 0.0  ;;  %v724_v8 = vmul.f32 0.2, %v712_v61  ;;  %v704_v9 = vadd.f32 %v703_v42, %v1875_v45 }
  0xf2   : > { %v1539_v46 = vpop.f32.mrf.mxu1  ;;  %v636_v63 = vmul.f32 0.2, %v618_v54  ;;  %v629_v0 = vadd.f32 %v1527_v44, %v1879_v50  ;;  %vm632_vm4 = vcmp.gt.f32.partialorder %v618_v54, 0.0  ;;  %v642_v10 = vsel %vm634_vm3, %v626_v53, %v638_v62 }
  0xf3   : > { %v620_v49 = vpop.f32.mrf.mxu0  ;;  %v715_v13 = vadd.f32 %v1539_v46, %v1879_v50  ;;  %v561_v19 = vsel %vm553_vm5, %v547_v59, %v557_v6  ;;  %v559_v20 = vsel %vm551_vm6, %v539_v60, %v555_v7  ;;  %v646_v22 = vmax.f32 %v560_v2, %v642_v10 }
  0xf4   : > { %v706_v52 = vpop.f32.mrf.mxu1  ;;  %v621_v3 = vadd.f32 %v620_v49, %v1881_v51  ;;  %v640_v11 = vsel %vm632_vm4, %v618_v54, %v636_v63  ;;  %v639_v12 = vmul.f32 0.2, %v629_v0  ;;  %vm635_vm8 = vcmp.gt.f32.partialorder %v629_v0, 0.0 }
  0xf5   : > { %v707_v16 = vadd.f32 %v706_v52, %v1881_v51  ;;  %v728_v23 = vsel %vm720_vm7, %v712_v61, %v724_v8  ;;  %vm718_vm10 = vcmp.gt.f32.partialorder %v704_v9, 0.0  ;;  %v722_v24 = vmul.f32 0.2, %v704_v9 }
  0xf6   : > { %v637_v15 = vmul.f32 0.2, %v621_v3  ;;  %vm633_vm9 = vcmp.gt.f32.partialorder %v621_v3, 0.0  ;;  %v644_v25 = vmax.f32 %v558_v5, %v640_v11  ;;  %v643_v26 = vsel %vm635_vm8, %v629_v0, %v639_v12 }
  0xf7   : > { %vm721_vm11 = vcmp.gt.f32.partialorder %v715_v13, 0.0  ;;  %v725_v27 = vmul.f32 0.2, %v715_v13  ;;  %v723_v30 = vmul.f32 0.2, %v707_v16  ;;  %vm719_vm12 = vcmp.gt.f32.partialorder %v707_v16, 0.0 }
  0xf8   : > { %v641_v29 = vsel %vm633_vm9, %v621_v3, %v637_v15  ;;  %v732_v37 = vmax.f32 %v646_v22, %v728_v23  ;;  %v726_v38 = vsel %vm718_vm10, %v704_v9, %v722_v24  ;;  %v647_v42 = vmax.f32 %v561_v19, %v643_v26 }
  0xf9   : > { %v730_v41 = vmax.f32 %v644_v25, %v726_v38  ;;  %v729_v44 = vsel %vm721_vm11, %v715_v13, %v725_v27  ;;  %v645_v46 = vmax.f32 %v559_v20, %v641_v29  ;;  %v727_v48 = vsel %vm719_vm12, %v707_v16, %v723_v30 }
  0xfa   : > { %v733_v62 = vmax.f32 %v647_v42, %v729_v44  ;;  %vm1183_vm10 = vcmask 519168  }
  0xfb   : > { %v731_v63 = vmax.f32 %v645_v46, %v727_v48 }
  0xfd   : > { %v1550_v55 = vpop.f32.mrf.mxu0 }
  0xfe   : > { %v1562_v57 = vpop.f32.mrf.mxu1  ;;  %v798_v17 = vadd.f32 %v1550_v55, %v1873_v43 }
  0xff   : > { %v789_v1 = vpop.f32.mrf.mxu0  ;;  %v884_v32 = vadd.f32 %v1562_v57, %v1873_v43 }
 0x100   : > { %v875_v4 = vpop.f32.mrf.mxu1  ;;  %v790_v21 = vadd.f32 %v789_v1, %v1875_v45  ;;  %v810_v31 = vmul.f32 0.2, %v798_v17  ;;  %vm806_vm13 = vcmp.gt.f32.partialorder %v798_v17, 0.0 }
 0x101   : > { %v1551_v14 = vpop.f32.mrf.mxu0  ;;  %v896_v52 = vmul.f32 0.2, %v884_v32  ;;  %v876_v53 = vadd.f32 %v875_v4, %v1875_v45  ;;  %vm892_vm15 = vcmp.gt.f32.partialorder %v884_v32, 0.0 }
 0x102   : > { %v1563_v18 = vpop.f32.mrf.mxu1  ;;  %v808_v34 = vmul.f32 0.2, %v790_v21  ;;  %v801_v35 = vadd.f32 %v1551_v14, %v1879_v50  ;;  %vm804_vm14 = vcmp.gt.f32.partialorder %v790_v21, 0.0  ;;  %v814_v49 = vsel %vm806_vm13, %v798_v17, %v810_v31 }
 0x103   : > { %v792_v28 = vpop.f32.mrf.mxu0  ;;  %v887_v56 = vadd.f32 %v1563_v18, %v1879_v50  ;;  %v818_v0 = vmax.f32 %v732_v37, %v814_v49  ;;  %v900_v1 = vsel %vm892_vm15, %v884_v32, %v896_v52  ;;  %vm890_vm2 = vcmp.gt.f32.partialorder %v876_v53, 0.0 }
 0x104   : > { %v878_v33 = vpop.f32.mrf.mxu1  ;;  %v793_v39 = vadd.f32 %v792_v28, %v1881_v51  ;;  %v812_v54 = vsel %vm804_vm14, %v790_v21, %v808_v34  ;;  %v811_v55 = vmul.f32 0.2, %v801_v35  ;;  %vm807_vm0 = vcmp.gt.f32.partialorder %v801_v35, 0.0 }
 0x105   : > { %v894_v2 = vmul.f32 0.2, %v876_v53  ;;  %v879_v3 = vadd.f32 %v878_v33, %v1881_v51  ;;  %v816_v4 = vmax.f32 %v730_v41, %v812_v54  ;;  %vm893_vm3 = vcmp.gt.f32.partialorder %v887_v56, 0.0 }
 0x106   : > { %v809_v58 = vmul.f32 0.2, %v793_v39  ;;  %vm805_vm1 = vcmp.gt.f32.partialorder %v793_v39, 0.0  ;;  %v815_v5 = vsel %vm807_vm0, %v801_v35, %v811_v55  ;;  %v897_v6 = vmul.f32 0.2, %v887_v56 }
 0x107   : > { %v904_v15 = vmax.f32 %v818_v0, %v900_v1  ;;  %v898_v16 = vsel %vm890_vm2, %v876_v53, %v894_v2  ;;  %v895_v17 = vmul.f32 0.2, %v879_v3  ;;  %v819_v20 = vmax.f32 %v733_v62, %v815_v5 }
 0x108   : > { %v813_v8 = vsel %vm805_vm1, %v793_v39, %v809_v58  ;;  %v902_v19 = vmax.f32 %v816_v4, %v898_v16  ;;  %v901_v21 = vsel %vm893_vm3, %v887_v56, %v897_v6  ;;  %vm891_vm6 = vcmp.gt.f32.partialorder %v879_v3, 0.0 }
 0x109   : > { %v817_v22 = vmax.f32 %v731_v63, %v813_v8  ;;  %v899_v30 = vsel %vm891_vm6, %v879_v3, %v895_v17 }
 0x10b   : > { %v903_v37 = vmax.f32 %v817_v22, %v899_v30 }
 0x10d   : > { %v1574_v36 = vpop.f32.mrf.mxu0 }
 0x10e   : > { %v1586_v40 = vpop.f32.mrf.mxu1  ;;  %v970_v59 = vadd.f32 %v1574_v36, %v1873_v43  ;;  %v905_v36 = vmax.f32 %v819_v20, %v901_v21 }
 0x10f   : > { %v961_v47 = vpop.f32.mrf.mxu0  ;;  %v1056_v13 = vadd.f32 %v1586_v40, %v1873_v43 }
 0x110   : > { %v962_v60 = vadd.f32 %v961_v47, %v1875_v45  ;;  %v1047_v61 = vpop.f32.mrf.mxu1  ;;  %v982_v9 = vmul.f32 0.2, %v970_v59  ;;  %vm978_vm4 = vcmp.gt.f32.partialorder %v970_v59, 0.0 }
 0x111   : > { %v1575_v57 = vpop.f32.mrf.mxu0  ;;  %v1048_v14 = vadd.f32 %v1047_v61, %v1875_v45  ;;  %v1068_v27 = vmul.f32 0.2, %v1056_v13  ;;  %vm1064_vm8 = vcmp.gt.f32.partialorder %v1056_v13, 0.0 }
 0x112   : > { %v980_v10 = vmul.f32 0.2, %v962_v60  ;;  %v973_v11 = vadd.f32 %v1575_v57, %v1879_v50  ;;  %v1587_v12 = vpop.f32.mrf.mxu1  ;;  %vm976_vm5 = vcmp.gt.f32.partialorder %v962_v60, 0.0  ;;  %v986_v23 = vsel %vm978_vm4, %v970_v59, %v982_v9 }
 0x113   : > { %v964_v7 = vpop.f32.mrf.mxu0  ;;  %v1066_v28 = vmul.f32 0.2, %v1048_v14  ;;  %v1059_v29 = vadd.f32 %v1587_v12, %v1879_v50  ;;  %vm1062_vm9 = vcmp.gt.f32.partialorder %v1048_v14, 0.0  ;;  %v990_v32 = vmax.f32 %v904_v15, %v986_v23 }
 0x114   : > { %v965_v18 = vadd.f32 %v964_v7, %v1881_v51  ;;  %v984_v24 = vsel %vm976_vm5, %v962_v60, %v980_v10  ;;  %v983_v25 = vmul.f32 0.2, %v973_v11  ;;  %v1050_v26 = vpop.f32.mrf.mxu1  ;;  %vm979_vm7 = vcmp.gt.f32.partialorder %v973_v11, 0.0 }
 0x115   : > { %v988_v33 = vmax.f32 %v902_v19, %v984_v24  ;;  %v1051_v34 = vadd.f32 %v1050_v26, %v1881_v51  ;;  %v1072_v40 = vsel %vm1064_vm8, %v1056_v13, %v1068_v27  ;;  %v1070_v41 = vsel %vm1062_vm9, %v1048_v14, %v1066_v28 }
 0x116   : > { %v981_v31 = vmul.f32 0.2, %v965_v18  ;;  %vm977_vm11 = vcmp.gt.f32.partialorder %v965_v18, 0.0  ;;  %v987_v38 = vsel %vm979_vm7, %v973_v11, %v983_v25  ;;  %vm1065_vm12 = vcmp.gt.f32.partialorder %v1059_v29, 0.0 }
 0x117   : > { %v1069_v42 = vmul.f32 0.2, %v1059_v29  ;;  %v1076_v49 = vmax.f32 %v990_v32, %v1072_v40  ;;  %v1074_v52 = vmax.f32 %v988_v33, %v1070_v41  ;;  %v991_v53 = vmax.f32 %v905_v36, %v987_v38 }
 0x118   : > { %v985_v46 = vsel %vm977_vm11, %v965_v18, %v981_v31  ;;  %v1067_v54 = vmul.f32 0.2, %v1051_v34  ;;  %vm1063_vm15 = vcmp.gt.f32.partialorder %v1051_v34, 0.0 }
 0x119   : > { %v1073_v58 = vsel %vm1065_vm12, %v1059_v29, %v1069_v42  ;;  %v989_v59 = vmax.f32 %v903_v37, %v985_v46 }
 0x11a   : > { %v1077_v0 = vmax.f32 %v991_v53, %v1073_v58 }
 0x11d   : > { %v1598_v35 = vpop.f32.mrf.mxu0 }
 0x11e   : > { %v1142_v39 = vadd.f32 %v1598_v35, %v1873_v43 }
 0x11f   : > { %v1133_v44 = vpop.f32.mrf.mxu0 }
 0x120   : > { %vm1150_vm13 = vcmp.gt.f32.partialorder %v1142_v39, 0.0  ;;  %v1154_v47 = vmul.f32 0.2, %v1142_v39  ;;  %v1134_v48 = vadd.f32 %v1133_v44, %v1875_v45 }
 0x121   : > { %v1599_v55 = vpop.f32.mrf.mxu0 }
 0x122   : > { %v1158_v56 = vsel %vm1150_vm13, %v1142_v39, %v1154_v47  ;;  %vm1148_vm14 = vcmp.gt.f32.partialorder %v1134_v48, 0.0  ;;  %v1152_v57 = vmul.f32 0.2, %v1134_v48  ;;  %v1145_v43 = vadd.f32 %v1599_v55, %v1879_v50 }
 0x123   : > { %v1162_v60 = vmax.f32 %v1076_v49, %v1158_v56  ;;  %v1136_v61 = vpop.f32.mrf.mxu0  ;;  %v1071_v50 = vsel %vm1063_vm15, %v1051_v34, %v1067_v54 }
 0x124   : > { %v1156_v45 = vsel %vm1148_vm14, %v1134_v48, %v1152_v57  ;;  %vm1151_vm0 = vcmp.gt.f32.partialorder %v1145_v43, 0.0  ;;  %v1155_v62 = vmul.f32 0.2, %v1145_v43  ;;  %v1137_v63 = vadd.f32 %v1136_v61, %v1881_v51 }
 0x125   : > { %v1432_v1 = vpack.c.bf16 %v1162_v60, %v1162_v60  ;;  %v1160_v2 = vmax.f32 %v1074_v52, %v1156_v45  ;;  %v1075_v5 = vmax.f32 %v989_v59, %v1071_v50 }
 0x126   : > { %v1159_v3 = vsel %vm1151_vm0, %v1145_v43, %v1155_v62  ;;  %vm1149_vm1 = vcmp.gt.f32.partialorder %v1137_v63, 0.0  ;;  %v1153_v4 = vmul.f32 0.2, %v1137_v63 }
 0x127   : > { %1186 = vst.msk [vmem:[%s324_s29 + $0x8] sm:$0xf] %vm1183_vm10, %v1432_v1  ;;  %v1430_v6 = vpack.c.bf16 %v1160_v2, %v1160_v2  ;;  %v1163_v7 = vmax.f32 %v1077_v0, %v1159_v3 }
 0x128   : > { %v1157_v8 = vsel %vm1149_vm1, %v1137_v63, %v1153_v4 }
 0x129   : > { %1184 = vst.msk [vmem:[%s324_s29] sm:$0xf] %vm1183_vm10, %v1430_v6  ;;  %v1433_v9 = vpack.c.bf16 %v1163_v7, %v1163_v7  ;;  %v1161_v10 = vmax.f32 %v1075_v5, %v1157_v8 }
 0x12b   : > { %1187 = vst.msk [vmem:[%s324_s29 + $0xc] sm:$0xf] %vm1183_vm10, %v1433_v9  ;;  %v1431_v51 = vpack.c.bf16 %v1161_v10, %v1161_v10 }
 0x12d   : > { %1185 = vst.msk [vmem:[%s324_s29 + $0x4] sm:$0xf] %vm1183_vm10, %v1431_v51 }
 0x12e PF: > { %s15_s20 = sadd.s32 1, %s1672_s20   ;;  %s1944_s18 = smov %s1668_s19 }
 0x12f   : > { %p12_p5 = scmp.ge.s32.totalorder %s15_s20, 4   ;;  %s1945_s19 = smov %s1947_s21 }
 0x131   :  { %14 = sbr.rel (!%p12_p5) target bundleno = 2 (0x2), region = 92 }

// kernel: _lambda_.15
= control target key start
LH: loop header
LB: loop body
LE: loop exit
PB: predicated region body
PF: predicated region fallthrough
CT: control target
= control target key end

     0   :  { %s1713_s18 = smov 0   ;;  %s1715_s19 = smov 0   ;;  %s1937_s0 = inlined_call_operand.vmem [shape: bf16[2,8,32,64], index: 0, kind: input, shape index: {}]   ;;  %s1938_s1 = inlined_call_operand.vmem [shape: bf16[2,32,64], index: 1, kind: input, shape index: {}]   ;;  %s1939_s2 = inlined_call_operand.vmem [shape: bf16[64,128], index: 2, kind: input, shape index: {}]   ;;  %s1940_s3 = inlined_call_operand.vmem [shape: bf16[64,128], index: 3, kind: input, shape index: {}]   ;;  %s1941_s4 = inlined_call_operand.vmem [shape: f32[1,128], index: 4, kind: input, shape index: {}]   ;;  %s1942_s5 = inlined_call_operand.vmem [shape: bf16[2,32,128], index: 5, kind: output, shape index: {}]  }
   0x1   :  { %s1717_s20 = smov 0  }
   0x2 LB: > { %s34_s21 = sadd.s32 1, %s1677_s19  ;;  %p1335_p0 = scmp.ge.s32.totalorder %s1681_s20, 1  ;;  %s1681_s20 = sphi %s1717_s20, %s15_s20   ;;  %s1677_s19 = sphi %s1715_s19, %s1944_s19   ;;  %s1673_s18 = sphi %s1713_s18, %s1943_s18  }
   0x3   : > { %p36_p1 = scmp.ge.s32.totalorder %s34_s21, 2  ;;  %p240_p2 = scmp.lt.s32.totalorder %s1681_s20, 3 }
   0x5   : > { %s1946_s21 = smov (%p36_p1, %s34_s21), 0  ;;  %p241_p3 = pnand %p1335_p0, %p240_p2 }
   0x6   : > { %p292_p4 = scmp.lt.s32.totalorder (!%p241_p3), %s1673_s18, 1 }
   0x7   : > { %244 = sbr.rel (%p241_p3) target bundleno = 302 (0x12e), region = 40 }
   0xc   : > { %v1633_v0 = vld [vmem:[%s1940_s3 + $0x18] sm:$0xff]   ;;  %v1635_v2 = vld [vmem:[%s1940_s3 + $0x10] sm:$0xff]   ;;  %s1948_s18 = smov (!%p292_p4, %s1673_s18), 1  ;;  %v1637_v4 = vld [vmem:[%s1940_s3 + $0x8] sm:$0xff]   ;;  %vm384_vm0 = vcmask 523264  }
   0xd   : > { %v1737_v1 = vld [vmem:[%s1939_s2 + $0x18] sm:$0xff]   ;;  %1501 = vmatprep.subr.bf16.mxu0 %v1633_v0  ;;  %v1748_v3 = vld [vmem:[%s1939_s2 + $0x10] sm:$0xff]   ;;  %s1425_s7 = sshll.u32 %s1948_s18, 7  ;;  %v1759_v5 = vld [vmem:[%s1939_s2 + $0x8] sm:$0xff]   ;;  %s1426_s10 = sshll.u32 %s1948_s18, 4 }
   0xe   : > { %1513 = vmatprep.subr.bf16.mxu1 %v1737_v1  ;;  %1502 = vmatpush3.bf16.msra.mxu0 %v1633_v0  ;;  %s314_s13 = scalar_lea.vmem %s1938_s1, %s1426_s10  ;;  %v1639_v6 = vld [vmem:[%s1940_s3] sm:$0xff]   ;;  %s1773_s22 = scalar_lea.vmem %s1937_s0, %s1425_s7 }
   0xf   : > { %1514 = vmatpush3.bf16.msra.mxu1 %v1737_v1  ;;  %1503 = vmatprep.subr.bf16.mxu0 %v1635_v2  ;;  %v1641_v7 = vld [vmem:[%s314_s13] sm:$0xff]   ;;  %v1642_v10 = vld [vmem:[%s314_s13 + $0x8] sm:$0xff]   ;;  %v1645_v12 = vld [vmem:[%s1773_s22 + $0x10] sm:$0xff]   ;;  %s324_s29 = scalar_lea.vmem %s1942_s5, %s1426_s10 }
  0x10   : > { %1515 = vmatprep.subr.bf16.mxu1 %v1748_v3  ;;  %v1780_v8 = vld [vmem:[%s1939_s2] sm:$0xff]   ;;  %1509 = vmatprep.mubr.msk.bf16.mxu0 %vm384_vm0, %v1641_v7  ;;  %v1644_v11 = vld [vmem:[%s1773_s22 + $0x8] sm:$0xff]   ;;  %v1647_v14 = vld [vmem:[%s1773_s22 + $0x18] sm:$0xff]  }
  0x11   : > { %v1643_v9 = vld [vmem:[%s1773_s22] sm:$0xff]   ;;  %v1648_v15 = vld [vmem:[%s1773_s22 + $0x28] sm:$0xff]   ;;  %v1649_v16 = vld [vmem:[%s1773_s22 + $0x30] sm:$0xff]  }
  0x12   : > { %1504 = vmatpush3.bf16.msra.mxu0 %v1635_v2  ;;  %1521 = vmatprep.mubr.msk.bf16.mxu1 %vm384_vm0, %v1643_v9  ;;  %v1646_v13 = vld [vmem:[%s1773_s22 + $0x20] sm:$0xff]   ;;  %v1651_v18 = vld [vmem:[%s1773_s22 + $0x38] sm:$0xff]   ;;  %v1652_v19 = vld [vmem:[%s1773_s22 + $0x48] sm:$0xff]  }
  0x13   : > { %1516 = vmatpush3.bf16.msra.mxu1 %v1748_v3  ;;  %1505 = vmatprep.subr.bf16.mxu0 %v1637_v4  ;;  %v1650_v17 = vld [vmem:[%s1773_s22 + $0x40] sm:$0xff]   ;;  %v1653_v20 = vld [vmem:[%s1773_s22 + $0x50] sm:$0xff]   ;;  %v1655_v22 = vld [vmem:[%s1773_s22 + $0x58] sm:$0xff]  }
  0x14   : > { %1517 = vmatprep.subr.bf16.mxu1 %v1759_v5  ;;  %v1654_v21 = vld [vmem:[%s1773_s22 + $0x60] sm:$0xff]   ;;  %v1656_v23 = vld [vmem:[%s1773_s22 + $0x68] sm:$0xff]   ;;  %v1657_v24 = vld [vmem:[%s1773_s22 + $0x70] sm:$0xff]  }
  0x15   : > { %v1658_v25 = vld [vmem:[%s1773_s22 + $0x78] sm:$0xff]   ;;  %v1342_v36 = vld [vmem:[%s1941_s4] ss:$0 sm:$0xff] }
  0x16   : > { %1506 = vmatpush3.bf16.msra.mxu0 %v1637_v4 }
  0x17   : > { %1518 = vmatpush3.bf16.msra.mxu1 %v1759_v5  ;;  %1507 = vmatprep.subr.bf16.mxu0 %v1639_v6 }
  0x18   : > { %1519 = vmatprep.subr.bf16.mxu1 %v1780_v8 }
  0x1a   : > { %1508 = vmatpush3.bf16.msra.mxu0 %v1639_v6 }
  0x1b   : > { %1520 = vmatpush3.bf16.msra.mxu1 %v1780_v8  ;;  %1525 = vmatprep.subr.bf16.mxu0 %v1737_v1 }
  0x1c   : > { %1537 = vmatprep.subr.bf16.mxu1 %v1737_v1 }
  0x1d   : > { %1510 = vmatmul.mubr.msk.bf16.vlgmr.msra.gmra.mxu0 %vm384_vm0, %v1642_v10 }
  0x1e   : > { %1522 = vmatmul.mubr.msk.bf16.vlgmr.msra.gmra.mxu1 %vm384_vm0, %v1644_v11  ;;  %1526 = vmatpush3.bf16.msra.mxu0 %v1737_v1 }
  0x1f   : > { %1538 = vmatpush3.bf16.msra.mxu1 %v1737_v1  ;;  %1527 = vmatprep.subr.bf16.mxu0 %v1748_v3 }
  0x20   : > { %1539 = vmatprep.subr.bf16.mxu1 %v1748_v3  ;;  %1533 = vmatprep.mubr.msk.bf16.mxu0 %vm384_vm0, %v1645_v12 }
  0x21   : > { %1545 = vmatprep.mubr.msk.bf16.mxu1 %vm384_vm0, %v1646_v13 }
  0x22   : > { %1528 = vmatpush3.bf16.msra.mxu0 %v1748_v3 }
  0x23   : > { %1540 = vmatpush3.bf16.msra.mxu1 %v1748_v3  ;;  %1529 = vmatprep.subr.bf16.mxu0 %v1759_v5 }
  0x24   : > { %1541 = vmatprep.subr.bf16.mxu1 %v1759_v5 }
  0x26   : > { %1530 = vmatpush3.bf16.msra.mxu0 %v1759_v5 }
  0x27   : > { %1542 = vmatpush3.bf16.msra.mxu1 %v1759_v5  ;;  %1531 = vmatprep.subr.bf16.mxu0 %v1780_v8 }
  0x28   : > { %1543 = vmatprep.subr.bf16.mxu1 %v1780_v8 }
  0x2a   : > { %1532 = vmatpush3.bf16.msra.mxu0 %v1780_v8 }
  0x2b   : > { %1544 = vmatpush3.bf16.msra.mxu1 %v1780_v8  ;;  %1549 = vmatprep.subr.bf16.mxu0 %v1737_v1 }
  0x2c   : > { %1561 = vmatprep.subr.bf16.mxu1 %v1737_v1 }
  0x2d   : > { %1534 = vmatmul.mubr.msk.bf16.vlgmr.msra.gmra.mxu0 %vm384_vm0, %v1647_v14 }
  0x2e   : > { %1546 = vmatmul.mubr.msk.bf16.vlgmr.msra.gmra.mxu1 %vm384_vm0, %v1648_v15  ;;  %1550 = vmatpush3.bf16.msra.mxu0 %v1737_v1 }
  0x2f   : > { %1562 = vmatpush3.bf16.msra.mxu1 %v1737_v1  ;;  %1551 = vmatprep.subr.bf16.mxu0 %v1748_v3 }
  0x30   : > { %1563 = vmatprep.subr.bf16.mxu1 %v1748_v3  ;;  %1557 = vmatprep.mubr.msk.bf16.mxu0 %vm384_vm0, %v1649_v16 }
  0x31   : > { %1569 = vmatprep.mubr.msk.bf16.mxu1 %vm384_vm0, %v1650_v17 }
  0x32   : > { %1552 = vmatpush3.bf16.msra.mxu0 %v1748_v3 }
  0x33   : > { %1564 = vmatpush3.bf16.msra.mxu1 %v1748_v3  ;;  %1553 = vmatprep.subr.bf16.mxu0 %v1759_v5 }
  0x34   : > { %1565 = vmatprep.subr.bf16.mxu1 %v1759_v5 }
  0x36   : > { %1554 = vmatpush3.bf16.msra.mxu0 %v1759_v5 }
  0x37   : > { %1566 = vmatpush3.bf16.msra.mxu1 %v1759_v5  ;;  %1555 = vmatprep.subr.bf16.mxu0 %v1780_v8 }
  0x38   : > { %1567 = vmatprep.subr.bf16.mxu1 %v1780_v8 }
  0x3a   : > { %1556 = vmatpush3.bf16.msra.mxu0 %v1780_v8 }
  0x3b   : > { %1568 = vmatpush3.bf16.msra.mxu1 %v1780_v8  ;;  %1573 = vmatprep.subr.bf16.mxu0 %v1737_v1 }
  0x3c   : > { %1585 = vmatprep.subr.bf16.mxu1 %v1737_v1 }
  0x3d   : > { %1558 = vmatmul.mubr.msk.bf16.vlgmr.msra.gmra.mxu0 %vm384_vm0, %v1651_v18 }
  0x3e   : > { %1570 = vmatmul.mubr.msk.bf16.vlgmr.msra.gmra.mxu1 %vm384_vm0, %v1652_v19  ;;  %1574 = vmatpush3.bf16.msra.mxu0 %v1737_v1 }
  0x3f   : > { %1586 = vmatpush3.bf16.msra.mxu1 %v1737_v1  ;;  %1575 = vmatprep.subr.bf16.mxu0 %v1748_v3 }
  0x40   : > { %1587 = vmatprep.subr.bf16.mxu1 %v1748_v3  ;;  %1581 = vmatprep.mubr.msk.bf16.mxu0 %vm384_vm0, %v1653_v20 }
  0x41   : > { %1593 = vmatprep.mubr.msk.bf16.mxu1 %vm384_vm0, %v1654_v21 }
  0x42   : > { %1576 = vmatpush3.bf16.msra.mxu0 %v1748_v3 }
  0x43   : > { %1588 = vmatpush3.bf16.msra.mxu1 %v1748_v3  ;;  %1577 = vmatprep.subr.bf16.mxu0 %v1759_v5 }
  0x44   : > { %1589 = vmatprep.subr.bf16.mxu1 %v1759_v5 }
  0x46   : > { %1578 = vmatpush3.bf16.msra.mxu0 %v1759_v5 }
  0x47   : > { %1590 = vmatpush3.bf16.msra.mxu1 %v1759_v5  ;;  %1579 = vmatprep.subr.bf16.mxu0 %v1780_v8 }
  0x48   : > { %1591 = vmatprep.subr.bf16.mxu1 %v1780_v8 }
  0x4a   : > { %1580 = vmatpush3.bf16.msra.mxu0 %v1780_v8 }
  0x4b   : > { %1592 = vmatpush3.bf16.msra.mxu1 %v1780_v8  ;;  %1597 = vmatprep.subr.bf16.mxu0 %v1737_v1 }
  0x4d   : > { %1582 = vmatmul.mubr.msk.bf16.vlgmr.msra.gmra.mxu0 %vm384_vm0, %v1655_v22 }
  0x4e   : > { %1594 = vmatmul.mubr.msk.bf16.vlgmr.msra.gmra.mxu1 %vm384_vm0, %v1656_v23  ;;  %1598 = vmatpush3.bf16.msra.mxu0 %v1737_v1 }
  0x4f   : > { %1599 = vmatprep.subr.bf16.mxu0 %v1748_v3  ;;  %1605 = vmatprep.mubr.msk.bf16.mxu0 %vm384_vm0, %v1657_v24 }
  0x52   : > { %1600 = vmatpush3.bf16.msra.mxu0 %v1748_v3 }
  0x53   : > { %1601 = vmatprep.subr.bf16.mxu0 %v1759_v5 }
  0x56   : > { %1602 = vmatpush3.bf16.msra.mxu0 %v1759_v5 }
  0x57   : > { %1603 = vmatprep.subr.bf16.mxu0 %v1780_v8 }
  0x5a   : > { %1604 = vmatpush3.bf16.msra.mxu0 %v1780_v8 }
  0x5d   : > { %1606 = vmatmul.mubr.msk.bf16.vlgmr.msra.gmra.mxu0 %vm384_vm0, %v1658_v25 }
  0xdd   : > { %v1511_v26 = vpop.f32.mrf.mxu0 }
  0xde   : > { %v1523_v27 = vpop.f32.mrf.mxu1  ;;  %v1878_v39 = vadd.f32 %v1511_v26, %v1342_v36 }
  0xdf   : > { %v425_v28 = vpop.f32.mrf.mxu0 }
  0xe0   : > { %v535_v29 = vpop.f32.mrf.mxu1  ;;  %v1880_v42 = vadd.f32 %v1342_v36, %v425_v28  ;;  %v544_v43 = vadd.f32 %v1523_v27, %v1878_v39 }
  0xe1   : > { %v1512_v30 = vpop.f32.mrf.mxu0 }
  0xe2   : > { %v1524_v31 = vpop.f32.mrf.mxu1  ;;  %v1883_v45 = vadd.f32 %v1512_v30, %v1342_v36  ;;  %v556_v49 = vmul.f32 0.2, %v544_v43  ;;  %v536_v50 = vadd.f32 %v535_v29, %v1880_v42  ;;  %vm552_vm1 = vcmp.gt.f32.partialorder %v544_v43, 0.0 }
  0xe3   : > { %v428_v32 = vpop.f32.mrf.mxu0 }
  0xe4   : > { %v538_v33 = vpop.f32.mrf.mxu1  ;;  %v1885_v47 = vadd.f32 %v1342_v36, %v428_v32  ;;  %v547_v54 = vadd.f32 %v1524_v31, %v1883_v45  ;;  %v560_v59 = vsel %vm552_vm1, %v544_v43, %v556_v49  ;;  %vm550_vm2 = vcmp.gt.f32.partialorder %v536_v50, 0.0 }
  0xe5   : > { %v554_v62 = vmul.f32 0.2, %v536_v50 }
  0xe6   : > { %v539_v56 = vadd.f32 %v538_v33, %v1885_v47  ;;  %vm553_vm4 = vcmp.gt.f32.partialorder %v547_v54, 0.0  ;;  %v557_v1 = vmul.f32 0.2, %v547_v54 }
  0xe7   : > { %v558_v10 = vsel %vm550_vm2, %v536_v50, %v554_v62 }
  0xe8   : > { %vm551_vm6 = vcmp.gt.f32.partialorder %v539_v56, 0.0  ;;  %v555_v3 = vmul.f32 0.2, %v539_v56  ;;  %v561_v14 = vsel %vm553_vm4, %v547_v54, %v557_v1 }
  0xea   : > { %v559_v17 = vsel %vm551_vm6, %v539_v56, %v555_v3 }
  0xed   : > { %v1535_v34 = vpop.f32.mrf.mxu0 }
  0xee   : > { %v1547_v35 = vpop.f32.mrf.mxu1  ;;  %v626_v51 = vadd.f32 %v1535_v34, %v1878_v39 }
  0xef   : > { %v617_v37 = vpop.f32.mrf.mxu0  ;;  %v712_v57 = vadd.f32 %v1547_v35, %v1878_v39 }
  0xf0   : > { %v703_v38 = vpop.f32.mrf.mxu1  ;;  %v618_v53 = vadd.f32 %v617_v37, %v1880_v42  ;;  %v638_v60 = vmul.f32 0.2, %v626_v51  ;;  %vm634_vm3 = vcmp.gt.f32.partialorder %v626_v51, 0.0 }
  0xf1   : > { %v1536_v40 = vpop.f32.mrf.mxu0  ;;  %v724_v4 = vmul.f32 0.2, %v712_v57  ;;  %vm720_vm8 = vcmp.gt.f32.partialorder %v712_v57, 0.0  ;;  %v704_v7 = vadd.f32 %v703_v38, %v1880_v42 }
  0xf2   : > { %v1548_v41 = vpop.f32.mrf.mxu1  ;;  %v629_v55 = vadd.f32 %v1536_v40, %v1883_v45  ;;  %v636_v63 = vmul.f32 0.2, %v618_v53  ;;  %vm632_vm5 = vcmp.gt.f32.partialorder %v618_v53, 0.0  ;;  %v642_v6 = vsel %vm634_vm3, %v626_v51, %v638_v60 }
  0xf3   : > { %v620_v44 = vpop.f32.mrf.mxu0  ;;  %v715_v8 = vadd.f32 %v1548_v41, %v1883_v45  ;;  %v646_v18 = vmax.f32 %v560_v59, %v642_v6  ;;  %v728_v19 = vsel %vm720_vm8, %v712_v57, %v724_v4  ;;  %vm718_vm10 = vcmp.gt.f32.partialorder %v704_v7, 0.0 }
  0xf4   : > { %v706_v46 = vpop.f32.mrf.mxu1  ;;  %v621_v0 = vadd.f32 %v620_v44, %v1885_v47  ;;  %v639_v2 = vmul.f32 0.2, %v629_v55  ;;  %vm635_vm7 = vcmp.gt.f32.partialorder %v629_v55, 0.0  ;;  %v640_v11 = vsel %vm632_vm5, %v618_v53, %v636_v63 }
  0xf5   : > { %v707_v20 = vadd.f32 %v706_v46, %v1885_v47  ;;  %v644_v22 = vmax.f32 %v558_v10, %v640_v11  ;;  %v722_v23 = vmul.f32 0.2, %v704_v7  ;;  %v725_v24 = vmul.f32 0.2, %v715_v8 }
  0xf6   : > { %v637_v12 = vmul.f32 0.2, %v621_v0  ;;  %v643_v15 = vsel %vm635_vm7, %v629_v55, %v639_v2  ;;  %vm633_vm9 = vcmp.gt.f32.partialorder %v621_v0, 0.0  ;;  %vm721_vm11 = vcmp.gt.f32.partialorder %v715_v8, 0.0 }
  0xf7   : > { %v647_v26 = vmax.f32 %v561_v14, %v643_v15  ;;  %v732_v34 = vmax.f32 %v646_v18, %v728_v19  ;;  %v723_v35 = vmul.f32 0.2, %v707_v20  ;;  %v726_v38 = vsel %vm718_vm10, %v704_v7, %v722_v23 }
  0xf8   : > { %v641_v27 = vsel %vm633_vm9, %v621_v0, %v637_v12  ;;  %v729_v40 = vsel %vm721_vm11, %v715_v8, %v725_v24  ;;  %vm719_vm14 = vcmp.gt.f32.partialorder %v707_v20, 0.0  ;;  %v730_v43 = vmax.f32 %v644_v22, %v726_v38 }
  0xf9   : > { %v733_v44 = vmax.f32 %v647_v26, %v729_v40  ;;  %v645_v46 = vmax.f32 %v559_v17, %v641_v27  ;;  %v727_v55 = vsel %vm719_vm14, %v707_v20, %v723_v35 }
  0xfb   : > { %v731_v60 = vmax.f32 %v645_v46, %v727_v55 }
  0xfd   : > { %v1559_v48 = vpop.f32.mrf.mxu0 }
  0xfe   : > { %v1571_v52 = vpop.f32.mrf.mxu1  ;;  %v798_v13 = vadd.f32 %v1559_v48, %v1878_v39 }
  0xff   : > { %v789_v58 = vpop.f32.mrf.mxu0  ;;  %v884_v30 = vadd.f32 %v1571_v52, %v1878_v39 }
 0x100   : > { %v875_v61 = vpop.f32.mrf.mxu1  ;;  %v790_v16 = vadd.f32 %v789_v58, %v1880_v42  ;;  %v810_v28 = vmul.f32 0.2, %v798_v13  ;;  %vm806_vm12 = vcmp.gt.f32.partialorder %v798_v13, 0.0 }
 0x101   : > { %v1560_v5 = vpop.f32.mrf.mxu0  ;;  %v876_v41 = vadd.f32 %v875_v61, %v1880_v42  ;;  %v896_v50 = vmul.f32 0.2, %v884_v30  ;;  %vm892_vm15 = vcmp.gt.f32.partialorder %v884_v30, 0.0 }
 0x102   : > { %v1572_v9 = vpop.f32.mrf.mxu1  ;;  %v808_v31 = vmul.f32 0.2, %v790_v16  ;;  %v801_v32 = vadd.f32 %v1560_v5, %v1883_v45  ;;  %vm804_vm13 = vcmp.gt.f32.partialorder %v790_v16, 0.0  ;;  %v814_v48 = vsel %vm806_vm12, %v798_v13, %v810_v28 }
 0x103   : > { %v792_v21 = vpop.f32.mrf.mxu0  ;;  %v887_v53 = vadd.f32 %v1572_v9, %v1883_v45  ;;  %v818_v57 = vmax.f32 %v732_v34, %v814_v48  ;;  %v894_v58 = vmul.f32 0.2, %v876_v41  ;;  %vm890_vm2 = vcmp.gt.f32.partialorder %v876_v41, 0.0 }
 0x104   : > { %v878_v25 = vpop.f32.mrf.mxu1  ;;  %v793_v36 = vadd.f32 %v792_v21, %v1885_v47  ;;  %v812_v51 = vsel %vm804_vm13, %v790_v16, %v808_v31  ;;  %v811_v52 = vmul.f32 0.2, %v801_v32  ;;  %vm807_vm0 = vcmp.gt.f32.partialorder %v801_v32, 0.0 }
 0x105   : > { %v816_v61 = vmax.f32 %v730_v43, %v812_v51  ;;  %v879_v62 = vadd.f32 %v878_v25, %v1885_v47  ;;  %v900_v0 = vsel %vm892_vm15, %v884_v30, %v896_v50  ;;  %v897_v2 = vmul.f32 0.2, %v887_v53 }
 0x106   : > { %v809_v56 = vmul.f32 0.2, %v793_v36  ;;  %vm805_vm1 = vcmp.gt.f32.partialorder %v793_v36, 0.0  ;;  %v815_v1 = vsel %vm807_vm0, %v801_v32, %v811_v52  ;;  %vm893_vm3 = vcmp.gt.f32.partialorder %v887_v53, 0.0 }
 0x107   : > { %v904_v8 = vmax.f32 %v818_v57, %v900_v0  ;;  %v898_v9 = vsel %vm890_vm2, %v876_v41, %v894_v58  ;;  %v819_v13 = vmax.f32 %v733_v44, %v815_v1  ;;  %v895_v14 = vmul.f32 0.2, %v879_v62 }
 0x108   : > { %v813_v5 = vsel %vm805_vm1, %v793_v36, %v809_v56  ;;  %v902_v12 = vmax.f32 %v816_v61, %v898_v9  ;;  %v901_v15 = vsel %vm893_vm3, %v887_v53, %v897_v2  ;;  %vm891_vm5 = vcmp.gt.f32.partialorder %v879_v62, 0.0 }
 0x109   : > { %v817_v16 = vmax.f32 %v731_v60, %v813_v5  ;;  %v899_v24 = vsel %vm891_vm5, %v879_v62, %v895_v14  ;;  %v905_v28 = vmax.f32 %v819_v13, %v901_v15 }
 0x10d   : > { %v1583_v29 = vpop.f32.mrf.mxu0 }
 0x10e   : > { %v1595_v33 = vpop.f32.mrf.mxu1  ;;  %v970_v59 = vadd.f32 %v1583_v29, %v1878_v39  ;;  %v903_v29 = vmax.f32 %v817_v16, %v899_v24 }
 0x10f   : > { %v961_v37 = vpop.f32.mrf.mxu0  ;;  %v1056_v6 = vadd.f32 %v1595_v33, %v1878_v39 }
 0x110   : > { %v1047_v54 = vpop.f32.mrf.mxu1  ;;  %v962_v7 = vadd.f32 %v961_v37, %v1880_v42  ;;  %v982_v10 = vmul.f32 0.2, %v970_v59  ;;  %vm978_vm4 = vcmp.gt.f32.partialorder %v970_v59, 0.0 }
 0x111   : > { %v1584_v49 = vpop.f32.mrf.mxu0  ;;  %v1068_v19 = vmul.f32 0.2, %v1056_v6  ;;  %vm1064_vm7 = vcmp.gt.f32.partialorder %v1056_v6, 0.0  ;;  %v1048_v25 = vadd.f32 %v1047_v54, %v1880_v42 }
 0x112   : > { %v973_v3 = vadd.f32 %v1584_v49, %v1883_v45  ;;  %v1596_v4 = vpop.f32.mrf.mxu1  ;;  %v980_v20 = vmul.f32 0.2, %v962_v7  ;;  %v986_v22 = vsel %vm978_vm4, %v970_v59, %v982_v10  ;;  %vm976_vm8 = vcmp.gt.f32.partialorder %v962_v7, 0.0 }
 0x113   : > { %v964_v63 = vpop.f32.mrf.mxu0  ;;  %v1059_v21 = vadd.f32 %v1596_v4, %v1883_v45  ;;  %v990_v32 = vmax.f32 %v904_v8, %v986_v22  ;;  %v1072_v33 = vsel %vm1064_vm7, %v1056_v6, %v1068_v19  ;;  %v1066_v41 = vmul.f32 0.2, %v1048_v25 }
 0x114   : > { %v965_v11 = vadd.f32 %v964_v63, %v1885_v47  ;;  %v983_v17 = vmul.f32 0.2, %v973_v3  ;;  %v1050_v18 = vpop.f32.mrf.mxu1  ;;  %vm979_vm6 = vcmp.gt.f32.partialorder %v973_v3, 0.0  ;;  %v984_v34 = vsel %vm976_vm8, %v962_v7, %v980_v20 }
 0x115   : > { %v1051_v26 = vadd.f32 %v1050_v18, %v1885_v47  ;;  %v1069_v35 = vmul.f32 0.2, %v1059_v21  ;;  %vm1065_vm10 = vcmp.gt.f32.partialorder %v1059_v21, 0.0  ;;  %vm1062_vm12 = vcmp.gt.f32.partialorder %v1048_v25, 0.0 }
 0x116   : > { %v981_v23 = vmul.f32 0.2, %v965_v11  ;;  %vm977_vm9 = vcmp.gt.f32.partialorder %v965_v11, 0.0  ;;  %v987_v30 = vsel %vm979_vm6, %v973_v3, %v983_v17  ;;  %v988_v49 = vmax.f32 %v902_v12, %v984_v34 }
 0x117   : > { %v991_v43 = vmax.f32 %v905_v28, %v987_v30  ;;  %v1067_v44 = vmul.f32 0.2, %v1051_v26  ;;  %vm1063_vm13 = vcmp.gt.f32.partialorder %v1051_v26, 0.0  ;;  %v1073_v50 = vsel %vm1065_vm10, %v1059_v21, %v1069_v35 }
 0x118   : > { %v985_v37 = vsel %vm977_vm9, %v965_v11, %v981_v23  ;;  %v1076_v55 = vmax.f32 %v990_v32, %v1072_v33  ;;  %v1070_v56 = vsel %vm1062_vm12, %v1048_v25, %v1066_v41 }
 0x119   : > { %v989_v51 = vmax.f32 %v903_v29, %v985_v37  ;;  %v1077_v57 = vmax.f32 %v991_v43, %v1073_v50  ;;  %v1071_v58 = vsel %vm1063_vm13, %v1051_v26, %v1067_v44 }
 0x11b   : > { %v1075_v62 = vmax.f32 %v989_v51, %v1071_v58 }
 0x11d   : > { %v1607_v27 = vpop.f32.mrf.mxu0 }
 0x11e   : > { %v1142_v31 = vadd.f32 %v1607_v27, %v1878_v39 }
 0x11f   : > { %v1133_v36 = vpop.f32.mrf.mxu0 }
 0x120   : > { %v1154_v38 = vmul.f32 0.2, %v1142_v31  ;;  %v1134_v40 = vadd.f32 %v1133_v36, %v1880_v42  ;;  %vm1150_vm11 = vcmp.gt.f32.partialorder %v1142_v31, 0.0 }
 0x121   : > { %v1608_v46 = vpop.f32.mrf.mxu0 }
 0x122   : > { %v1152_v48 = vmul.f32 0.2, %v1134_v40  ;;  %v1145_v39 = vadd.f32 %v1608_v46, %v1883_v45  ;;  %vm1148_vm14 = vcmp.gt.f32.partialorder %v1134_v40, 0.0  ;;  %v1158_v53 = vsel %vm1150_vm11, %v1142_v31, %v1154_v38 }
 0x123   : > { %v1136_v52 = vpop.f32.mrf.mxu0  ;;  %v1074_v45 = vmax.f32 %v988_v49, %v1070_v56  ;;  %v1162_v63 = vmax.f32 %v1076_v55, %v1158_v53 }
 0x124   : > { %vm1151_vm15 = vcmp.gt.f32.partialorder %v1145_v39, 0.0  ;;  %v1155_v54 = vmul.f32 0.2, %v1145_v39  ;;  %v1137_v42 = vadd.f32 %v1136_v52, %v1885_v47  ;;  %v1156_v59 = vsel %vm1148_vm14, %v1134_v40, %v1152_v48 }
 0x125   : > { %v1160_v2 = vmax.f32 %v1074_v45, %v1156_v59 }
 0x126   : > { %v1159_v60 = vsel %vm1151_vm15, %v1145_v39, %v1155_v54  ;;  %vm1149_vm0 = vcmp.gt.f32.partialorder %v1137_v42, 0.0  ;;  %v1153_v61 = vmul.f32 0.2, %v1137_v42 }
 0x127   : > { %v1163_v0 = vmax.f32 %v1077_v57, %v1159_v60 }
 0x128   : > { %v1157_v1 = vsel %vm1149_vm0, %v1137_v42, %v1153_v61 }
 0x129   : > { %v1444_v47 = vpack.c.bf16 %v1163_v0, %v1162_v63  ;;  %v1161_v3 = vmax.f32 %v1075_v62, %v1157_v1 }
 0x12b   : > { %1446 = vst [vmem:[%s324_s29 + $0x8] sm:$0xff] %v1444_v47   ;;  %v1439_v4 = vpack.c.bf16 %v1161_v3, %v1160_v2 }
 0x12d   : > { %1440 = vst [vmem:[%s324_s29] sm:$0xff] %v1439_v4  }
 0x12e PF: > { %s15_s20 = sadd.s32 1, %s1681_s20   ;;  %s1943_s18 = smov %s1677_s19 }
 0x12f   : > { %p12_p5 = scmp.ge.s32.totalorder %s15_s20, 4   ;;  %s1944_s19 = smov %s1946_s21 }
 0x131   :  { %14 = sbr.rel (!%p12_p5) target bundleno = 2 (0x2), region = 92 }

// kernel: _lambda_.16
= control target key start
LH: loop header
LB: loop body
LE: loop exit
PB: predicated region body
PF: predicated region fallthrough
CT: control target
= control target key end

     0   :  { %s689_s15 = smov 0   ;;  %s691_s16 = smov 0   ;;  %s745_s0 = inlined_call_operand.vmem [shape: bf16[2,32,128], index: 0, kind: input, shape index: {}, may-alias: {0,1}]   ;;  %s746_s1 = inlined_call_operand.vmem [shape: bf16[2,32,128], index: 1, kind: input, shape index: {}, may-alias: {0,1}]   ;;  %s747_s2 = inlined_call_operand.vmem [shape: f32[2,32,1], index: 2, kind: input, shape index: {}]   ;;  %s748_s3 = inlined_call_operand.vmem [shape: f32[2,1,32], index: 3, kind: input, shape index: {}]   ;;  %s749_s4 = inlined_call_operand.vmem [shape: bf16[2,32,32], index: 4, kind: output, shape index: {}]  }
   0x1   :  { %s693_s17 = smov 0  }
   0x2 LB: > { %s26_s18 = sadd.s32 1, %s657_s16  ;;  %p568_p0 = scmp.ge.s32.totalorder %s661_s17, 1  ;;  %s661_s17 = sphi %s693_s17, %s14_s17   ;;  %s657_s16 = sphi %s691_s16, %s751_s16   ;;  %s653_s15 = sphi %s689_s15, %s750_s15  }
   0x3   : > { %p28_p1 = scmp.ge.s32.totalorder %s26_s18, 2  ;;  %p216_p2 = scmp.lt.s32.totalorder %s661_s17, 3 }
   0x5   : > { %s753_s18 = smov (%p28_p1, %s26_s18), 0  ;;  %p217_p3 = pnand %p568_p0, %p216_p2 }
   0x6   : > { %p265_p4 = scmp.lt.s32.totalorder (!%p217_p3), %s653_s15, 1 }
   0x7   : > { %220 = sbr.rel (%p217_p3) target bundleno = 240 (0xf0), region = 36 }
   0xc   : > { %v663_v0 = vmov 0   ;;  %s755_s15 = smov (!%p265_p4, %s653_s15), 1  ;;  %vm440_vm0 = vcmask 257024  }
   0xd   : > { %634 = vset.pattern.permute.xlu1 %v663_v0  ;;  %633 = vset.pattern.permute.xlu0 %v663_v0  ;;  %s710_s19 = sshll.u32 %s755_s15, 4  ;;  %s590_s20 = sshll.u32 %s755_s15, 5 }
   0xe   : > { %s278_s23 = scalar_lea.vmem %s746_s1, %s710_s19  ;;  %s269_s26 = scalar_lea.vmem %s745_s0, %s710_s19 }
   0xf   : > { %v635_v1 = vld [vmem:[%s278_s23 + $0x8] sm:$0xff]   ;;  %v636_v2 = vld [vmem:[%s278_s23] sm:$0xff]   ;;  %s284_s29 = scalar_lea.vmem %s747_s2, %s590_s20  ;;  %s290_s6 = scalar_lea.vmem %s748_s3, %s755_s15 }
  0x10   : > { %600 = vmatprep.subr.bf16.mxu0 %v635_v1  ;;  %v637_v3 = vld [vmem:[%s269_s26] sm:$0xff]   ;;  %v387_v4 = vld [vmem:[%s284_s29 + $0x10] sm:$0xff]  ;;  %v388_v6 = vld [vmem:[%s284_s29 + $0x18] sm:$0xff]  ;;  %s298_s9 = scalar_lea.vmem %s749_s4, %s710_s19 }
  0x11   : > { %601 = vmatpush3.bf16.xpose.msra.mxu0 %v635_v1  ;;  %604 = vmatprep.mubr.bf16.mxu0 %v637_v3  ;;  %v385_v5 = vld [vmem:[%s284_s29] sm:$0xff]  ;;  %v386_v7 = vld [vmem:[%s284_s29 + $0x8] sm:$0xff] }
  0x12   : > { %602 = vmatprep.subr.bf16.mxu0 %v636_v2  ;;  %401 = vperm.xlu1 %634, %v387_v4   ;;  %v638_v8 = vld [vmem:[%s269_s26 + $0x8] sm:$0xff]   ;;  %v581_v13 = vld [vmem:[%s290_s6] ss:$0 sm:$0xff] }
  0x13   : > { %391 = vperm.xlu0 %633, %v385_v5  }
  0x16   : > { %406 = vperm.xlu1 %634, %v388_v6  }
  0x17   : > { %396 = vperm.xlu0 %633, %v386_v7  }
  0x19   : > { %603 = vmatpush3.bf16.xpose.msra.mxu0 %v636_v2 }
  0x20   : > { %605 = vmatmul.mubr.bf16.vlgmr.msra.gmra.mxu0 %v638_v8 }
  0x8d   : > { %v402_v9 = vpop.permute.xlu1 %401 }
  0x8e   : > { %v392_v12 = vpop.permute.xlu0 %391 }
  0x91   : > { %v407_v21 = vpop.permute.xlu1 %406 }
  0x92   : > { %v397_v27 = vpop.permute.xlu0 %396 }
  0xe0   : > { %v606_v10 = vpop.f32.mrf.mxu0 }
  0xe1   : > { %v383_v11 = vmul.f32 2.0, %v606_v10 }
  0xe2   : > { %v366_v14 = vpop.f32.mrf.mxu0 }
  0xe3   : > { %v411_v15 = vsub.f32 %v383_v11, %v402_v9  ;;  %v381_v16 = vmul.f32 2.0, %v366_v14 }
  0xe4   : > { %v607_v17 = vpop.f32.mrf.mxu0 }
  0xe5   : > { %v422_v18 = vsub.f32 %v411_v15, %v581_v13  ;;  %v409_v19 = vsub.f32 %v381_v16, %v392_v12  ;;  %v384_v20 = vmul.f32 2.0, %v607_v17 }
  0xe6   : > { %v369_v22 = vpop.f32.mrf.mxu0 }
  0xe7   : > { %v594_v23 = vpack.c.bf16 %v422_v18, %v422_v18  ;;  %v420_v24 = vsub.f32 %v409_v19, %v581_v13  ;;  %v412_v25 = vsub.f32 %v384_v20, %v407_v21  ;;  %v382_v26 = vmul.f32 2.0, %v369_v22 }
  0xe9   : > { %443 = vst.msk [vmem:[%s298_s9 + $0x8] sm:$0xf] %vm440_vm0, %v594_v23  ;;  %v592_v28 = vpack.c.bf16 %v420_v24, %v420_v24  ;;  %v423_v29 = vsub.f32 %v412_v25, %v581_v13  ;;  %v410_v30 = vsub.f32 %v382_v26, %v397_v27 }
  0xeb   : > { %441 = vst.msk [vmem:[%s298_s9] sm:$0xf] %vm440_vm0, %v592_v28  ;;  %v595_v31 = vpack.c.bf16 %v423_v29, %v423_v29  ;;  %v421_v32 = vsub.f32 %v410_v30, %v581_v13 }
  0xed   : > { %444 = vst.msk [vmem:[%s298_s9 + $0xc] sm:$0xf] %vm440_vm0, %v595_v31  ;;  %v593_v33 = vpack.c.bf16 %v421_v32, %v421_v32 }
  0xef   : > { %442 = vst.msk [vmem:[%s298_s9 + $0x4] sm:$0xf] %vm440_vm0, %v593_v33 }
  0xf0 PF: > { %s14_s17 = sadd.s32 1, %s661_s17   ;;  %s750_s15 = smov %s657_s16 }
  0xf1   : > { %p11_p5 = scmp.ge.s32.totalorder %s14_s17, 4   ;;  %s751_s16 = smov %s753_s18 }
  0xf3   :  { %13 = sbr.rel (!%p11_p5) target bundleno = 2 (0x2), region = 75 }

// kernel: _lambda_.17
= control target key start
LH: loop header
LB: loop body
LE: loop exit
PB: predicated region body
PF: predicated region fallthrough
CT: control target
= control target key end

     0   :  { %s1888_s18 = smov 0   ;;  %s1890_s19 = smov 0   ;;  %s2497_s0 = inlined_call_operand.vmem [shape: bf16[2,8,32,128], index: 0, kind: input, shape index: {}]   ;;  %s2498_s1 = inlined_call_operand.vmem [shape: bf16[2,32,128], index: 1, kind: input, shape index: {}]   ;;  %s2499_s2 = inlined_call_operand.vmem [shape: bf16[128,256], index: 2, kind: input, shape index: {}]   ;;  %s2500_s3 = inlined_call_operand.vmem [shape: bf16[128,256], index: 3, kind: input, shape index: {}]   ;;  %s2501_s4 = inlined_call_operand.vmem [shape: f32[1,256], index: 4, kind: input, shape index: {}]   ;;  %s2502_s5 = inlined_call_operand.vmem [shape: bf16[2,32,256], index: 5, kind: output, shape index: {}]  }
   0x1   :  { %s1892_s20 = smov 0  }
   0x2 LB: > { %s34_s21 = sadd.s32 1, %s1851_s19  ;;  %p1620_p0 = scmp.ge.s32.totalorder %s1855_s20, 1  ;;  %s1855_s20 = sphi %s1892_s20, %s15_s20   ;;  %s1851_s19 = sphi %s1890_s19, %s2504_s19   ;;  %s1847_s18 = sphi %s1888_s18, %s2503_s18  }
   0x3   : > { %p36_p1 = scmp.ge.s32.totalorder %s34_s21, 2  ;;  %p240_p2 = scmp.lt.s32.totalorder %s1855_s20, 3 }
   0x5   : > { %s2506_s21 = smov (%p36_p1, %s34_s21), 0  ;;  %p241_p3 = pnand %p1620_p0, %p240_p2 }
   0x6   : > { %p293_p4 = scmp.lt.s32.totalorder (!%p241_p3), %s1847_s18, 1 }
   0x7   : > { %244 = sbr.rel (%p241_p3) target bundleno = 385 (0x181), region = 40 }
   0xc   : > { %v1767_v0 = vld [vmem:[%s2500_s3 + $0x74] ss:$8 sps:$4 sm:$0xff]   ;;  %v1857_v2 = vmov 0   ;;  %v1771_v3 = vld [vmem:[%s2500_s3 + $0x70] ss:$8 sps:$4 sm:$0xff]   ;;  %s2508_s18 = smov (!%p293_p4, %s1847_s18), 1 }
   0xd   : > { %v1914_v1 = vld [vmem:[%s2499_s2 + $0x74] ss:$8 sps:$4 sm:$0xff]   ;;  %489 = vmatprep.mubr.bf16.mxu0 %v1857_v2  ;;  %670 = vmatprep.mubr.bf16.mxu1 %v1857_v2  ;;  %v1924_v4 = vld [vmem:[%s2499_s2 + $0x70] ss:$8 sps:$4 sm:$0xff]   ;;  %v1773_v5 = vld [vmem:[%s2500_s3 + $0x64] ss:$8 sps:$4 sm:$0xff]  }
   0xe   : > { %457 = vmatprep.subr.bf16.mxu0 %v1767_v0  ;;  %638 = vmatprep.subr.bf16.mxu1 %v1914_v1  ;;  %v1934_v6 = vld [vmem:[%s2499_s2 + $0x64] ss:$8 sps:$4 sm:$0xff]   ;;  %v1777_v7 = vld [vmem:[%s2500_s3 + $0x60] ss:$8 sps:$4 sm:$0xff]   ;;  %v1779_v9 = vld [vmem:[%s2500_s3 + $0x54] ss:$8 sps:$4 sm:$0xff]  }
   0xf   : > { %458 = vmatpush1.bf16.msra.mxu0 %v1771_v3  ;;  %639 = vmatpush1.bf16.msra.mxu1 %v1924_v4  ;;  %v1942_v8 = vld [vmem:[%s2499_s2 + $0x60] ss:$8 sps:$4 sm:$0xff]   ;;  %v1951_v10 = vld [vmem:[%s2499_s2 + $0x54] ss:$8 sps:$4 sm:$0xff]   ;;  %v1783_v11 = vld [vmem:[%s2500_s3 + $0x50] ss:$8 sps:$4 sm:$0xff]  }
  0x10   : > { %459 = vmatprep.subr.bf16.mxu0 %v1773_v5  ;;  %640 = vmatprep.subr.bf16.mxu1 %v1934_v6  ;;  %v1959_v12 = vld [vmem:[%s2499_s2 + $0x50] ss:$8 sps:$4 sm:$0xff]   ;;  %v1785_v13 = vld [vmem:[%s2500_s3 + $0x44] ss:$8 sps:$4 sm:$0xff]   ;;  %v1789_v15 = vld [vmem:[%s2500_s3 + $0x40] ss:$8 sps:$4 sm:$0xff]  }
  0x11   : > { %v1969_v14 = vld [vmem:[%s2499_s2 + $0x44] ss:$8 sps:$4 sm:$0xff]   ;;  %v1979_v16 = vld [vmem:[%s2499_s2 + $0x40] ss:$8 sps:$4 sm:$0xff]   ;;  %v1791_v17 = vld [vmem:[%s2500_s3 + $0x34] ss:$8 sps:$4 sm:$0xff]  }
  0x12   : > { %v1988_v18 = vld [vmem:[%s2499_s2 + $0x34] ss:$8 sps:$4 sm:$0xff]   ;;  %v1795_v19 = vld [vmem:[%s2500_s3 + $0x30] ss:$8 sps:$4 sm:$0xff]   ;;  %v1797_v21 = vld [vmem:[%s2500_s3 + $0x24] ss:$8 sps:$4 sm:$0xff]  }
  0x13   : > { %460 = vmatpush1.bf16.msra.mxu0 %v1777_v7  ;;  %641 = vmatpush1.bf16.msra.mxu1 %v1942_v8  ;;  %v1999_v20 = vld [vmem:[%s2499_s2 + $0x30] ss:$8 sps:$4 sm:$0xff]   ;;  %v2009_v22 = vld [vmem:[%s2499_s2 + $0x24] ss:$8 sps:$4 sm:$0xff]   ;;  %s1716_s24 = sshll.u32 %s2508_s18, 4  ;;  %s1715_s25 = sshll.u32 %s2508_s18, 7 }
  0x14   : > { %461 = vmatprep.subr.bf16.mxu0 %v1779_v9  ;;  %642 = vmatprep.subr.bf16.mxu1 %v1951_v10  ;;  %v1801_v23 = vld [vmem:[%s2500_s3 + $0x20] ss:$8 sps:$4 sm:$0xff]   ;;  %v1803_v25 = vld [vmem:[%s2500_s3 + $0x14] ss:$8 sps:$4 sm:$0xff]   ;;  %s2028_s9 = scalar_lea.vmem %s2498_s1, %s1716_s24  ;;  %s2039_s14 = scalar_lea.vmem %s2497_s0, %s1715_s25  ;;  %v1807_v27 = vld [vmem:[%s2500_s3 + $0x10] ss:$8 sps:$4 sm:$0xff]  }
  0x15   : > { %v2020_v24 = vld [vmem:[%s2499_s2 + $0x20] ss:$8 sps:$4 sm:$0xff]   ;;  %v2034_v26 = vld [vmem:[%s2499_s2 + $0x14] ss:$8 sps:$4 sm:$0xff]   ;;  %v2047_v28 = vld [vmem:[%s2499_s2 + $0x10] ss:$8 sps:$4 sm:$0xff]  }
  0x16   : > { %v1809_v29 = vld [vmem:[%s2500_s3 + $0x4] ss:$8 sps:$4 sm:$0xff]   ;;  %v1813_v31 = vld [vmem:[%s2500_s3] ss:$8 sps:$4 sm:$0xff]   ;;  %v1819_v37 = vld [vmem:[%s2039_s14 + $0x10] sm:$0xff]   ;;  %s1717_s8 = sshll.u32 %s2508_s18, 5 }
  0x17   : > { %462 = vmatpush1.bf16.msra.mxu0 %v1783_v11  ;;  %643 = vmatpush1.bf16.msra.mxu1 %v1959_v12  ;;  %v2057_v30 = vld [vmem:[%s2499_s2 + $0x4] ss:$8 sps:$4 sm:$0xff]   ;;  %v2066_v32 = vld [vmem:[%s2499_s2] ss:$8 sps:$4 sm:$0xff]   ;;  %v1821_v39 = vld [vmem:[%s2039_s14 + $0x18] sm:$0xff]   ;;  %s326_s18 = scalar_lea.vmem %s2502_s5, %s1717_s8 }
  0x18   : > { %463 = vmatprep.subr.bf16.mxu0 %v1785_v13  ;;  %644 = vmatprep.subr.bf16.mxu1 %v1969_v14  ;;  %v1815_v33 = vld [vmem:[%s2028_s9] sm:$0xff]   ;;  %v1817_v35 = vld [vmem:[%s2028_s9 + $0x8] sm:$0xff]   ;;  %v1823_v41 = vld [vmem:[%s2039_s14 + $0x30] sm:$0xff]  }
  0x19   : > { %v1816_v34 = vld [vmem:[%s2039_s14] sm:$0xff]   ;;  %v1818_v36 = vld [vmem:[%s2039_s14 + $0x8] sm:$0xff]   ;;  %v1825_v43 = vld [vmem:[%s2039_s14 + $0x38] sm:$0xff]  }
  0x1a   : > { %v1820_v38 = vld [vmem:[%s2039_s14 + $0x20] sm:$0xff]   ;;  %v1822_v40 = vld [vmem:[%s2039_s14 + $0x28] sm:$0xff]   ;;  %v1827_v45 = vld [vmem:[%s2039_s14 + $0x50] sm:$0xff]  }
  0x1b   : > { %464 = vmatpush1.bf16.msra.mxu0 %v1789_v15  ;;  %645 = vmatpush1.bf16.msra.mxu1 %v1979_v16  ;;  %v1824_v42 = vld [vmem:[%s2039_s14 + $0x40] sm:$0xff]   ;;  %v1826_v44 = vld [vmem:[%s2039_s14 + $0x48] sm:$0xff]   ;;  %v1829_v47 = vld [vmem:[%s2039_s14 + $0x58] sm:$0xff]  }
  0x1c   : > { %465 = vmatprep.subr.bf16.mxu0 %v1791_v17  ;;  %646 = vmatprep.subr.bf16.mxu1 %v1988_v18  ;;  %v1828_v46 = vld [vmem:[%s2039_s14 + $0x60] sm:$0xff]   ;;  %v1830_v48 = vld [vmem:[%s2039_s14 + $0x68] sm:$0xff]   ;;  %v1831_v49 = vld [vmem:[%s2039_s14 + $0x70] sm:$0xff]  }
  0x1d   : > { %v1832_v50 = vld [vmem:[%s2039_s14 + $0x78] sm:$0xff]   ;;  %v353_v15 = vld [vmem:[%s2501_s4] sm:$0x3] }
  0x1f   : > { %466 = vmatpush1.bf16.msra.mxu0 %v1795_v19  ;;  %647 = vmatpush1.bf16.msra.mxu1 %v1999_v20 }
  0x20   : > { %467 = vmatprep.subr.bf16.mxu0 %v1797_v21  ;;  %648 = vmatprep.subr.bf16.mxu1 %v2009_v22 }
  0x23   : > { %468 = vmatpush1.bf16.msra.mxu0 %v1801_v23  ;;  %649 = vmatpush1.bf16.msra.mxu1 %v2020_v24 }
  0x24   : > { %469 = vmatprep.subr.bf16.mxu0 %v1803_v25  ;;  %650 = vmatprep.subr.bf16.mxu1 %v2034_v26 }
  0x27   : > { %470 = vmatpush1.bf16.msra.mxu0 %v1807_v27  ;;  %651 = vmatpush1.bf16.msra.mxu1 %v2047_v28 }
  0x28   : > { %471 = vmatprep.subr.bf16.mxu0 %v1809_v29  ;;  %652 = vmatprep.subr.bf16.mxu1 %v2057_v30 }
  0x2b   : > { %472 = vmatpush1.bf16.msra.mxu0 %v1813_v31  ;;  %653 = vmatpush1.bf16.msra.mxu1 %v2066_v32 }
  0x2c   : > { %732 = vmatprep.subr.bf16.mxu0 %v1914_v1  ;;  %834 = vmatprep.subr.bf16.mxu1 %v1914_v1 }
  0x2e   : > { %490 = vmatmul.mubr.bf16.vlgmr.msra.gmra.mxu0 %v1815_v33  ;;  %671 = vmatmul.mubr.bf16.vlgmr.msra.gmra.mxu1 %v1816_v34 }
  0x2f   : > { %733 = vmatpush1.bf16.msra.mxu0 %v1924_v4  ;;  %835 = vmatpush1.bf16.msra.mxu1 %v1924_v4 }
  0x30   : > { %734 = vmatprep.subr.bf16.mxu0 %v1934_v6  ;;  %836 = vmatprep.subr.bf16.mxu1 %v1934_v6 }
  0x31   : > { %499 = vmatprep.mubr.bf16.mxu0 %v1857_v2  ;;  %680 = vmatprep.mubr.bf16.mxu1 %v1857_v2 }
  0x33   : > { %735 = vmatpush1.bf16.msra.mxu0 %v1942_v8  ;;  %837 = vmatpush1.bf16.msra.mxu1 %v1942_v8 }
  0x34   : > { %736 = vmatprep.subr.bf16.mxu0 %v1951_v10  ;;  %838 = vmatprep.subr.bf16.mxu1 %v1951_v10 }
  0x36   : > { %500 = vmatmul.mubr.bf16.gmra.mxu0 %v1817_v35  ;;  %681 = vmatmul.mubr.bf16.gmra.mxu1 %v1818_v36 }
  0x37   : > { %737 = vmatpush1.bf16.msra.mxu0 %v1959_v12  ;;  %839 = vmatpush1.bf16.msra.mxu1 %v1959_v12 }
  0x38   : > { %738 = vmatprep.subr.bf16.mxu0 %v1969_v14  ;;  %840 = vmatprep.subr.bf16.mxu1 %v1969_v14 }
  0x39   : > { %764 = vmatprep.mubr.bf16.mxu0 %v1857_v2  ;;  %866 = vmatprep.mubr.bf16.mxu1 %v1857_v2 }
  0x3b   : > { %739 = vmatpush1.bf16.msra.mxu0 %v1979_v16  ;;  %841 = vmatpush1.bf16.msra.mxu1 %v1979_v16 }
  0x3c   : > { %740 = vmatprep.subr.bf16.mxu0 %v1988_v18  ;;  %842 = vmatprep.subr.bf16.mxu1 %v1988_v18 }
  0x3f   : > { %741 = vmatpush1.bf16.msra.mxu0 %v1999_v20  ;;  %843 = vmatpush1.bf16.msra.mxu1 %v1999_v20 }
  0x40   : > { %742 = vmatprep.subr.bf16.mxu0 %v2009_v22  ;;  %844 = vmatprep.subr.bf16.mxu1 %v2009_v22 }
  0x43   : > { %743 = vmatpush1.bf16.msra.mxu0 %v2020_v24  ;;  %845 = vmatpush1.bf16.msra.mxu1 %v2020_v24 }
  0x44   : > { %744 = vmatprep.subr.bf16.mxu0 %v2034_v26  ;;  %846 = vmatprep.subr.bf16.mxu1 %v2034_v26 }
  0x47   : > { %745 = vmatpush1.bf16.msra.mxu0 %v2047_v28  ;;  %847 = vmatpush1.bf16.msra.mxu1 %v2047_v28 }
  0x48   : > { %746 = vmatprep.subr.bf16.mxu0 %v2057_v30  ;;  %848 = vmatprep.subr.bf16.mxu1 %v2057_v30 }
  0x4b   : > { %747 = vmatpush1.bf16.msra.mxu0 %v2066_v32  ;;  %849 = vmatpush1.bf16.msra.mxu1 %v2066_v32 }
  0x4c   : > { %936 = vmatprep.subr.bf16.mxu0 %v1914_v1  ;;  %1038 = vmatprep.subr.bf16.mxu1 %v1914_v1 }
  0x4e   : > { %765 = vmatmul.mubr.bf16.vlgmr.msra.gmra.mxu0 %v1819_v37  ;;  %867 = vmatmul.mubr.bf16.vlgmr.msra.gmra.mxu1 %v1820_v38 }
  0x4f   : > { %937 = vmatpush1.bf16.msra.mxu0 %v1924_v4  ;;  %1039 = vmatpush1.bf16.msra.mxu1 %v1924_v4 }
  0x50   : > { %938 = vmatprep.subr.bf16.mxu0 %v1934_v6  ;;  %1040 = vmatprep.subr.bf16.mxu1 %v1934_v6 }
  0x51   : > { %774 = vmatprep.mubr.bf16.mxu0 %v1857_v2  ;;  %876 = vmatprep.mubr.bf16.mxu1 %v1857_v2 }
  0x53   : > { %939 = vmatpush1.bf16.msra.mxu0 %v1942_v8  ;;  %1041 = vmatpush1.bf16.msra.mxu1 %v1942_v8 }
  0x54   : > { %940 = vmatprep.subr.bf16.mxu0 %v1951_v10  ;;  %1042 = vmatprep.subr.bf16.mxu1 %v1951_v10 }
  0x56   : > { %775 = vmatmul.mubr.bf16.gmra.mxu0 %v1821_v39  ;;  %877 = vmatmul.mubr.bf16.gmra.mxu1 %v1822_v40 }
  0x57   : > { %941 = vmatpush1.bf16.msra.mxu0 %v1959_v12  ;;  %1043 = vmatpush1.bf16.msra.mxu1 %v1959_v12 }
  0x58   : > { %942 = vmatprep.subr.bf16.mxu0 %v1969_v14  ;;  %1044 = vmatprep.subr.bf16.mxu1 %v1969_v14 }
  0x59   : > { %968 = vmatprep.mubr.bf16.mxu0 %v1857_v2  ;;  %1070 = vmatprep.mubr.bf16.mxu1 %v1857_v2 }
  0x5b   : > { %943 = vmatpush1.bf16.msra.mxu0 %v1979_v16  ;;  %1045 = vmatpush1.bf16.msra.mxu1 %v1979_v16 }
  0x5c   : > { %944 = vmatprep.subr.bf16.mxu0 %v1988_v18  ;;  %1046 = vmatprep.subr.bf16.mxu1 %v1988_v18 }
  0x5f   : > { %945 = vmatpush1.bf16.msra.mxu0 %v1999_v20  ;;  %1047 = vmatpush1.bf16.msra.mxu1 %v1999_v20 }
  0x60   : > { %946 = vmatprep.subr.bf16.mxu0 %v2009_v22  ;;  %1048 = vmatprep.subr.bf16.mxu1 %v2009_v22 }
  0x63   : > { %947 = vmatpush1.bf16.msra.mxu0 %v2020_v24  ;;  %1049 = vmatpush1.bf16.msra.mxu1 %v2020_v24 }
  0x64   : > { %948 = vmatprep.subr.bf16.mxu0 %v2034_v26  ;;  %1050 = vmatprep.subr.bf16.mxu1 %v2034_v26 }
  0x67   : > { %949 = vmatpush1.bf16.msra.mxu0 %v2047_v28  ;;  %1051 = vmatpush1.bf16.msra.mxu1 %v2047_v28 }
  0x68   : > { %950 = vmatprep.subr.bf16.mxu0 %v2057_v30  ;;  %1052 = vmatprep.subr.bf16.mxu1 %v2057_v30 }
  0x6b   : > { %951 = vmatpush1.bf16.msra.mxu0 %v2066_v32  ;;  %1053 = vmatpush1.bf16.msra.mxu1 %v2066_v32 }
  0x6c   : > { %1140 = vmatprep.subr.bf16.mxu0 %v1914_v1  ;;  %1242 = vmatprep.subr.bf16.mxu1 %v1914_v1 }
  0x6e   : > { %969 = vmatmul.mubr.bf16.vlgmr.msra.gmra.mxu0 %v1823_v41  ;;  %1071 = vmatmul.mubr.bf16.vlgmr.msra.gmra.mxu1 %v1824_v42 }
  0x6f   : > { %1141 = vmatpush1.bf16.msra.mxu0 %v1924_v4  ;;  %1243 = vmatpush1.bf16.msra.mxu1 %v1924_v4 }
  0x70   : > { %1142 = vmatprep.subr.bf16.mxu0 %v1934_v6  ;;  %1244 = vmatprep.subr.bf16.mxu1 %v1934_v6 }
  0x71   : > { %978 = vmatprep.mubr.bf16.mxu0 %v1857_v2  ;;  %1080 = vmatprep.mubr.bf16.mxu1 %v1857_v2 }
  0x73   : > { %1143 = vmatpush1.bf16.msra.mxu0 %v1942_v8  ;;  %1245 = vmatpush1.bf16.msra.mxu1 %v1942_v8 }
  0x74   : > { %1144 = vmatprep.subr.bf16.mxu0 %v1951_v10  ;;  %1246 = vmatprep.subr.bf16.mxu1 %v1951_v10 }
  0x76   : > { %979 = vmatmul.mubr.bf16.gmra.mxu0 %v1825_v43  ;;  %1081 = vmatmul.mubr.bf16.gmra.mxu1 %v1826_v44 }
  0x77   : > { %1145 = vmatpush1.bf16.msra.mxu0 %v1959_v12  ;;  %1247 = vmatpush1.bf16.msra.mxu1 %v1959_v12 }
  0x78   : > { %1146 = vmatprep.subr.bf16.mxu0 %v1969_v14  ;;  %1248 = vmatprep.subr.bf16.mxu1 %v1969_v14 }
  0x79   : > { %1172 = vmatprep.mubr.bf16.mxu0 %v1857_v2  ;;  %1274 = vmatprep.mubr.bf16.mxu1 %v1857_v2 }
  0x7b   : > { %1147 = vmatpush1.bf16.msra.mxu0 %v1979_v16  ;;  %1249 = vmatpush1.bf16.msra.mxu1 %v1979_v16 }
  0x7c   : > { %1148 = vmatprep.subr.bf16.mxu0 %v1988_v18  ;;  %1250 = vmatprep.subr.bf16.mxu1 %v1988_v18 }
  0x7f   : > { %1149 = vmatpush1.bf16.msra.mxu0 %v1999_v20  ;;  %1251 = vmatpush1.bf16.msra.mxu1 %v1999_v20 }
  0x80   : > { %1150 = vmatprep.subr.bf16.mxu0 %v2009_v22  ;;  %1252 = vmatprep.subr.bf16.mxu1 %v2009_v22 }
  0x83   : > { %1151 = vmatpush1.bf16.msra.mxu0 %v2020_v24  ;;  %1253 = vmatpush1.bf16.msra.mxu1 %v2020_v24 }
  0x84   : > { %1152 = vmatprep.subr.bf16.mxu0 %v2034_v26  ;;  %1254 = vmatprep.subr.bf16.mxu1 %v2034_v26 }
  0x87   : > { %1153 = vmatpush1.bf16.msra.mxu0 %v2047_v28  ;;  %1255 = vmatpush1.bf16.msra.mxu1 %v2047_v28 }
  0x88   : > { %1154 = vmatprep.subr.bf16.mxu0 %v2057_v30  ;;  %1256 = vmatprep.subr.bf16.mxu1 %v2057_v30 }
  0x8b   : > { %1155 = vmatpush1.bf16.msra.mxu0 %v2066_v32  ;;  %1257 = vmatpush1.bf16.msra.mxu1 %v2066_v32 }
  0x8c   : > { %1344 = vmatprep.subr.bf16.mxu0 %v1914_v1  ;;  %1726 = vmatprep.subr.bf16.mxu1 %v1914_v1 }
  0x8e   : > { %1173 = vmatmul.mubr.bf16.vlgmr.msra.gmra.mxu0 %v1827_v45  ;;  %1275 = vmatmul.mubr.bf16.vlgmr.msra.gmra.mxu1 %v1828_v46 }
  0x8f   : > { %1345 = vmatpush1.bf16.msra.mxu0 %v1924_v4  ;;  %1734 = vmatpush1.bf16.msra.mxu1 %v1924_v4 }
  0x90   : > { %1346 = vmatprep.subr.bf16.mxu0 %v1934_v6  ;;  %1727 = vmatprep.subr.bf16.mxu1 %v1934_v6  ;;  %v355_v6 = vlaneseq }
  0x91   : > { %1182 = vmatprep.mubr.bf16.mxu0 %v1857_v2  ;;  %1284 = vmatprep.mubr.bf16.mxu1 %v1857_v2 }
  0x92   : > { %v356_v9 = vshrl.u32 %v355_v6, 7 }
  0x93   : > { %1347 = vmatpush1.bf16.msra.mxu0 %v1942_v8  ;;  %1735 = vmatpush1.bf16.msra.mxu1 %v1942_v8 }
  0x94   : > { %1348 = vmatprep.subr.bf16.mxu0 %v1951_v10  ;;  %1728 = vmatprep.subr.bf16.mxu1 %v1951_v10  ;;  %v361_v13 = vsub.s32 1, %v356_v9 }
  0x96   : > { %1183 = vmatmul.mubr.bf16.gmra.mxu0 %v1829_v47  ;;  %1285 = vmatmul.mubr.bf16.gmra.mxu1 %v1830_v48 }
  0x97   : > { %1349 = vmatpush1.bf16.msra.mxu0 %v1959_v12  ;;  %1736 = vmatpush1.bf16.msra.mxu1 %v1959_v12  ;;  %v357_v12 = vsub.s32 0, %v356_v9 }
  0x98   : > { %1350 = vmatprep.subr.bf16.mxu0 %v1969_v14  ;;  %1729 = vmatprep.subr.bf16.mxu1 %v1969_v14 }
  0x99   : > { %1376 = vmatprep.mubr.bf16.mxu0 %v1857_v2  ;;  %1386 = vmatprep.mubr.bf16.mxu1 %v1857_v2  ;;  %v358_v17 = vrot.slane %v353_v15, %v357_v12 }
  0x9b   : > { %1351 = vmatpush1.bf16.msra.mxu0 %v1979_v16  ;;  %1737 = vmatpush1.bf16.msra.mxu1 %v1979_v16 }
  0x9c   : > { %1352 = vmatprep.subr.bf16.mxu0 %v1988_v18  ;;  %1730 = vmatprep.subr.bf16.mxu1 %v1988_v18  ;;  %v362_v18 = vrot.slane %v353_v15, %v361_v13 }
  0x9f   : > { %1353 = vmatpush1.bf16.msra.mxu0 %v1999_v20  ;;  %1738 = vmatpush1.bf16.msra.mxu1 %v1999_v20 }
  0xa0   : > { %1354 = vmatprep.subr.bf16.mxu0 %v2009_v22  ;;  %1731 = vmatprep.subr.bf16.mxu1 %v2009_v22 }
  0xa3   : > { %1355 = vmatpush1.bf16.msra.mxu0 %v2020_v24  ;;  %1739 = vmatpush1.bf16.msra.mxu1 %v2020_v24 }
  0xa4   : > { %1356 = vmatprep.subr.bf16.mxu0 %v2034_v26  ;;  %1732 = vmatprep.subr.bf16.mxu1 %v2034_v26 }
  0xa7   : > { %1357 = vmatpush1.bf16.msra.mxu0 %v2047_v28  ;;  %1740 = vmatpush1.bf16.msra.mxu1 %v2047_v28 }
  0xa8   : > { %1358 = vmatprep.subr.bf16.mxu0 %v2057_v30  ;;  %1733 = vmatprep.subr.bf16.mxu1 %v2057_v30 }
  0xab   : > { %1359 = vmatpush1.bf16.msra.mxu0 %v2066_v32  ;;  %1741 = vmatpush1.bf16.msra.mxu1 %v2066_v32 }
  0xae   : > { %1377 = vmatmul.mubr.bf16.vlgmr.msra.gmra.mxu0 %v1831_v49  ;;  %1387 = vmatmul.mubr.bf16.vlgmr.msra.gmra.mxu1 %v1832_v50 }
  0xee   : > { %v491_v51 = vpop.f32.mrf.mxu0  ;;  %v672_v52 = vpop.f32.mrf.mxu1 }
  0xef   : > { %v2249_v21 = vadd.f32 %v491_v51, %v358_v17 }
  0xf0   : > { %v493_v53 = vpop.f32.mrf.mxu0  ;;  %v674_v54 = vpop.f32.mrf.mxu1 }
  0xf1   : > { %v2251_v22 = vadd.f32 %v493_v53, %v362_v18  ;;  %v673_v28 = vadd.f32 %v672_v52, %v2249_v21 }
  0xf2   : > { %v495_v55 = vpop.f32.mrf.mxu0  ;;  %v676_v56 = vpop.f32.mrf.mxu1 }
  0xf3   : > { %v2255_v24 = vadd.f32 %v495_v55, %v358_v17  ;;  %v675_v29 = vadd.f32 %v674_v54, %v2251_v22  ;;  %vm691_vm0 = vcmp.gt.f32.partialorder %v673_v28, 0.0  ;;  %v699_v37 = vmul.f32 0.2, %v673_v28 }
  0xf4   : > { %v497_v57 = vpop.f32.mrf.mxu0  ;;  %v678_v58 = vpop.f32.mrf.mxu1 }
  0xf5   : > { %v2257_v25 = vadd.f32 %v497_v57, %v362_v18  ;;  %v677_v31 = vadd.f32 %v676_v56, %v2255_v24  ;;  %vm692_vm1 = vcmp.gt.f32.partialorder %v675_v29, 0.0  ;;  %v700_v38 = vmul.f32 0.2, %v675_v29 }
  0xf6   : > { %v501_v59 = vpop.f32.mrf.mxu0  ;;  %v682_v60 = vpop.f32.mrf.mxu1  ;;  %v707_v51 = vsel %vm691_vm0, %v673_v28, %v699_v37 }
  0xf7   : > { %v2259_v26 = vadd.f32 %v501_v59, %v358_v17  ;;  %v679_v32 = vadd.f32 %v678_v58, %v2257_v25  ;;  %vm693_vm2 = vcmp.gt.f32.partialorder %v677_v31, 0.0  ;;  %v701_v40 = vmul.f32 0.2, %v677_v31 }
  0xf8   : > { %v503_v61 = vpop.f32.mrf.mxu0  ;;  %v684_v62 = vpop.f32.mrf.mxu1  ;;  %v2290_v52 = vsel %vm692_vm1, %v675_v29, %v700_v38 }
  0xf9   : > { %v2269_v33 = vadd.f32 %v503_v61, %v362_v18  ;;  %v683_v34 = vadd.f32 %v682_v60, %v2259_v26  ;;  %vm694_vm3 = vcmp.gt.f32.partialorder %v679_v32, 0.0  ;;  %v702_v44 = vmul.f32 0.2, %v679_v32 }
  0xfa   : > { %v505_v63 = vpop.f32.mrf.mxu0  ;;  %v686_v0 = vpop.f32.mrf.mxu1  ;;  %v2293_v53 = vsel %vm693_vm2, %v677_v31, %v701_v40 }
  0xfb   : > { %v2277_v41 = vadd.f32 %v505_v63, %v358_v17  ;;  %v703_v45 = vmul.f32 0.2, %v683_v34  ;;  %v685_v46 = vadd.f32 %v684_v62, %v2269_v33  ;;  %vm695_vm4 = vcmp.gt.f32.partialorder %v683_v34, 0.0 }
  0xfc   : > { %v507_v1 = vpop.f32.mrf.mxu0  ;;  %v688_v2 = vpop.f32.mrf.mxu1  ;;  %v2300_v57 = vsel %vm694_vm3, %v679_v32, %v702_v44 }
  0xfd   : > { %v2279_v42 = vadd.f32 %v507_v1, %v362_v18  ;;  %v687_v54 = vadd.f32 %v686_v0, %v2277_v41  ;;  %v2302_v58 = vsel %vm695_vm4, %v683_v34, %v703_v45  ;;  %vm696_vm6 = vcmp.gt.f32.partialorder %v685_v46, 0.0 }
  0xfe   : > { %v704_v1 = vmul.f32 0.2, %v685_v46 }
  0xff   : > { %v689_v55 = vadd.f32 %v688_v2, %v2279_v42  ;;  %vm697_vm9 = vcmp.gt.f32.partialorder %v687_v54, 0.0 }
 0x100   : > { %v2324_v29 = vsel %vm696_vm6, %v685_v46, %v704_v1 }
 0x101   : > { %vm698_vm10 = vcmp.gt.f32.partialorder %v689_v55, 0.0 }
 0x10e   : > { %v766_v3 = vpop.f32.mrf.mxu0  ;;  %v868_v4 = vpop.f32.mrf.mxu1 }
 0x10f   : > { %v767_v35 = vadd.f32 %v766_v3, %v2249_v21  ;;  %v869_v59 = vadd.f32 %v868_v4, %v2249_v21  ;;  %v705_v3 = vmul.f32 0.2, %v687_v54 }
 0x110   : > { %v768_v5 = vpop.f32.mrf.mxu0  ;;  %v2232_v7 = vpop.f32.mrf.mxu1 }
 0x111   : > { %v793_v48 = vmul.f32 0.2, %v767_v35  ;;  %v769_v49 = vadd.f32 %v768_v5, %v2251_v22  ;;  %vm785_vm5 = vcmp.gt.f32.partialorder %v767_v35, 0.0  ;;  %v871_v63 = vadd.f32 %v2232_v7, %v2251_v22 }
 0x112   : > { %v770_v8 = vpop.f32.mrf.mxu0  ;;  %v2234_v10 = vpop.f32.mrf.mxu1  ;;  %v706_v5 = vmul.f32 0.2, %v689_v55  ;;  %vm887_vm11 = vcmp.gt.f32.partialorder %v869_v59, 0.0 }
 0x113   : > { %v771_v50 = vadd.f32 %v770_v8, %v2255_v24  ;;  %v801_v61 = vsel %vm785_vm5, %v767_v35, %v793_v48  ;;  %v794_v62 = vmul.f32 0.2, %v769_v49  ;;  %vm786_vm7 = vcmp.gt.f32.partialorder %v769_v49, 0.0 }
 0x114   : > { %v2236_v11 = vpop.f32.mrf.mxu0  ;;  %v2238_v14 = vpop.f32.mrf.mxu1  ;;  %v809_v4 = vmax.f32 %v707_v51, %v801_v61  ;;  %v895_v8 = vmul.f32 0.2, %v869_v59  ;;  %v873_v9 = vadd.f32 %v2234_v10, %v2255_v24  ;;  %vm888_vm12 = vcmp.gt.f32.partialorder %v871_v63, 0.0 }
 0x115   : > { %v795_v0 = vmul.f32 0.2, %v771_v50  ;;  %vm787_vm8 = vcmp.gt.f32.partialorder %v771_v50, 0.0  ;;  %v773_v2 = vadd.f32 %v2236_v11, %v2257_v25  ;;  %v802_v12 = vsel %vm786_vm7, %v769_v49, %v794_v62 }
 0x116   : > { %v2243_v16 = vpop.f32.mrf.mxu0  ;;  %v2245_v19 = vpop.f32.mrf.mxu1  ;;  %v896_v13 = vmul.f32 0.2, %v871_v63  ;;  %v875_v11 = vadd.f32 %v2238_v14, %v2257_v25  ;;  %v2327_v10 = vsel %vm697_vm9, %v687_v54, %v705_v3  ;;  %v2330_v31 = vsel %vm698_vm10, %v689_v55, %v706_v5 }
 0x117   : > { %v803_v15 = vsel %vm787_vm8, %v771_v50, %v795_v0  ;;  %v796_v17 = vmul.f32 0.2, %v773_v2  ;;  %v777_v18 = vadd.f32 %v2243_v16, %v2259_v26  ;;  %vm788_vm13 = vcmp.gt.f32.partialorder %v773_v2, 0.0 }
 0x118   : > { %v2247_v20 = vpop.f32.mrf.mxu0  ;;  %v2253_v23 = vpop.f32.mrf.mxu1  ;;  %v903_v14 = vsel %vm887_vm11, %v869_v59, %v895_v8  ;;  %vm889_vm14 = vcmp.gt.f32.partialorder %v873_v9, 0.0  ;;  %v897_v34 = vmul.f32 0.2, %v873_v9  ;;  %v810_v37 = vmax.f32 %v2290_v52, %v802_v12 }
 0x119   : > { %v779_v28 = vadd.f32 %v2247_v20, %v2269_v33  ;;  %v2339_v35 = vmax.f32 %v809_v4, %v903_v14  ;;  %v904_v38 = vsel %vm888_vm12, %v871_v63, %v896_v13  ;;  %v811_v40 = vmax.f32 %v2293_v53, %v803_v15 }
 0x11a   : > { %v2261_v27 = vpop.f32.mrf.mxu0  ;;  %v2265_v30 = vpop.f32.mrf.mxu1  ;;  %v804_v44 = vsel %vm788_vm13, %v773_v2, %v796_v17  ;;  %v898_v45 = vmul.f32 0.2, %v875_v11  ;;  %v797_v46 = vmul.f32 0.2, %v777_v18  ;;  %vm789_vm15 = vcmp.gt.f32.partialorder %v777_v18, 0.0 }
 0x11b   : > { %v781_v16 = vadd.f32 %v2261_v27, %v2277_v41  ;;  %v798_v48 = vmul.f32 0.2, %v779_v28  ;;  %v879_v49 = vadd.f32 %v2245_v19, %v2259_v26  ;;  %vm790_vm0 = vcmp.gt.f32.partialorder %v779_v28, 0.0 }
 0x11c   : > { %v2273_v36 = vpop.f32.mrf.mxu0  ;;  %v2275_v39 = vpop.f32.mrf.mxu1  ;;  %v905_v51 = vsel %vm889_vm14, %v873_v9, %v897_v34  ;;  %vm890_vm1 = vcmp.gt.f32.partialorder %v875_v11, 0.0  ;;  %v881_v52 = vadd.f32 %v2253_v23, %v2269_v33  ;;  %v2355_v55 = vmax.f32 %v810_v37, %v904_v38 }
 0x11d   : > { %v783_v27 = vadd.f32 %v2273_v36, %v2279_v42  ;;  %v799_v53 = vmul.f32 0.2, %v781_v16  ;;  %v2357_v59 = vmax.f32 %v811_v40, %v905_v51  ;;  %v812_v19 = vmax.f32 %v2300_v57, %v804_v44 }
 0x11e   : > { %vm791_vm2 = vcmp.gt.f32.partialorder %v781_v16, 0.0  ;;  %v805_v61 = vsel %vm789_vm15, %v777_v18, %v797_v46  ;;  %v806_v36 = vsel %vm790_vm0, %v779_v28, %v798_v48  ;;  %v883_v62 = vadd.f32 %v2265_v30, %v2277_v41 }
 0x11f   : > { %v906_v0 = vsel %vm890_vm1, %v875_v11, %v898_v45  ;;  %vm891_vm3 = vcmp.gt.f32.partialorder %v879_v49, 0.0  ;;  %v899_v23 = vmul.f32 0.2, %v879_v49  ;;  %v800_v1 = vmul.f32 0.2, %v783_v27 }
 0x120   : > { %v900_v3 = vmul.f32 0.2, %v881_v52  ;;  %v807_v5 = vsel %vm791_vm2, %v781_v16, %v799_v53  ;;  %vm792_vm4 = vcmp.gt.f32.partialorder %v783_v27, 0.0  ;;  %v885_v57 = vadd.f32 %v2275_v39, %v2279_v42 }
 0x121   : > { %v2368_v8 = vmax.f32 %v812_v19, %v906_v0  ;;  %v813_v30 = vmax.f32 %v2302_v58, %v805_v61  ;;  %v814_v9 = vmax.f32 %v2324_v29, %v806_v36  ;;  %vm892_vm5 = vcmp.gt.f32.partialorder %v881_v52, 0.0 }
 0x122   : > { %vm893_vm6 = vcmp.gt.f32.partialorder %v883_v62, 0.0  ;;  %v815_v15 = vmax.f32 %v2327_v10, %v807_v5  ;;  %v808_v17 = vsel %vm792_vm4, %v783_v27, %v800_v1  ;;  %v907_v18 = vsel %vm891_vm3, %v879_v49, %v899_v23 }
 0x123   : > { %v908_v58 = vsel %vm892_vm5, %v881_v52, %v900_v3  ;;  %v902_v28 = vmul.f32 0.2, %v885_v57  ;;  %v2382_v34 = vmax.f32 %v813_v30, %v907_v18  ;;  %vm894_vm8 = vcmp.gt.f32.partialorder %v885_v57, 0.0 }
 0x124   : > { %v816_v16 = vmax.f32 %v2330_v31, %v808_v17 }
 0x125   : > { %v910_v46 = vsel %vm894_vm8, %v885_v57, %v902_v28 }
 0x126   : > { %v2399_v53 = vmax.f32 %v816_v16, %v910_v46 }
 0x12e   : > { %v2281_v43 = vpop.f32.mrf.mxu0  ;;  %v2284_v47 = vpop.f32.mrf.mxu1 }
 0x12f   : > { %v971_v63 = vadd.f32 %v2281_v43, %v2249_v21  ;;  %v901_v43 = vmul.f32 0.2, %v883_v62  ;;  %v1073_v13 = vadd.f32 %v2284_v47, %v2249_v21  ;;  %v2384_v47 = vmax.f32 %v814_v9, %v908_v58 }
 0x130   : > { %v2297_v56 = vpop.f32.mrf.mxu0  ;;  %v2305_v60 = vpop.f32.mrf.mxu1 }
 0x131   : > { %v997_v12 = vmul.f32 0.2, %v971_v63  ;;  %vm989_vm7 = vcmp.gt.f32.partialorder %v971_v63, 0.0  ;;  %v973_v39 = vadd.f32 %v2297_v56, %v2251_v22  ;;  %v909_v56 = vsel %vm893_vm6, %v883_v62, %v901_v43 }
 0x132   : > { %v2311_v6 = vpop.f32.mrf.mxu0  ;;  %v2315_v7 = vpop.f32.mrf.mxu1  ;;  %v1099_v38 = vmul.f32 0.2, %v1073_v13  ;;  %v2390_v40 = vmax.f32 %v815_v15, %v909_v56  ;;  %vm1091_vm9 = vcmp.gt.f32.partialorder %v1073_v13, 0.0  ;;  %v1075_v44 = vadd.f32 %v2305_v60, %v2251_v22 }
 0x133   : > { %v975_v29 = vadd.f32 %v2311_v6, %v2255_v24  ;;  %v1005_v37 = vsel %vm989_vm7, %v971_v63, %v997_v12  ;;  %v998_v6 = vmul.f32 0.2, %v973_v39  ;;  %vm990_vm10 = vcmp.gt.f32.partialorder %v973_v39, 0.0 }
 0x134   : > { %v2332_v32 = vpop.f32.mrf.mxu0  ;;  %v2337_v20 = vpop.f32.mrf.mxu1  ;;  %v1013_v27 = vmax.f32 %v2339_v35, %v1005_v37  ;;  %v1107_v19 = vsel %vm1091_vm9, %v1073_v13, %v1099_v38  ;;  %vm1092_vm13 = vcmp.gt.f32.partialorder %v1075_v44, 0.0 }
 0x135   : > { %v977_v10 = vadd.f32 %v2332_v32, %v2257_v25  ;;  %v999_v48 = vmul.f32 0.2, %v975_v29  ;;  %v1077_v32 = vadd.f32 %v2315_v7, %v2255_v24  ;;  %vm991_vm11 = vcmp.gt.f32.partialorder %v975_v29, 0.0 }
 0x136   : > { %v2348_v50 = vpop.f32.mrf.mxu0  ;;  %v2353_v54 = vpop.f32.mrf.mxu1  ;;  %v1079_v51 = vadd.f32 %v2337_v20, %v2257_v25  ;;  %v1006_v36 = vsel %vm990_vm10, %v973_v39, %v998_v6  ;;  %v1100_v7 = vmul.f32 0.2, %v1075_v44  ;;  %v2405_v23 = vmax.f32 %v1013_v27, %v1107_v19 }
 0x137   : > { %v1000_v31 = vmul.f32 0.2, %v977_v10  ;;  %vm992_vm12 = vcmp.gt.f32.partialorder %v977_v10, 0.0  ;;  %v981_v60 = vadd.f32 %v2348_v50, %v2259_v26  ;;  %v1007_v63 = vsel %vm991_vm11, %v975_v29, %v999_v48 }
 0x138   : > { %v982_v2 = vpop.f32.mrf.mxu0  ;;  %v2366_v4 = vpop.f32.mrf.mxu1  ;;  %vm1093_vm14 = vcmp.gt.f32.partialorder %v1077_v32, 0.0  ;;  %v1101_v0 = vmul.f32 0.2, %v1077_v32  ;;  %v1102_v3 = vmul.f32 0.2, %v1079_v51  ;;  %v1014_v50 = vmax.f32 %v2355_v55, %v1006_v36 }
 0x139   : > { %v983_v62 = vadd.f32 %v982_v2, %v2269_v33  ;;  %v1008_v1 = vsel %vm992_vm12, %v977_v10, %v1000_v31  ;;  %vm1094_vm15 = vcmp.gt.f32.partialorder %v1079_v51, 0.0  ;;  %v1001_v30 = vmul.f32 0.2, %v981_v60 }
 0x13a   : > { %v984_v11 = vpop.f32.mrf.mxu0  ;;  %v2380_v14 = vpop.f32.mrf.mxu1  ;;  %v1083_v2 = vadd.f32 %v2353_v54, %v2259_v26  ;;  %v1108_v43 = vsel %vm1092_vm13, %v1075_v44, %v1100_v7  ;;  %v1015_v12 = vmax.f32 %v2357_v59, %v1007_v63  ;;  %vm993_vm0 = vcmp.gt.f32.partialorder %v981_v60, 0.0 }
 0x13b   : > { %v985_v20 = vadd.f32 %v984_v11, %v2277_v41  ;;  %v1002_v13 = vmul.f32 0.2, %v983_v62  ;;  %v1109_v15 = vsel %vm1093_vm14, %v1077_v32, %v1101_v0  ;;  %v1016_v17 = vmax.f32 %v2368_v8, %v1008_v1 }
 0x13c   : > { %v986_v45 = vpop.f32.mrf.mxu0  ;;  %v1088_v49 = vpop.f32.mrf.mxu1  ;;  %vm994_vm1 = vcmp.gt.f32.partialorder %v983_v62, 0.0  ;;  %v1110_v55 = vsel %vm1094_vm15, %v1079_v51, %v1102_v3  ;;  %v1085_v18 = vadd.f32 %v2366_v4, %v2269_v33  ;;  %v1009_v58 = vsel %vm993_vm0, %v981_v60, %v1001_v30 }
 0x13d   : > { %v987_v5 = vadd.f32 %v986_v45, %v2279_v42  ;;  %v1003_v39 = vmul.f32 0.2, %v985_v20  ;;  %vm995_vm2 = vcmp.gt.f32.partialorder %v985_v20, 0.0  ;;  %v1103_v28 = vmul.f32 0.2, %v1083_v2 }
 0x13e   : > { %v1087_v59 = vadd.f32 %v2380_v14, %v2277_v41  ;;  %vm1095_vm4 = vcmp.gt.f32.partialorder %v1083_v2, 0.0  ;;  %v1010_v10 = vsel %vm994_vm1, %v983_v62, %v1002_v13  ;;  %v1089_v8 = vadd.f32 %v1088_v49, %v2279_v42 }
 0x13f   : > { %v1004_v54 = vmul.f32 0.2, %v987_v5  ;;  %vm996_vm3 = vcmp.gt.f32.partialorder %v987_v5, 0.0  ;;  %v2421_v16 = vmax.f32 %v1014_v50, %v1108_v43  ;;  %v2423_v37 = vmax.f32 %v1015_v12, %v1109_v15 }
 0x140   : > { %v2425_v4 = vmax.f32 %v1016_v17, %v1110_v55  ;;  %v1011_v38 = vsel %vm995_vm2, %v985_v20, %v1003_v39  ;;  %v1017_v44 = vmax.f32 %v2382_v34, %v1009_v58  ;;  %v1104_v45 = vmul.f32 0.2, %v1085_v18 }
 0x141   : > { %v1012_v14 = vsel %vm996_vm3, %v987_v5, %v1004_v54  ;;  %v1111_v48 = vsel %vm1095_vm4, %v1083_v2, %v1103_v28  ;;  %v1018_v32 = vmax.f32 %v2384_v47, %v1010_v10  ;;  %vm1096_vm5 = vcmp.gt.f32.partialorder %v1085_v18, 0.0 }
 0x142   : > { %vm1097_vm6 = vcmp.gt.f32.partialorder %v1087_v59, 0.0  ;;  %v1019_v27 = vmax.f32 %v2390_v40, %v1011_v38  ;;  %v1105_v31 = vmul.f32 0.2, %v1087_v59  ;;  %v1106_v51 = vmul.f32 0.2, %v1089_v8 }
 0x143   : > { %v1020_v19 = vmax.f32 %v2399_v53, %v1012_v14  ;;  %vm1098_vm7 = vcmp.gt.f32.partialorder %v1089_v8, 0.0  ;;  %v2433_v36 = vmax.f32 %v1017_v44, %v1111_v48 }
 0x144   : > { %v1113_v53 = vsel %vm1097_vm6, %v1087_v59, %v1105_v31  ;;  %v1114_v20 = vsel %vm1098_vm7, %v1089_v8, %v1106_v51 }
 0x145   : > { %v2442_v3 = vmax.f32 %v1019_v27, %v1113_v53  ;;  %v2444_v5 = vmax.f32 %v1020_v19, %v1114_v20 }
 0x14e   : > { %v1174_v52 = vpop.f32.mrf.mxu0  ;;  %v1276_v61 = vpop.f32.mrf.mxu1 }
 0x14f   : > { %v1175_v56 = vadd.f32 %v1174_v52, %v2249_v21  ;;  %v1277_v46 = vadd.f32 %v1276_v61, %v2249_v21  ;;  %v1112_v61 = vsel %vm1096_vm5, %v1085_v18, %v1104_v45 }
 0x150   : > { %v1176_v35 = vpop.f32.mrf.mxu0  ;;  %v1278_v9 = vpop.f32.mrf.mxu1  ;;  %v2436_v62 = vmax.f32 %v1018_v32, %v1112_v61 }
 0x151   : > { %v1201_v52 = vmul.f32 0.2, %v1175_v56  ;;  %vm1193_vm8 = vcmp.gt.f32.partialorder %v1175_v56, 0.0  ;;  %v1177_v34 = vadd.f32 %v1176_v35, %v2251_v22  ;;  %v1303_v7 = vmul.f32 0.2, %v1277_v46 }
 0x152   : > { %v1178_v57 = vpop.f32.mrf.mxu0  ;;  %v1280_v29 = vpop.f32.mrf.mxu1  ;;  %vm1295_vm9 = vcmp.gt.f32.partialorder %v1277_v46, 0.0  ;;  %v1279_v35 = vadd.f32 %v1278_v9, %v2251_v22 }
 0x153   : > { %v1179_v47 = vadd.f32 %v1178_v57, %v2255_v24  ;;  %v1209_v1 = vsel %vm1193_vm8, %v1175_v56, %v1201_v52  ;;  %v1202_v50 = vmul.f32 0.2, %v1177_v34  ;;  %v1311_v2 = vsel %vm1295_vm9, %v1277_v46, %v1303_v7 }
 0x154   : > { %v1180_v11 = vpop.f32.mrf.mxu0  ;;  %v1282_v49 = vpop.f32.mrf.mxu1  ;;  %vm1194_vm10 = vcmp.gt.f32.partialorder %v1177_v34, 0.0  ;;  %v1281_v12 = vadd.f32 %v1280_v29, %v2255_v24  ;;  %v1217_v13 = vmax.f32 %v2405_v23, %v1209_v1  ;;  %vm1296_vm12 = vcmp.gt.f32.partialorder %v1279_v35, 0.0 }
 0x155   : > { %v1181_v40 = vadd.f32 %v1180_v11, %v2257_v25  ;;  %v1203_v43 = vmul.f32 0.2, %v1179_v47  ;;  %vm1195_vm11 = vcmp.gt.f32.partialorder %v1179_v47, 0.0  ;;  %v1304_v9 = vmul.f32 0.2, %v1279_v35 }
 0x156   : > { %v1184_v6 = vpop.f32.mrf.mxu0  ;;  %v1286_v0 = vpop.f32.mrf.mxu1  ;;  %v1210_v11 = vsel %vm1194_vm10, %v1177_v34, %v1202_v50  ;;  %v1283_v55 = vadd.f32 %v1282_v49, %v2257_v25  ;;  %vm1297_vm15 = vcmp.gt.f32.partialorder %v1281_v12, 0.0  ;;  %v1305_v59 = vmul.f32 0.2, %v1281_v12 }
 0x157   : > { %v1185_v63 = vadd.f32 %v1184_v6, %v2259_v26  ;;  %v1204_v15 = vmul.f32 0.2, %v1181_v40  ;;  %vm1196_vm13 = vcmp.gt.f32.partialorder %v1181_v40, 0.0  ;;  %v1287_v18 = vadd.f32 %v1286_v0, %v2259_v26 }
 0x158   : > { %v1186_v60 = vpop.f32.mrf.mxu0  ;;  %v1288_v39 = vpop.f32.mrf.mxu1  ;;  %v1211_v28 = vsel %vm1195_vm11, %v1179_v47, %v1203_v43  ;;  %v2453_v38 = vmax.f32 %v1217_v13, %v1311_v2  ;;  %v1218_v6 = vmax.f32 %v2421_v16, %v1210_v11  ;;  %v1312_v44 = vsel %vm1296_vm12, %v1279_v35, %v1304_v9 }
 0x159   : > { %v1187_v57 = vadd.f32 %v1186_v60, %v2269_v33  ;;  %v1205_v17 = vmul.f32 0.2, %v1185_v63  ;;  %vm1197_vm14 = vcmp.gt.f32.partialorder %v1185_v63, 0.0  ;;  %v1212_v23 = vsel %vm1196_vm13, %v1181_v40, %v1204_v15 }
 0x15a   : > { %v1188_v30 = vpop.f32.mrf.mxu0  ;;  %v1289_v10 = vadd.f32 %v1288_v39, %v2269_v33  ;;  %v1290_v56 = vpop.f32.mrf.mxu1  ;;  %v1219_v14 = vmax.f32 %v2423_v37, %v1211_v28  ;;  %v1306_v46 = vmul.f32 0.2, %v1283_v55  ;;  %v1307_v48 = vmul.f32 0.2, %v1287_v18 }
 0x15b   : > { %v1206_v54 = vmul.f32 0.2, %v1187_v57  ;;  %vm1198_vm0 = vcmp.gt.f32.partialorder %v1187_v57, 0.0  ;;  %v1213_v29 = vsel %vm1197_vm14, %v1185_v63, %v1205_v17  ;;  %v1189_v8 = vadd.f32 %v1188_v30, %v2277_v41 }
 0x15c   : > { %v1190_v58 = vpop.f32.mrf.mxu0  ;;  %v1220_v49 = vmax.f32 %v2425_v4, %v1212_v23  ;;  %vm1298_vm1 = vcmp.gt.f32.partialorder %v1283_v55, 0.0  ;;  %v1221_v27 = vmax.f32 %v2433_v36, %v1213_v29  ;;  %vm1299_vm2 = vcmp.gt.f32.partialorder %v1287_v18, 0.0  ;;  %v1292_v19 = vpop.f32.mrf.mxu1 }
 0x15d   : > { %v1191_v45 = vadd.f32 %v1190_v58, %v2279_v42  ;;  %v1214_v32 = vsel %vm1198_vm0, %v1187_v57, %v1206_v54  ;;  %v1313_v31 = vsel %vm1297_vm15, %v1281_v12, %v1305_v59  ;;  %v1308_v51 = vmul.f32 0.2, %v1289_v10 }
 0x15e   : > { %v1207_v52 = vmul.f32 0.2, %v1189_v8  ;;  %v1291_v16 = vadd.f32 %v1290_v56, %v2277_v41  ;;  %v1222_v34 = vmax.f32 %v2436_v62, %v1214_v32  ;;  %vm1300_vm3 = vcmp.gt.f32.partialorder %v1289_v10, 0.0 }
 0x15f   : > { %vm1199_vm4 = vcmp.gt.f32.partialorder %v1189_v8, 0.0  ;;  %v1208_v37 = vmul.f32 0.2, %v1191_v45  ;;  %v1320_v60 = vmax.f32 %v1218_v6, %v1312_v44  ;;  %v1314_v61 = vsel %vm1298_vm1, %v1283_v55, %v1306_v46 }
 0x160   : > { %v1315_v7 = vsel %vm1299_vm2, %v1287_v18, %v1307_v48  ;;  %vm1200_vm5 = vcmp.gt.f32.partialorder %v1191_v45, 0.0  ;;  %v2464_v4 = vmax.f32 %v1219_v14, %v1313_v31  ;;  %v2466_v36 = vmax.f32 %v1220_v49, %v1314_v61 }
 0x161   : > { %v1323_v47 = vmax.f32 %v1221_v27, %v1315_v7  ;;  %v1293_v40 = vadd.f32 %v1292_v19, %v2279_v42  ;;  %v1316_v53 = vsel %vm1300_vm3, %v1289_v10, %v1308_v51  ;;  %v1215_v20 = vsel %vm1199_vm4, %v1189_v8, %v1207_v52 }
 0x162   : > { %v1324_v35 = vmax.f32 %v1222_v34, %v1316_v53  ;;  %vm1301_vm6 = vcmp.gt.f32.partialorder %v1291_v16, 0.0  ;;  %v1309_v50 = vmul.f32 0.2, %v1291_v16  ;;  %v1216_v57 = vsel %vm1200_vm5, %v1191_v45, %v1208_v37 }
 0x163   : > { %v1223_v13 = vmax.f32 %v2442_v3, %v1215_v20  ;;  %vm1302_vm9 = vcmp.gt.f32.partialorder %v1293_v40, 0.0  ;;  %v1310_v39 = vmul.f32 0.2, %v1293_v40  ;;  %v1224_v18 = vmax.f32 %v2444_v5, %v1216_v57 }
 0x164   : > { %v1317_v8 = vsel %vm1301_vm6, %v1291_v16, %v1309_v50 }
 0x165   : > { %v1325_v32 = vmax.f32 %v1223_v13, %v1317_v8 }
 0x16e   : > { %v1378_v63 = vpop.f32.mrf.mxu0  ;;  %v1388_v0 = vpop.f32.mrf.mxu1 }
 0x16f   : > { %v1379_v62 = vadd.f32 %v1378_v63, %v2249_v21  ;;  %v1389_v1 = vadd.f32 %v1388_v0, %v2259_v26 }
 0x170   : > { %v1380_v30 = vpop.f32.mrf.mxu0  ;;  %v1390_v2 = vpop.f32.mrf.mxu1 }
 0x171   : > { %vm1397_vm7 = vcmp.gt.f32.partialorder %v1379_v62, 0.0  ;;  %v1405_v43 = vmul.f32 0.2, %v1379_v62  ;;  %vm1401_vm8 = vcmp.gt.f32.partialorder %v1389_v1, 0.0  ;;  %v1409_v12 = vmul.f32 0.2, %v1389_v1 }
 0x172   : > { %v1381_v15 = vadd.f32 %v1380_v30, %v2251_v22  ;;  %v1391_v21 = vadd.f32 %v1390_v2, %v2269_v33  ;;  %v1382_v17 = vpop.f32.mrf.mxu0  ;;  %v1392_v26 = vpop.f32.mrf.mxu1 }
 0x173   : > { %v1413_v9 = vsel %vm1397_vm7, %v1379_v62, %v1405_v43  ;;  %v1383_v11 = vadd.f32 %v1382_v17, %v2255_v24  ;;  %v1393_v55 = vadd.f32 %v1392_v26, %v2277_v41  ;;  %v1417_v54 = vsel %vm1401_vm8, %v1389_v1, %v1409_v12 }
 0x174   : > { %vm1398_vm10 = vcmp.gt.f32.partialorder %v1381_v15, 0.0  ;;  %v1406_v58 = vmul.f32 0.2, %v1381_v15  ;;  %v1384_v3 = vpop.f32.mrf.mxu0  ;;  %v1394_v28 = vpop.f32.mrf.mxu1  ;;  %v1421_v59 = vmax.f32 %v2453_v38, %v1413_v9  ;;  %vm1402_vm11 = vcmp.gt.f32.partialorder %v1391_v21, 0.0 }
 0x175   : > { %v1410_v22 = vmul.f32 0.2, %v1391_v21  ;;  %v1407_v33 = vmul.f32 0.2, %v1383_v11  ;;  %vm1399_vm12 = vcmp.gt.f32.partialorder %v1383_v11, 0.0  ;;  %v1385_v24 = vadd.f32 %v1384_v3, %v2257_v25 }
 0x176   : > { %v1414_v23 = vsel %vm1398_vm10, %v1381_v15, %v1406_v58  ;;  %v1411_v29 = vmul.f32 0.2, %v1393_v55  ;;  %vm1403_vm13 = vcmp.gt.f32.partialorder %v1393_v55, 0.0  ;;  %v1395_v5 = vadd.f32 %v1394_v28, %v2279_v42 }
 0x177   : > { %v1422_v10 = vmax.f32 %v1320_v60, %v1414_v23  ;;  %v1418_v41 = vsel %vm1402_vm11, %v1391_v21, %v1410_v22  ;;  %v1425_v56 = vmax.f32 %v1323_v47, %v1417_v54  ;;  %vm1400_vm14 = vcmp.gt.f32.partialorder %v1385_v24, 0.0 }
 0x178   : > { %v1426_v38 = vmax.f32 %v1324_v35, %v1418_v41  ;;  %v1415_v44 = vsel %vm1399_vm12, %v1383_v11, %v1407_v33  ;;  %v1408_v45 = vmul.f32 0.2, %v1385_v24  ;;  %vm1404_vm15 = vcmp.gt.f32.partialorder %v1395_v5, 0.0 }
 0x179   : > { %v1718_v6 = vpack.c.bf16 %v1422_v10, %v1421_v59  ;;  %v1318_v25 = vsel %vm1302_vm9, %v1293_v40, %v1310_v39  ;;  %v1419_v46 = vsel %vm1403_vm13, %v1393_v55, %v1411_v29  ;;  %v1412_v48 = vmul.f32 0.2, %v1395_v5 }
 0x17a   : > { %v1720_v14 = vpack.c.bf16 %v1426_v38, %v1425_v56  ;;  %v1326_v42 = vmax.f32 %v1224_v18, %v1318_v25  ;;  %v1416_v49 = vsel %vm1400_vm14, %v1385_v24, %v1408_v45  ;;  %v1423_v27 = vmax.f32 %v2464_v4, %v1415_v44 }
 0x17b   : > { %1456 = vst [vmem:[%s326_s18] sm:$0xff] %v1718_v6  ;;  %v1424_v31 = vmax.f32 %v2466_v36, %v1416_v49  ;;  %v1420_v51 = vsel %vm1404_vm15, %v1395_v5, %v1412_v48  ;;  %v1427_v52 = vmax.f32 %v1325_v32, %v1419_v46 }
 0x17c   : > { %1458 = vst [vmem:[%s326_s18 + $0x10] sm:$0xff] %v1720_v14  ;;  %v1428_v16 = vmax.f32 %v1326_v42, %v1420_v51 }
 0x17d   : > { %v1719_v19 = vpack.c.bf16 %v1424_v31, %v1423_v27 }
 0x17e   : > { %v1721_v34 = vpack.c.bf16 %v1428_v16, %v1427_v52 }
 0x17f   : > { %1457 = vst [vmem:[%s326_s18 + $0x8] sm:$0xff] %v1719_v19 }
 0x180   : > { %1459 = vst [vmem:[%s326_s18 + $0x18] sm:$0xff] %v1721_v34 }
 0x181 PF: > { %s15_s20 = sadd.s32 1, %s1855_s20   ;;  %s2503_s18 = smov %s1851_s19 }
 0x182   : > { %p12_p5 = scmp.ge.s32.totalorder %s15_s20, 4   ;;  %s2504_s19 = smov %s2506_s21 }
 0x184   :  { %14 = sbr.rel (!%p12_p5) target bundleno = 2 (0x2), region = 92 }

// kernel: _lambda_.19
= control target key start
LH: loop header
LB: loop body
LE: loop exit
PB: predicated region body
PF: predicated region fallthrough
CT: control target
= control target key end

     0   :  { %s1585_s30 = smov 0   ;;  %s1587_s10 = smov 0   ;;  %s1871_s0 = inlined_call_operand.vmem [shape: bf16[2,32,64], index: 0, kind: input, shape index: {}]   ;;  %s1872_s1 = inlined_call_operand.vmem [shape: f32[2,1,128], index: 1, kind: input, shape index: {}]   ;;  %s1873_s2 = inlined_call_operand.vmem [shape: bf16[64,256], index: 2, kind: input, shape index: {}]   ;;  %s1874_s3 = inlined_call_operand.vmem [shape: bf16[128,256], index: 3, kind: input, shape index: {}]   ;;  %s1875_s4 = inlined_call_operand.vmem [shape: f32[1,256], index: 4, kind: input, shape index: {}]   ;;  %s1876_s5 = inlined_call_operand.vmem [shape: bf16[256,256], index: 5, kind: input, shape index: {}]   ;;  %s1877_s6 = inlined_call_operand.vmem [shape: f32[1,256], index: 6, kind: input, shape index: {}]   ;;  %s1878_s7 = inlined_call_operand.vmem [shape: bf16[256,128], index: 7, kind: input, shape index: {}]   ;;  %s1879_s8 = inlined_call_operand.vmem [shape: f32[1,128], index: 8, kind: input, shape index: {}]   ;;  %s1880_s9 = inlined_call_operand.vmem [shape: f32[2,32,128], index: 9, kind: output, shape index: {}]  }
   0x1   :  { %s1589_s11 = smov 0  }
   0x2 LB: > { %s31_s12 = sadd.s32 1, %s1528_s10  ;;  %p1269_p0 = scmp.ge.s32.totalorder %s1532_s11, 1  ;;  %s1532_s11 = sphi %s1589_s11, %s19_s11   ;;  %s1528_s10 = sphi %s1587_s10, %s1882_s10   ;;  %s1524_s30 = sphi %s1585_s30, %s1881_s30  }
   0x3   : > { %p33_p1 = scmp.ge.s32.totalorder %s31_s12, 2  ;;  %p316_p2 = scmp.lt.s32.totalorder %s1532_s11, 3 }
   0x5   : > { %s1884_s12 = smov (%p33_p1, %s31_s12), 0  ;;  %p317_p3 = pnand %p1269_p0, %p316_p2 }
   0x6   : > { %p364_p4 = scmp.lt.s32.totalorder (!%p317_p3), %s1524_s30, 1 }
   0x7   : > { %320 = sbr.rel (%p317_p3) target bundleno = 673 (0x2a1), region = 56 }
   0xc   : > { %v1408_v0 = vld [vmem:[%s1874_s3 + $0x74] ss:$8 sps:$4 sm:$0xff]   ;;  %v1410_v1 = vld [vmem:[%s1874_s3 + $0x70] ss:$8 sps:$4 sm:$0xff]   ;;  %v1534_v2 = vmov 0   ;;  %s1886_s30 = smov (!%p364_p4, %s1524_s30), 1 }
   0xd   : > { %647 = vmatprep.mubr.bf16.mxu1 %v1534_v2  ;;  %529 = vmatprep.mubr.bf16.mxu0 %v1534_v2  ;;  %v1411_v3 = vld [vmem:[%s1874_s3 + $0x64] ss:$8 sps:$4 sm:$0xff]   ;;  %v1413_v4 = vld [vmem:[%s1874_s3 + $0x60] ss:$8 sps:$4 sm:$0xff]   ;;  %v1414_v5 = vld [vmem:[%s1874_s3 + $0x54] ss:$8 sps:$4 sm:$0xff]   ;;  %s375_s21 = scalar_lea.vmem %s1872_s1, %s1886_s30 }
   0xe   : > { %497 = vmatprep.subr.bf16.mxu0 %v1408_v0  ;;  %v1416_v6 = vld [vmem:[%s1873_s2 + $0x34] ss:$8 sps:$4 sm:$0xff]   ;;  %v1419_v7 = vld [vmem:[%s1873_s2 + $0x30] ss:$8 sps:$4 sm:$0xff]   ;;  %v1422_v9 = vld [vmem:[%s1873_s2 + $0x24] ss:$8 sps:$4 sm:$0xff]  }
   0xf   : > { %498 = vmatpush1.bf16.msra.mxu0 %v1410_v1  ;;  %623 = vmatprep.subr.bf16.mxu1 %v1416_v6  ;;  %v1418_v8 = vld [vmem:[%s1874_s3 + $0x50] ss:$8 sps:$4 sm:$0xff]   ;;  %v1425_v10 = vld [vmem:[%s1873_s2 + $0x20] ss:$8 sps:$4 sm:$0xff]   ;;  %v1420_v11 = vld [vmem:[%s1874_s3 + $0x44] ss:$8 sps:$4 sm:$0xff]   ;;  %v487_v6 = vlaneseq }
  0x10   : > { %499 = vmatprep.subr.bf16.mxu0 %v1411_v3  ;;  %624 = vmatpush1.bf16.msra.mxu1 %v1419_v7  ;;  %v1428_v12 = vld [vmem:[%s1873_s2 + $0x14] ss:$8 sps:$4 sm:$0xff]   ;;  %v1424_v13 = vld [vmem:[%s1874_s3 + $0x40] ss:$8 sps:$4 sm:$0xff]   ;;  %s1353_s22 = sshll.u32 %s1886_s30, 4  ;;  %vm608_vm0 = vcmask 523264  }
  0x11   : > { %625 = vmatprep.subr.bf16.mxu1 %v1422_v9  ;;  %v1431_v14 = vld [vmem:[%s1873_s2 + $0x10] ss:$8 sps:$4 sm:$0xff]   ;;  %v1426_v15 = vld [vmem:[%s1874_s3 + $0x34] ss:$8 sps:$4 sm:$0xff]   ;;  %v1434_v16 = vld [vmem:[%s1873_s2 + $0x4] ss:$8 sps:$4 sm:$0xff]   ;;  %s1657_s14 = scalar_lea.vmem %s1871_s0, %s1353_s22 }
  0x12   : > { %v1430_v17 = vld [vmem:[%s1874_s3 + $0x30] ss:$8 sps:$4 sm:$0xff]   ;;  %v1437_v18 = vld [vmem:[%s1873_s2] ss:$8 sps:$4 sm:$0xff]   ;;  %v1432_v19 = vld [vmem:[%s1874_s3 + $0x24] ss:$8 sps:$4 sm:$0xff]  }
  0x13   : > { %500 = vmatpush1.bf16.msra.mxu0 %v1413_v4  ;;  %v1440_v20 = vld [vmem:[%s1657_s14] sm:$0xff]   ;;  %v1448_v22 = vld [vmem:[%s1876_s5 + $0x74] ss:$8 sps:$4 sm:$0xff]   ;;  %v1446_v24 = vld [vmem:[%s1876_s5 + $0x70] ss:$8 sps:$4 sm:$0xff]   ;;  %s1354_s16 = sshll.u32 %s1886_s30, 5 }
  0x14   : > { %501 = vmatprep.subr.bf16.mxu0 %v1414_v5  ;;  %626 = vmatpush1.bf16.msra.mxu1 %v1425_v10  ;;  %v1436_v21 = vld [vmem:[%s1874_s3 + $0x20] ss:$8 sps:$4 sm:$0xff]   ;;  %v1438_v23 = vld [vmem:[%s1874_s3 + $0x14] ss:$8 sps:$4 sm:$0xff]   ;;  %v1451_v25 = vld [vmem:[%s1876_s5 + $0x64] ss:$8 sps:$4 sm:$0xff]  }
  0x15   : > { %627 = vmatprep.subr.bf16.mxu1 %v1428_v12  ;;  %v1441_v26 = vld [vmem:[%s1874_s3 + $0x10] ss:$8 sps:$4 sm:$0xff]   ;;  %v1442_v27 = vld [vmem:[%s1874_s3 + $0x4] ss:$8 sps:$4 sm:$0xff]   ;;  %v1449_v28 = vld [vmem:[%s1876_s5 + $0x60] ss:$8 sps:$4 sm:$0xff]  }
  0x16   : > { %v1454_v29 = vld [vmem:[%s1876_s5 + $0x54] ss:$8 sps:$4 sm:$0xff]   ;;  %v1445_v30 = vld [vmem:[%s1657_s14 + $0x8] sm:$0xff]   ;;  %v387_v32 = vld [vmem:[%s375_s21] sm:$0x1]  ;;  %s384_s21 = scalar_lea.vmem %s1880_s9, %s1354_s16 }
  0x17   : > { %502 = vmatpush1.bf16.msra.mxu0 %v1418_v8  ;;  %v1444_v31 = vld [vmem:[%s1874_s3] ss:$8 sps:$4 sm:$0xff]   ;;  %v1452_v33 = vld [vmem:[%s1876_s5 + $0x50] ss:$8 sps:$4 sm:$0xff]   ;;  %v1457_v34 = vld [vmem:[%s1876_s5 + $0x44] ss:$8 sps:$4 sm:$0xff]   ;;  %v388_v35 = vpack.c.bf16 %v387_v32, %v387_v32 }
  0x18   : > { %503 = vmatprep.subr.bf16.mxu0 %v1420_v11  ;;  %628 = vmatpush1.bf16.msra.mxu1 %v1431_v14  ;;  %v1455_v36 = vld [vmem:[%s1876_s5 + $0x40] ss:$8 sps:$4 sm:$0xff]   ;;  %v1460_v37 = vld [vmem:[%s1876_s5 + $0x34] ss:$8 sps:$4 sm:$0xff]   ;;  %v1458_v38 = vld [vmem:[%s1876_s5 + $0x30] ss:$8 sps:$4 sm:$0xff]  }
  0x19   : > { %629 = vmatprep.subr.bf16.mxu1 %v1434_v16  ;;  %v1463_v39 = vld [vmem:[%s1876_s5 + $0x24] ss:$8 sps:$4 sm:$0xff]   ;;  %v1461_v40 = vld [vmem:[%s1876_s5 + $0x20] ss:$8 sps:$4 sm:$0xff]   ;;  %v1466_v41 = vld [vmem:[%s1876_s5 + $0x14] ss:$8 sps:$4 sm:$0xff]  }
  0x1a   : > { %v1464_v42 = vld [vmem:[%s1876_s5 + $0x10] ss:$8 sps:$4 sm:$0xff]   ;;  %v1469_v43 = vld [vmem:[%s1876_s5 + $0x4] ss:$8 sps:$4 sm:$0xff]   ;;  %v1467_v44 = vld [vmem:[%s1876_s5] ss:$8 sps:$4 sm:$0xff]  }
  0x1b   : > { %504 = vmatpush1.bf16.msra.mxu0 %v1424_v13  ;;  %v1472_v45 = vld [vmem:[%s1876_s5 + $0xf4] ss:$8 sps:$4 sm:$0xff]   ;;  %v1470_v46 = vld [vmem:[%s1876_s5 + $0xf0] ss:$8 sps:$4 sm:$0xff]   ;;  %v1475_v47 = vld [vmem:[%s1876_s5 + $0xe4] ss:$8 sps:$4 sm:$0xff]  }
  0x1c   : > { %505 = vmatprep.subr.bf16.mxu0 %v1426_v15  ;;  %630 = vmatpush1.bf16.msra.mxu1 %v1437_v18  ;;  %v1473_v48 = vld [vmem:[%s1876_s5 + $0xe0] ss:$8 sps:$4 sm:$0xff]   ;;  %v1478_v49 = vld [vmem:[%s1876_s5 + $0xd4] ss:$8 sps:$4 sm:$0xff]   ;;  %v1476_v50 = vld [vmem:[%s1876_s5 + $0xd0] ss:$8 sps:$4 sm:$0xff]  }
  0x1d   : > { %900 = vmatprep.subr.bf16.mxu1 %v1448_v22  ;;  %v1479_v51 = vld [vmem:[%s1876_s5 + $0xc0] ss:$8 sps:$4 sm:$0xff]   ;;  %v1481_v52 = vld [vmem:[%s1876_s5 + $0xc4] ss:$8 sps:$4 sm:$0xff]   ;;  %v1482_v53 = vld [vmem:[%s1876_s5 + $0xb0] ss:$8 sps:$4 sm:$0xff]  }
  0x1e   : > { %v1484_v54 = vld [vmem:[%s1876_s5 + $0xb4] ss:$8 sps:$4 sm:$0xff]   ;;  %v1487_v55 = vld [vmem:[%s1876_s5 + $0xa4] ss:$8 sps:$4 sm:$0xff]   ;;  %v1485_v56 = vld [vmem:[%s1876_s5 + $0xa0] ss:$8 sps:$4 sm:$0xff]  }
  0x1f   : > { %506 = vmatpush1.bf16.msra.mxu0 %v1430_v17  ;;  %1300 = vmatmul.mubr.msk.bf16.vlgmr.msra.gmra.mxu1 %vm608_vm0, %v1440_v20  ;;  %v1490_v57 = vld [vmem:[%s1876_s5 + $0x94] ss:$8 sps:$4 sm:$0xff]   ;;  %v1488_v58 = vld [vmem:[%s1876_s5 + $0x90] ss:$8 sps:$4 sm:$0xff]   ;;  %v1491_v59 = vld [vmem:[%s1876_s5 + $0x80] ss:$8 sps:$4 sm:$0xff]  }
  0x20   : > { %507 = vmatprep.subr.bf16.mxu0 %v1432_v19  ;;  %657 = vmatprep.mubr.bf16.mxu1 %v1534_v2  ;;  %v1493_v60 = vld [vmem:[%s1876_s5 + $0x84] ss:$8 sps:$4 sm:$0xff]   ;;  %v1494_v61 = vld [vmem:[%s1878_s7 + $0x78] sm:$0xff]   ;;  %v1496_v63 = vld [vmem:[%s1878_s7 + $0x70] sm:$0xff]   ;;  %v1814_v8 = vshrl.u32 %v487_v6, 7 }
  0x21   : > { %901 = vmatpush1.bf16.msra.mxu1 %v1446_v24  ;;  %v1495_v62 = vld [vmem:[%s1878_s7 + $0x38] sm:$0xff]   ;;  %v1497_v0 = vld [vmem:[%s1878_s7 + $0x30] sm:$0xff]   ;;  %v1498_v1 = vld [vmem:[%s1878_s7 + $0x68] sm:$0xff]  }
  0x22   : > { %902 = vmatprep.subr.bf16.mxu1 %v1451_v25  ;;  %v1499_v2 = vld [vmem:[%s1878_s7 + $0x28] sm:$0xff]   ;;  %v1500_v3 = vld [vmem:[%s1878_s7 + $0x60] sm:$0xff]   ;;  %v1502_v5 = vld [vmem:[%s1878_s7 + $0x58] sm:$0xff]   ;;  %v1817_v11 = vsub.s32 0, %v1814_v8  ;;  %v493_v14 = vsub.s32 1, %v1814_v8 }
  0x23   : > { %508 = vmatpush1.bf16.msra.mxu0 %v1436_v21  ;;  %v1501_v4 = vld [vmem:[%s1878_s7 + $0x20] sm:$0xff]  }
  0x24   : > { %509 = vmatprep.subr.bf16.mxu0 %v1438_v23  ;;  %v405_v13 = vld [vmem:[%s1875_s4] sm:$0x3] }
  0x25   : > { %903 = vmatpush1.bf16.msra.mxu1 %v1449_v28  ;;  %v490_v16 = vrot.slane %v405_v13, %v1817_v11  ;;  %v494_v18 = vrot.slane %v405_v13, %v493_v14 }
  0x26   : > { %904 = vmatprep.subr.bf16.mxu1 %v1454_v29 }
  0x27   : > { %510 = vmatpush1.bf16.msra.mxu0 %v1441_v26  ;;  %1301 = vmatmul.mubr.msk.bf16.gmra.mxu1 %vm608_vm0, %v1445_v30 }
  0x28   : > { %511 = vmatprep.subr.bf16.mxu0 %v1442_v27 }
  0x29   : > { %905 = vmatpush1.bf16.msra.mxu1 %v1452_v33 }
  0x2a   : > { %906 = vmatprep.subr.bf16.mxu1 %v1457_v34 }
  0x2b   : > { %512 = vmatpush1.bf16.msra.mxu0 %v1444_v31 }
  0x2c   : > { %1355 = vmatprep.subr.bf16.mxu0 %v1494_v61  ;;  %v1507_v61 = vld [vmem:[%s1878_s7 + $0x8] sm:$0xff]  }
  0x2d   : > { %907 = vmatpush1.bf16.msra.mxu1 %v1455_v36 }
  0x2e   : > { %530 = vmatmul.mubr.bf16.vlgmr.msra.gmra.mxu0 %v388_v35  ;;  %908 = vmatprep.subr.bf16.mxu1 %v1460_v37 }
  0x2f   : > { %1356 = vmatpush3.bf16.msra.mxu0 %v1495_v62  ;;  %v1508_v62 = vld [vmem:[%s1878_s7 + $0x40] sm:$0xff]  }
  0x30   : > { %1357 = vmatprep.subr.bf16.mxu0 %v1496_v63  ;;  %v1509_v63 = vld [vmem:[%s1878_s7] sm:$0xff]  }
  0x31   : > { %909 = vmatpush1.bf16.msra.mxu1 %v1458_v38 }
  0x32   : > { %910 = vmatprep.subr.bf16.mxu1 %v1463_v39 }
  0x33   : > { %1358 = vmatpush3.bf16.msra.mxu0 %v1497_v0  ;;  %v728_v0 = vld [vmem:[%s1877_s6] sm:$0x3] }
  0x34   : > { %1359 = vmatprep.subr.bf16.mxu0 %v1498_v1  ;;  %v737_v1 = vrot.slane %v728_v0, %v493_v14 }
  0x35   : > { %911 = vmatpush1.bf16.msra.mxu1 %v1461_v40 }
  0x36   : > { %912 = vmatprep.subr.bf16.mxu1 %v1466_v41 }
  0x37   : > { %1360 = vmatpush3.bf16.msra.mxu0 %v1499_v2  ;;  %v733_v2 = vrot.slane %v728_v0, %v1817_v11 }
  0x38   : > { %1361 = vmatprep.subr.bf16.mxu0 %v1500_v3 }
  0x39   : > { %913 = vmatpush1.bf16.msra.mxu1 %v1464_v42 }
  0x3a   : > { %914 = vmatprep.subr.bf16.mxu1 %v1469_v43 }
  0x3b   : > { %1362 = vmatpush3.bf16.msra.mxu0 %v1501_v4 }
  0x3c   : > { %1363 = vmatprep.subr.bf16.mxu0 %v1502_v5 }
  0x3d   : > { %915 = vmatpush1.bf16.msra.mxu1 %v1467_v44 }
  0x3e   : > { %916 = vmatprep.subr.bf16.mxu1 %v1472_v45 }
  0x41   : > { %917 = vmatpush2.bf16.msra.mxu1 %v1470_v46 }
  0x42   : > { %918 = vmatprep.subr.bf16.mxu1 %v1475_v47 }
  0x45   : > { %919 = vmatpush2.bf16.msra.mxu1 %v1473_v48 }
  0x46   : > { %920 = vmatprep.subr.bf16.mxu1 %v1478_v49 }
  0x49   : > { %921 = vmatpush2.bf16.msra.mxu1 %v1476_v50 }
  0x4a   : > { %922 = vmatprep.subr.bf16.mxu1 %v1481_v52 }
  0x4d   : > { %923 = vmatpush2.bf16.msra.mxu1 %v1479_v51 }
  0x4e   : > { %924 = vmatprep.subr.bf16.mxu1 %v1484_v54 }
  0x51   : > { %925 = vmatpush2.bf16.msra.mxu1 %v1482_v53 }
  0x52   : > { %926 = vmatprep.subr.bf16.mxu1 %v1487_v55 }
  0x55   : > { %927 = vmatpush2.bf16.msra.mxu1 %v1485_v56 }
  0x56   : > { %928 = vmatprep.subr.bf16.mxu1 %v1490_v57  ;;  %v1503_v57 = vld [vmem:[%s1878_s7 + $0x18] sm:$0xff]  }
  0x57   : > { %1364 = vmatpush3.bf16.msra.mxu0 %v1503_v57 }
  0x59   : > { %929 = vmatpush2.bf16.msra.mxu1 %v1488_v58  ;;  %v1504_v58 = vld [vmem:[%s1878_s7 + $0x50] sm:$0xff]  }
  0x5a   : > { %930 = vmatprep.subr.bf16.mxu1 %v1493_v60  ;;  %1365 = vmatprep.subr.bf16.mxu0 %v1504_v58  ;;  %v1506_v60 = vld [vmem:[%s1878_s7 + $0x48] sm:$0xff]  }
  0x5d   : > { %931 = vmatpush2.bf16.msra.mxu1 %v1491_v59  ;;  %v1505_v59 = vld [vmem:[%s1878_s7 + $0x10] sm:$0xff]  }
  0x5e   : > { %1366 = vmatpush3.bf16.msra.mxu0 %v1505_v59 }
  0x5f   : > { %1367 = vmatprep.subr.bf16.mxu0 %v1506_v60 }
  0x62   : > { %1368 = vmatpush3.bf16.msra.mxu0 %v1507_v61 }
  0x63   : > { %1369 = vmatprep.subr.bf16.mxu0 %v1508_v62 }
  0x66   : > { %1370 = vmatpush3.bf16.msra.mxu0 %v1509_v63 }
  0xdf   : > { %v649_v7 = vpop.f32.mrf.mxu1 }
  0xe1   : > { %v651_v9 = vpop.f32.mrf.mxu1 }
  0xe3   : > { %v653_v10 = vpop.f32.mrf.mxu1 }
  0xe5   : > { %v655_v12 = vpop.f32.mrf.mxu1 }
  0xe7   : > { %v659_v15 = vpop.f32.mrf.mxu1 }
  0xe9   : > { %v661_v17 = vpop.f32.mrf.mxu1 }
  0xeb   : > { %v663_v22 = vpop.f32.mrf.mxu1 }
  0xed   : > { %v665_v30 = vpop.f32.mrf.mxu1 }
  0xee   : > { %v531_v19 = vpop.f32.mrf.mxu0 }
  0xef   : > { %v532_v20 = vadd.f32 %v531_v19, %v490_v16 }
  0xf0   : > { %v533_v21 = vpop.f32.mrf.mxu0 }
  0xf1   : > { %v553_v23 = vrot.slane %v532_v20, %v1817_v11  ;;  %v534_v24 = vadd.f32 %v533_v21, %v494_v18 }
  0xf2   : > { %v535_v25 = vpop.f32.mrf.mxu0 }
  0xf3   : > { %v650_v26 = vadd.f32 %v649_v7, %v553_v23  ;;  %v654_v27 = vadd.f32 %v653_v10, %v553_v23  ;;  %v557_v28 = vrot.slane %v534_v24, %v1817_v11  ;;  %v660_v41 = vadd.f32 %v659_v15, %v553_v23 }
  0xf4   : > { %v536_v29 = vpop.f32.mrf.mxu0  ;;  %v664_v42 = vadd.f32 %v663_v22, %v553_v23 }
  0xf5   : > { %v676_v31 = vmul.f32 0.2, %v650_v26  ;;  %v662_v32 = vadd.f32 %v661_v17, %v557_v28  ;;  %v678_v33 = vmul.f32 0.2, %v654_v27  ;;  %v666_v34 = vadd.f32 %v665_v30, %v557_v28 }
  0xf6   : > { %v652_v35 = vadd.f32 %v651_v9, %v557_v28  ;;  %v656_v36 = vadd.f32 %v655_v12, %v557_v28  ;;  %vm668_vm1 = vcmp.gt.f32.partialorder %v650_v26, 0.0  ;;  %vm670_vm2 = vcmp.gt.f32.partialorder %v654_v27, 0.0 }
  0xf7   : > { %vm673_vm3 = vcmp.gt.f32.partialorder %v662_v32, 0.0  ;;  %v681_v37 = vmul.f32 0.2, %v662_v32  ;;  %vm675_vm4 = vcmp.gt.f32.partialorder %v666_v34, 0.0  ;;  %v683_v38 = vmul.f32 0.2, %v666_v34 }
  0xf8   : > { %vm669_vm5 = vcmp.gt.f32.partialorder %v652_v35, 0.0  ;;  %vm671_vm6 = vcmp.gt.f32.partialorder %v656_v36, 0.0  ;;  %v677_v39 = vmul.f32 0.2, %v652_v35  ;;  %v679_v40 = vmul.f32 0.2, %v656_v36 }
  0xf9   : > { %v684_v43 = vsel %vm668_vm1, %v650_v26, %v676_v31  ;;  %v686_v44 = vsel %vm670_vm2, %v654_v27, %v678_v33  ;;  %v689_v47 = vsel %vm673_vm3, %v662_v32, %v681_v37  ;;  %v691_v48 = vsel %vm675_vm4, %v666_v34, %v683_v38 }
  0xfa   : > { %v685_v45 = vsel %vm669_vm5, %v652_v35, %v677_v39  ;;  %v687_v46 = vsel %vm671_vm6, %v656_v36, %v679_v40  ;;  %v692_v50 = vpack.c.bf16 %v686_v44, %v684_v43  ;;  %v680_v51 = vmul.f32 0.2, %v660_v41  ;;  %v1334_v40 = vld [vmem:[%s1879_s8] ss:$0 sm:$0xff] }
  0xfb   : > { %v693_v49 = vpack.c.bf16 %v687_v46, %v685_v45  ;;  %v682_v52 = vmul.f32 0.2, %v664_v42  ;;  %v695_v53 = vpack.c.bf16 %v691_v48, %v689_v47  ;;  %vm672_vm7 = vcmp.gt.f32.partialorder %v660_v41, 0.0 }
  0xfc   : > { %vm674_vm8 = vcmp.gt.f32.partialorder %v664_v42, 0.0  ;;  %v688_v54 = vsel %vm672_vm7, %v660_v41, %v680_v51 }
  0xfd   : > { %932 = vmatprep.mubr.bf16.mxu1 %v693_v49  ;;  %v690_v55 = vsel %vm674_vm8, %v664_v42, %v682_v52 }
  0xfe   : > { %933 = vmatmul.mubr.bf16.vlgmr.msra.gmra.mxu1 %v692_v50  ;;  %v694_v56 = vpack.c.bf16 %v690_v55, %v688_v54 }
  0xff   : > { %942 = vmatprep.mubr.bf16.mxu1 %v695_v53 }
 0x106   : > { %943 = vmatmul.mubr.bf16.gmra.mxu1 %v694_v56 }
 0x1be   : > { %v934_v3 = vpop.f32.mrf.mxu1 }
 0x1bf   : > { %v935_v6 = vadd.f32 %v934_v3, %v733_v2 }
 0x1c0   : > { %v936_v4 = vpop.f32.mrf.mxu1 }
 0x1c1   : > { %v937_v5 = vadd.f32 %v936_v4, %v737_v1  ;;  %v961_v16 = vmul.f32 0.2, %v935_v6  ;;  %vm953_vm11 = vcmp.gt.f32.partialorder %v935_v6, 0.0 }
 0x1c2   : > { %v938_v7 = vpop.f32.mrf.mxu1 }
 0x1c3   : > { %v939_v9 = vadd.f32 %v938_v7, %v733_v2  ;;  %v962_v12 = vmul.f32 0.2, %v937_v5  ;;  %vm954_vm10 = vcmp.gt.f32.partialorder %v937_v5, 0.0  ;;  %v969_v21 = vsel %vm953_vm11, %v935_v6, %v961_v16 }
 0x1c4   : > { %v940_v10 = vpop.f32.mrf.mxu1 }
 0x1c5   : > { %vm955_vm9 = vcmp.gt.f32.partialorder %v939_v9, 0.0  ;;  %v963_v13 = vmul.f32 0.2, %v939_v9  ;;  %v941_v15 = vadd.f32 %v940_v10, %v737_v1  ;;  %v970_v19 = vsel %vm954_vm10, %v937_v5, %v962_v12 }
 0x1c6   : > { %v944_v17 = vpop.f32.mrf.mxu1 }
 0x1c7   : > { %vm956_vm12 = vcmp.gt.f32.partialorder %v941_v15, 0.0  ;;  %v964_v8 = vmul.f32 0.2, %v941_v15  ;;  %v971_v14 = vsel %vm955_vm9, %v939_v9, %v963_v13  ;;  %v945_v22 = vadd.f32 %v944_v17, %v733_v2 }
 0x1c8   : > { %v946_v18 = vpop.f32.mrf.mxu1  ;;  %v977_v25 = vpack.c.bf16 %v971_v14, %v969_v21 }
 0x1c9   : > { %v947_v11 = vadd.f32 %v946_v18, %v737_v1  ;;  %v972_v20 = vsel %vm956_vm12, %v941_v15, %v964_v8  ;;  %v965_v31 = vmul.f32 0.2, %v945_v22  ;;  %vm957_vm15 = vcmp.gt.f32.partialorder %v945_v22, 0.0 }
 0x1ca   : > { %v948_v23 = vpop.f32.mrf.mxu1  ;;  %v978_v24 = vpack.c.bf16 %v972_v20, %v970_v19 }
 0x1cb   : > { %v949_v26 = vadd.f32 %v948_v23, %v733_v2  ;;  %v966_v28 = vmul.f32 0.2, %v947_v11  ;;  %vm958_vm14 = vcmp.gt.f32.partialorder %v947_v11, 0.0  ;;  %v973_v37 = vsel %vm957_vm15, %v945_v22, %v965_v31 }
 0x1cc   : > { %v950_v27 = vpop.f32.mrf.mxu1  ;;  %1148 = vmatprep.mubr.bf16.mxu0 %v978_v24 }
 0x1cd   : > { %vm959_vm13 = vcmp.gt.f32.partialorder %v949_v26, 0.0  ;;  %v967_v29 = vmul.f32 0.2, %v949_v26  ;;  %v951_v30 = vadd.f32 %v950_v27, %v737_v1  ;;  %1149 = vmatmul.mubr.bf16.vlgmr.msra.gmra.mxu0 %v977_v25  ;;  %v974_v34 = vsel %vm958_vm14, %v947_v11, %v966_v28 }
 0x1cf   : > { %vm960_vm0 = vcmp.gt.f32.partialorder %v951_v30, 0.0  ;;  %v968_v32 = vmul.f32 0.2, %v951_v30  ;;  %v975_v33 = vsel %vm959_vm13, %v949_v26, %v967_v29 }
 0x1d0   : > { %v979_v38 = vpack.c.bf16 %v975_v33, %v973_v37 }
 0x1d1   : > { %v976_v35 = vsel %vm960_vm0, %v951_v30, %v968_v32 }
 0x1d2   : > { %v980_v36 = vpack.c.bf16 %v976_v35, %v974_v34 }
 0x1d4   : > { %1156 = vmatprep.mubr.bf16.mxu0 %v980_v36 }
 0x1d5   : > { %1157 = vmatmul.mubr.bf16.gmra.mxu0 %v979_v38 }
 0x28d   : > { %v1371_v39 = vpop.f32.mrf.mxu0 }
 0x28f   : > { %v1372_v41 = vpop.f32.mrf.mxu0 }
 0x290   : > { %v1373_v42 = vadd.f32 %v1372_v41, %v1371_v39 }
 0x291   : > { %v1374_v43 = vpop.f32.mrf.mxu0 }
 0x292   : > { %v1151_v44 = vadd.f32 %v1373_v42, %v1334_v40 }
 0x293   : > { %v1375_v45 = vpop.f32.mrf.mxu0 }
 0x294   : > { %1165 = vst [vmem:[%s384_s21] sm:$0xff] %v1151_v44  ;;  %v1376_v46 = vadd.f32 %v1375_v45, %v1374_v43 }
 0x295   : > { %v1377_v47 = vpop.f32.mrf.mxu0 }
 0x296   : > { %v1154_v48 = vadd.f32 %v1376_v46, %v1334_v40 }
 0x297   : > { %v1378_v49 = vpop.f32.mrf.mxu0 }
 0x298   : > { %1166 = vst [vmem:[%s384_s21 + $0x8] sm:$0xff] %v1154_v48  ;;  %v1379_v50 = vadd.f32 %v1378_v49, %v1377_v47 }
 0x299   : > { %v1380_v51 = vpop.f32.mrf.mxu0 }
 0x29a   : > { %v1159_v52 = vadd.f32 %v1379_v50, %v1334_v40 }
 0x29b   : > { %v1381_v53 = vpop.f32.mrf.mxu0 }
 0x29c   : > { %1167 = vst [vmem:[%s384_s21 + $0x10] sm:$0xff] %v1159_v52  ;;  %v1382_v54 = vadd.f32 %v1381_v53, %v1380_v51 }
 0x29e   : > { %v1162_v55 = vadd.f32 %v1382_v54, %v1334_v40 }
 0x2a0   : > { %1168 = vst [vmem:[%s384_s21 + $0x18] sm:$0xff] %v1162_v55 }
 0x2a1 PF: > { %s19_s11 = sadd.s32 1, %s1532_s11   ;;  %s1881_s30 = smov %s1528_s10 }
 0x2a2   : > { %p16_p5 = scmp.ge.s32.totalorder %s19_s11, 4   ;;  %s1882_s10 = smov %s1884_s12 }
 0x2a4   :  { %18 = sbr.rel (!%p16_p5) target bundleno = 2 (0x2), region = 89 }

// kernel: _lambda_.18
= control target key start
LH: loop header
LB: loop body
LE: loop exit
PB: predicated region body
PF: predicated region fallthrough
CT: control target
= control target key end

     0   :  { %s1708_s17 = smov 0   ;;  %s1710_s18 = smov 0   ;;  %s1889_s0 = inlined_call_operand.vmem [shape: bf16[2,32,64], index: 0, kind: input, shape index: {}]   ;;  %s1890_s1 = inlined_call_operand.vmem [shape: bf16[2,32,64], index: 1, kind: input, shape index: {}]   ;;  %s1891_s2 = inlined_call_operand.vmem [shape: bf16[2,32,128], index: 2, kind: input, shape index: {}]   ;;  %s1892_s3 = inlined_call_operand.vmem [shape: bf16[2,32,256], index: 3, kind: input, shape index: {}]   ;;  %s1893_s4 = inlined_call_operand.vmem [shape: bf16[64,64], index: 4, kind: input, shape index: {}]   ;;  %s1894_s5 = inlined_call_operand.vmem [shape: bf16[64,64], index: 5, kind: input, shape index: {}]   ;;  %s1895_s6 = inlined_call_operand.vmem [shape: bf16[128,64], index: 6, kind: input, shape index: {}]   ;;  %s1896_s7 = inlined_call_operand.vmem [shape: bf16[256,64], index: 7, kind: input, shape index: {}]   ;;  %s1897_s8 = inlined_call_operand.vmem [shape: f32[1,64], index: 8, kind: input, shape index: {}]   ;;  %s1898_s9 = inlined_call_operand.vmem [shape: bf16[2,32,64], index: 9, kind: output, shape index: {0}]   ;;  %s1899_s10 = inlined_call_operand.vmem [shape: f32[2,1,64], index: 10, kind: output, shape index: {1}]   ;;  %s1900_s11 = inlined_call_operand.vmem [shape: f32[2,1,64], index: 11, kind: output, shape index: {2}]  }
   0x1   :  { %s1712_s19 = smov 0  }
   0x2 LB: > { %s34_s20 = sadd.s32 1, %s1642_s18  ;;  %p1389_p0 = scmp.ge.s32.totalorder %s1646_s19, 1  ;;  %s1646_s19 = sphi %s1712_s19, %s22_s19   ;;  %s1642_s18 = sphi %s1710_s18, %s1902_s18   ;;  %s1638_s17 = sphi %s1708_s17, %s1901_s17  }
   0x3   : > { %p36_p1 = scmp.ge.s32.totalorder %s34_s20, 2  ;;  %p415_p2 = scmp.lt.s32.totalorder %s1646_s19, 3 }
   0x5   : > { %s1904_s20 = smov (%p36_p1, %s34_s20), 0  ;;  %p416_p3 = pnand %p1389_p0, %p415_p2 }
   0x6   : > { %p498_p4 = scmp.lt.s32.totalorder (!%p416_p3), %s1638_s17, 1 }
   0x7   : > { %419 = sbr.rel (%p416_p3) target bundleno = 304 (0x130), region = 56 }
   0xc   : > { %v1580_v0 = vld [vmem:[%s1894_s5 + $0x18] sm:$0xff]   ;;  %v1582_v2 = vld [vmem:[%s1894_s5 + $0x10] sm:$0xff]   ;;  %s1906_s17 = smov (!%p498_p4, %s1638_s17), 1  ;;  %v1584_v4 = vld [vmem:[%s1894_s5 + $0x8] sm:$0xff]   ;;  %vm613_vm0 = vcmask 523264   ;;  %vm1135_vm2 = vcmask 519168  }
   0xd   : > { %v1581_v1 = vld [vmem:[%s1893_s4 + $0x18] sm:$0xff]   ;;  %1512 = vmatprep.subr.bf16.mxu0 %v1580_v0  ;;  %v1583_v3 = vld [vmem:[%s1893_s4 + $0x10] sm:$0xff]   ;;  %s1744_s12 = sshll.u32 %s1906_s17, 4  ;;  %v1585_v5 = vld [vmem:[%s1893_s4 + $0x8] sm:$0xff]   ;;  %s1456_s15 = sshll.u32 %s1906_s17, 5  ;;  %vm1170_vm6 = vcmask 516096  }
   0xe   : > { %1524 = vmatprep.subr.bf16.mxu1 %v1581_v1  ;;  %1513 = vmatpush3.bf16.msra.mxu0 %v1580_v0  ;;  %s515_s21 = scalar_lea.vmem %s1890_s1, %s1744_s12  ;;  %v1586_v6 = vld [vmem:[%s1894_s5] sm:$0xff]   ;;  %s505_s26 = scalar_lea.vmem %s1889_s0, %s1744_s12  ;;  %v1592_v11 = vld [vmem:[%s1895_s6 + $0x38] sm:$0xff]   ;;  %v1595_v15 = vld [vmem:[%s1895_s6 + $0x30] sm:$0xff]  }
   0xf   : > { %1525 = vmatpush3.bf16.msra.mxu1 %v1581_v1  ;;  %1514 = vmatprep.subr.bf16.mxu0 %v1582_v2  ;;  %v1587_v7 = vld [vmem:[%s1893_s4] sm:$0xff]   ;;  %v1590_v10 = vld [vmem:[%s515_s21 + $0x8] sm:$0xff]   ;;  %v1593_v12 = vld [vmem:[%s1896_s7 + $0x78] sm:$0xff]   ;;  %s525_s24 = scalar_lea.vmem %s1891_s2, %s1744_s12  ;;  %s536_s13 = scalar_lea.vmem %s1892_s3, %s1456_s15 }
  0x10   : > { %1526 = vmatprep.subr.bf16.mxu1 %v1583_v3  ;;  %v1588_v8 = vld [vmem:[%s515_s21] sm:$0xff]   ;;  %v1591_v13 = vld [vmem:[%s505_s26 + $0x8] sm:$0xff]   ;;  %v1594_v14 = vld [vmem:[%s1896_s7 + $0x38] sm:$0xff]   ;;  %s1854_s14 = scalar_lea.vmem %s1898_s9, %s1744_s12  ;;  %s553_s22 = scalar_lea.vmem %s1900_s11, %s1906_s17 }
  0x11   : > { %v1589_v9 = vld [vmem:[%s505_s26] sm:$0xff]   ;;  %1520 = vmatprep.mubr.msk.bf16.mxu0 %vm613_vm0, %v1588_v8  ;;  %v1596_v16 = vld [vmem:[%s1896_s7 + $0x70] sm:$0xff]   ;;  %v1598_v18 = vld [vmem:[%s1895_s6 + $0x28] sm:$0xff]   ;;  %s550_s25 = scalar_lea.vmem %s1899_s10, %s1906_s17 }
  0x12   : > { %1515 = vmatpush3.bf16.msra.mxu0 %v1582_v2  ;;  %1532 = vmatprep.mubr.msk.bf16.mxu1 %vm613_vm0, %v1589_v9  ;;  %v1597_v17 = vld [vmem:[%s1896_s7 + $0x30] sm:$0xff]   ;;  %v1599_v19 = vld [vmem:[%s1896_s7 + $0x68] sm:$0xff]   ;;  %v1601_v21 = vld [vmem:[%s1895_s6 + $0x20] sm:$0xff]  }
  0x13   : > { %1527 = vmatpush3.bf16.msra.mxu1 %v1583_v3  ;;  %1516 = vmatprep.subr.bf16.mxu0 %v1584_v4  ;;  %v1600_v20 = vld [vmem:[%s1896_s7 + $0x28] sm:$0xff]   ;;  %v1602_v22 = vld [vmem:[%s1896_s7 + $0x60] sm:$0xff]   ;;  %v1604_v24 = vld [vmem:[%s1895_s6 + $0x18] sm:$0xff]  }
  0x14   : > { %1528 = vmatprep.subr.bf16.mxu1 %v1585_v5  ;;  %v1603_v23 = vld [vmem:[%s1896_s7 + $0x20] sm:$0xff]   ;;  %v1605_v25 = vld [vmem:[%s1896_s7 + $0x58] sm:$0xff]   ;;  %v1607_v27 = vld [vmem:[%s1895_s6 + $0x10] sm:$0xff]  }
  0x15   : > { %v1606_v26 = vld [vmem:[%s1896_s7 + $0x18] sm:$0xff]   ;;  %v1608_v28 = vld [vmem:[%s1896_s7 + $0x50] sm:$0xff]   ;;  %v1610_v30 = vld [vmem:[%s1895_s6 + $0x8] sm:$0xff]  }
  0x16   : > { %1517 = vmatpush3.bf16.msra.mxu0 %v1584_v4  ;;  %v1609_v29 = vld [vmem:[%s1896_s7 + $0x10] sm:$0xff]   ;;  %v1616_v31 = vld [vmem:[%s525_s24] sm:$0xff]   ;;  %v1611_v32 = vld [vmem:[%s1896_s7 + $0x48] sm:$0xff]  }
  0x17   : > { %1529 = vmatpush3.bf16.msra.mxu1 %v1585_v5  ;;  %1518 = vmatprep.subr.bf16.mxu0 %v1586_v6  ;;  %v1619_v33 = vld [vmem:[%s536_s13 + $0x4] ss:$8 sps:$4 sm:$0xff]   ;;  %v1617_v39 = vld [vmem:[%s536_s13] ss:$8 sps:$4 sm:$0xff]   ;;  %v1621_v40 = vld [vmem:[%s536_s13 + $0x14] ss:$8 sps:$4 sm:$0xff]  }
  0x18   : > { %1530 = vmatprep.subr.bf16.mxu1 %v1587_v7  ;;  %v1612_v34 = vld [vmem:[%s1896_s7 + $0x8] sm:$0xff]   ;;  %v1613_v35 = vld [vmem:[%s1895_s6] sm:$0xff]   ;;  %v1623_v41 = vld [vmem:[%s536_s13 + $0x10] ss:$8 sps:$4 sm:$0xff]  }
  0x19   : > { %v1614_v36 = vld [vmem:[%s1896_s7 + $0x40] sm:$0xff]   ;;  %v1620_v38 = vld [vmem:[%s525_s24 + $0x8] sm:$0xff]  }
  0x1a   : > { %1519 = vmatpush3.bf16.msra.mxu0 %v1586_v6  ;;  %v1615_v37 = vld [vmem:[%s1896_s7] sm:$0xff]  }
  0x1b   : > { %1531 = vmatpush3.bf16.msra.mxu1 %v1587_v7  ;;  %1536 = vmatprep.subr.bf16.mxu0 %v1592_v11  ;;  %v1446_v59 = vld [vmem:[%s1897_s8] ss:$0 sm:$0xff] }
  0x1c   : > { %1484 = vmatprep.subr.bf16.mxu1 %v1593_v12 }
  0x1d   : > { %1521 = vmatmul.mubr.msk.bf16.vlgmr.msra.gmra.mxu0 %vm613_vm0, %v1590_v10 }
  0x1e   : > { %1533 = vmatmul.mubr.msk.bf16.vlgmr.msra.gmra.mxu1 %vm613_vm0, %v1591_v13  ;;  %1537 = vmatpush3.bf16.msra.mxu0 %v1592_v11 }
  0x1f   : > { %1485 = vmatpush3.bf16.msra.mxu1 %v1594_v14  ;;  %1538 = vmatprep.subr.bf16.mxu0 %v1595_v15 }
  0x20   : > { %1486 = vmatprep.subr.bf16.mxu1 %v1596_v16  ;;  %1552 = vmatprep.mubr.bf16.mxu0 %v1616_v31 }
  0x21   : > { %1075 = vmatprep.mubr.bf16.mxu1 %v1619_v33 }
  0x22   : > { %1539 = vmatpush3.bf16.msra.mxu0 %v1595_v15 }
  0x23   : > { %1487 = vmatpush3.bf16.msra.mxu1 %v1597_v17  ;;  %1540 = vmatprep.subr.bf16.mxu0 %v1598_v18 }
  0x24   : > { %1488 = vmatprep.subr.bf16.mxu1 %v1599_v19 }
  0x26   : > { %1541 = vmatpush3.bf16.msra.mxu0 %v1598_v18 }
  0x27   : > { %1489 = vmatpush3.bf16.msra.mxu1 %v1600_v20  ;;  %1542 = vmatprep.subr.bf16.mxu0 %v1601_v21 }
  0x28   : > { %1490 = vmatprep.subr.bf16.mxu1 %v1602_v22 }
  0x2a   : > { %1543 = vmatpush3.bf16.msra.mxu0 %v1601_v21 }
  0x2b   : > { %1491 = vmatpush3.bf16.msra.mxu1 %v1603_v23  ;;  %1544 = vmatprep.subr.bf16.mxu0 %v1604_v24 }
  0x2c   : > { %1492 = vmatprep.subr.bf16.mxu1 %v1605_v25 }
  0x2e   : > { %1545 = vmatpush3.bf16.msra.mxu0 %v1604_v24 }
  0x2f   : > { %1493 = vmatpush3.bf16.msra.mxu1 %v1606_v26  ;;  %1546 = vmatprep.subr.bf16.mxu0 %v1607_v27 }
  0x30   : > { %1494 = vmatprep.subr.bf16.mxu1 %v1608_v28 }
  0x32   : > { %1547 = vmatpush3.bf16.msra.mxu0 %v1607_v27 }
  0x33   : > { %1495 = vmatpush3.bf16.msra.mxu1 %v1609_v29  ;;  %1548 = vmatprep.subr.bf16.mxu0 %v1610_v30 }
  0x34   : > { %1496 = vmatprep.subr.bf16.mxu1 %v1611_v32 }
  0x36   : > { %1549 = vmatpush3.bf16.msra.mxu0 %v1610_v30 }
  0x37   : > { %1497 = vmatpush3.bf16.msra.mxu1 %v1612_v34  ;;  %1550 = vmatprep.subr.bf16.mxu0 %v1613_v35 }
  0x38   : > { %1498 = vmatprep.subr.bf16.mxu1 %v1614_v36 }
  0x3a   : > { %1551 = vmatpush3.bf16.msra.mxu0 %v1613_v35 }
  0x3b   : > { %1499 = vmatpush3.bf16.msra.mxu1 %v1615_v37 }
  0x3d   : > { %1553 = vmatmul.mubr.bf16.vlgmr.msra.gmra.mxu0 %v1620_v38 }
  0x3e   : > { %1076 = vmatmul.mubr.bf16.vlgmr.msra.gmra.mxu1 %v1617_v39 }
  0x3f   : > { %1083 = vmatprep.mubr.bf16.mxu1 %v1621_v40 }
  0x46   : > { %1084 = vmatmul.mubr.bf16.gmra.mxu1 %v1623_v41 }
  0xdd   : > { %v1522_v42 = vpop.f32.mrf.mxu0 }
  0xde   : > { %v1534_v43 = vpop.f32.mrf.mxu1 }
  0xdf   : > { %v654_v44 = vpop.f32.mrf.mxu0  ;;  %v752_v4 = vadd.f32 %v1534_v43, %v1522_v42 }
  0xe0   : > { %v743_v45 = vpop.f32.mrf.mxu1 }
  0xe1   : > { %v1523_v46 = vpop.f32.mrf.mxu0  ;;  %v744_v51 = vadd.f32 %v743_v45, %v654_v44 }
  0xe2   : > { %v1535_v47 = vpop.f32.mrf.mxu1 }
  0xe3   : > { %v657_v48 = vpop.f32.mrf.mxu0  ;;  %v755_v16 = vadd.f32 %v1535_v47, %v1523_v46 }
  0xe4   : > { %v746_v49 = vpop.f32.mrf.mxu1 }
  0xe5   : > { %v747_v58 = vadd.f32 %v746_v49, %v657_v48 }
  0xfd   : > { %v1554_v50 = vpop.f32.mrf.mxu0 }
  0xfe   : > { %v1500_v52 = vpop.f32.mrf.mxu1  ;;  %v889_v8 = vadd.f32 %v1554_v50, %v752_v4 }
  0xff   : > { %v872_v53 = vpop.f32.mrf.mxu0 }
 0x100   : > { %v887_v54 = vadd.f32 %v872_v53, %v744_v51  ;;  %v1501_v55 = vpop.f32.mrf.mxu1 }
 0x101   : > { %v1502_v56 = vadd.f32 %v1501_v55, %v1500_v52  ;;  %v1555_v57 = vpop.f32.mrf.mxu0 }
 0x102   : > { %v1503_v60 = vpop.f32.mrf.mxu1  ;;  %v890_v21 = vadd.f32 %v1555_v57, %v755_v16 }
 0x103   : > { %v1092_v61 = vadd.f32 %v1502_v56, %v887_v54  ;;  %v875_v62 = vpop.f32.mrf.mxu0 }
 0x104   : > { %v888_v63 = vadd.f32 %v875_v62, %v747_v58  ;;  %v1504_v0 = vpop.f32.mrf.mxu1 }
 0x105   : > { %v1103_v1 = vadd.f32 %v1446_v59, %v1092_v61  ;;  %v1505_v2 = vadd.f32 %v1504_v0, %v1503_v60 }
 0x106   : > { %v1506_v3 = vpop.f32.mrf.mxu1 }
 0x107   : > { %vm1107_vm1 = vcmp.gt.f32.partialorder %v1103_v1, 0.0  ;;  %v1111_v5 = vmul.f32 0.2, %v1103_v1  ;;  %v1093_v6 = vadd.f32 %v1505_v2, %v888_v63 }
 0x108   : > { %v1507_v7 = vpop.f32.mrf.mxu1 }
 0x109   : > { %v1115_v9 = vsel %vm1107_vm1, %v1103_v1, %v1111_v5  ;;  %v1104_v10 = vadd.f32 %v1446_v59, %v1093_v6  ;;  %v1508_v11 = vadd.f32 %v1507_v7, %v1506_v3 }
 0x10a   : > { %v1458_v12 = vpack.c.bf16 %v1115_v9, %v1115_v9  ;;  %v1509_v13 = vpop.f32.mrf.mxu1  ;;  %v1153_v29 = vsel %vm613_vm0, %v1115_v9, 0.0  ;;  %v1140_v34 = vsel %vm613_vm0, %v1115_v9, -inf }
 0x10b   : > { %vm1108_vm3 = vcmp.gt.f32.partialorder %v1104_v10, 0.0  ;;  %v1112_v14 = vmul.f32 0.2, %v1104_v10  ;;  %v1094_v15 = vadd.f32 %v1508_v11, %v889_v8 }
 0x10c   : > { %1136 = vst.msk [vmem:[%s1854_s14] sm:$0xf] %vm1135_vm2, %v1458_v12  ;;  %v1510_v17 = vpop.f32.mrf.mxu1 }
 0x10d   : > { %v1116_v18 = vsel %vm1108_vm3, %v1104_v10, %v1112_v14  ;;  %v1105_v19 = vadd.f32 %v1446_v59, %v1094_v15  ;;  %v1511_v20 = vadd.f32 %v1510_v17, %v1509_v13 }
 0x10e   : > { %v1459_v22 = vpack.c.bf16 %v1116_v18, %v1116_v18  ;;  %v1154_v25 = vsel %vm613_vm0, %v1116_v18, 0.0  ;;  %v1141_v33 = vsel %vm613_vm0, %v1116_v18, -inf }
 0x10f   : > { %vm1109_vm4 = vcmp.gt.f32.partialorder %v1105_v19, 0.0  ;;  %v1113_v23 = vmul.f32 0.2, %v1105_v19  ;;  %v1095_v24 = vadd.f32 %v1511_v20, %v890_v21  ;;  %v1155_v31 = vadd.f32 %v1154_v25, %v1153_v29 }
 0x110   : > { %1137 = vst.msk [vmem:[%s1854_s14 + $0x4] sm:$0xf] %vm1135_vm2, %v1459_v22  ;;  %v1144_v41 = vmax.f32 %v1140_v34, %v1141_v33 }
 0x111   : > { %v1117_v26 = vsel %vm1109_vm4, %v1105_v19, %v1113_v23  ;;  %v1106_v28 = vadd.f32 %v1446_v59, %v1095_v24 }
 0x112   : > { %v1460_v27 = vpack.c.bf16 %v1117_v26, %v1117_v26  ;;  %v1156_v30 = vsel %vm613_vm0, %v1117_v26, 0.0  ;;  %v1142_v37 = vsel %vm613_vm0, %v1117_v26, -inf }
 0x113   : > { %vm1110_vm5 = vcmp.gt.f32.partialorder %v1106_v28, 0.0  ;;  %v1114_v32 = vmul.f32 0.2, %v1106_v28  ;;  %v1157_v35 = vadd.f32 %v1156_v30, %v1155_v31 }
 0x114   : > { %1138 = vst.msk [vmem:[%s1854_s14 + $0x8] sm:$0xf] %vm1135_vm2, %v1460_v27 }
 0x115   : > { %v1118_v36 = vsel %vm1110_vm5, %v1106_v28, %v1114_v32 }
 0x116   : > { %v1461_v38 = vpack.c.bf16 %v1118_v36, %v1118_v36  ;;  %v1143_v39 = vsel %vm613_vm0, %v1118_v36, -inf  ;;  %v1158_v40 = vsel %vm613_vm0, %v1118_v36, 0.0 }
 0x117   : > { %v1145_v42 = vmax.f32 %v1142_v37, %v1143_v39  ;;  %v1159_v43 = vadd.f32 %v1158_v40, %v1157_v35 }
 0x118   : > { %1139 = vst.msk [vmem:[%s1854_s14 + $0xc] sm:$0xf] %vm1135_vm2, %v1461_v38 }
 0x119   : > { %v1146_v44 = vmax.f32 %v1144_v41, %v1145_v42  ;;  %v1160_v45 = vrot.slane %v1159_v43, 4 }
 0x11b   : > { %v1147_v46 = vrot.slane %v1146_v44, 4  ;;  %v1161_v47 = vadd.f32 %v1160_v45, %v1159_v43 }
 0x11d   : > { %v1148_v48 = vmax.f32 %v1146_v44, %v1147_v46  ;;  %v1162_v49 = vrot.slane %v1161_v47, 2 }
 0x11f   : > { %v1149_v50 = vrot.slane %v1148_v48, 2  ;;  %v1163_v51 = vadd.f32 %v1162_v49, %v1161_v47 }
 0x121   : > { %v1150_v52 = vmax.f32 %v1148_v48, %v1149_v50  ;;  %v1164_v53 = vrot.slane %v1163_v51, 1 }
 0x123   : > { %v1151_v54 = vrot.slane %v1150_v52, 1  ;;  %v1165_v55 = vadd.f32 %v1164_v53, %v1163_v51 }
 0x125   : > { %v1152_v56 = vmax.f32 %v1150_v52, %v1151_v54  ;;  %1172 = vst.msk [vmem:[%s553_s22] sm:$0x1] %vm1170_vm6, %v1165_v55 }
 0x127   : > { %1171 = vst.msk [vmem:[%s550_s25] sm:$0x1] %vm1170_vm6, %v1152_v56 }
 0x12c   : > { %v1187_v57 = vld [vmem:[%s553_s22] sm:$0x1] }
 0x12d   : > { %v1188_v58 = vmul.f32 0.03125, %v1187_v57 }
 0x12f   : > { %1190 = vst.msk [vmem:[%s553_s22] sm:$0x1] %vm1170_vm6, %v1188_v58 }
 0x130 PF: > { %s22_s19 = sadd.s32 1, %s1646_s19   ;;  %s1901_s17 = smov %s1642_s18 }
 0x131   : > { %p19_p5 = scmp.ge.s32.totalorder %s22_s19, 4   ;;  %s1902_s18 = smov %s1904_s20 }
 0x133   :  { %21 = sbr.rel (!%p19_p5) target bundleno = 2 (0x2), region = 131 }

</bundles_post_ra>
